<compile_context>
chip_gen: v7x
topology: tpu7x:2x2x1
jax: 0.10.0
libtpu: 0.0.40
codegen_flags: <defaults>
</compile_context>

<pallas_src>
import functools

import jax
import jax.numpy as jnp
from jax.experimental import pallas as pl
from jax.experimental.pallas import tpu as pltpu


def _toeplitz_conv_weight(w_oihw, W):
    """(Cout, Cin, 3, 3) PyTorch weight -> (3*W*Cin, W*Cout) block-Toeplitz matrix.

    out[h, w*Cout+co] = sum_{dy,wu,ci} xstack[dy][h, wu*Cin + ci]
                                       * big[dy*W*Cin + wu*Cin + ci, w*Cout + co]
    where xstack slab dy holds unpadded input row (h+dy-1) (zeros at the H
    border).  The W-border zero padding is encoded as zeros in `big`.
    """
    Cout, Cin = w_oihw.shape[0], w_oihw.shape[1]
    k = jnp.transpose(w_oihw, (2, 3, 1, 0))          # (3, 3, Cin, Cout) HWIO
    wu = jnp.arange(W)[:, None]                      # input column
    wo = jnp.arange(W)[None, :]                      # output column
    dx = wu - wo + 1                                 # horizontal tap, valid in [0, 2]
    mask = (dx >= 0) & (dx <= 2)
    g = k[:, jnp.clip(dx, 0, 2), :, :]               # (3, W, W, Cin, Cout)
    g = jnp.where(mask[None, :, :, None, None], g, 0.0)
    g = jnp.transpose(g, (0, 1, 3, 2, 4))            # (dy, wu, ci, wo, co)
    return g.reshape(3 * W * Cin, W * Cout)


def _pick_batch_block(N, H):
    """Batch sub-block NB.  M = NB*H rows per MXU matmul: aim for >=256 (fills
    the 256-row MXU on v6e/v7x; several 128-row passes on v5e).  If the batch is
    large, grow the block (amortize the ~0.35us/step overhead) while keeping
    >= 8 grid steps (>= 4 per TensorCore on v7x) so the pipeline can overlap."""
    nb = max(1, min(N, pl.cdiv(256, H)))
    if N // nb >= 8:
        nb = min(N // 8, max(nb, pl.cdiv(2048, H)))
    # Blocks must tile the batch exactly so the fused BN statistics never see
    # padded rows.
    while N % nb:
        nb -= 1
    return nb


def _compiler_params():
    try:
        kind = jax.devices()[0].device_kind.lower()
    except Exception:  # pragma: no cover - defensive, keeps the script runnable
        kind = ""
    if "v7" in kind:
        vmem_bytes = 48 * 1024 * 1024     # 64 MiB physical per core: leave headroom
    elif "v5" in kind or "v6" in kind:
        vmem_bytes = 100 * 1024 * 1024    # 128 MiB physical
    else:
        vmem_bytes = 64 * 1024 * 1024
    return pltpu.CompilerParams(
        dimension_semantics=("parallel",),   # batch-block axis -> megacore on v7x
        vmem_limit_bytes=vmem_bytes,
    )


def _conv3x3_rows(xm, w_ref, pad_ref, NB, H):
    """3x3 'SAME' conv over a (M=NB*H, S_in) row stack of NB images.

    The W axis and the 3 horizontal taps live in the contraction via the
    block-Toeplitz weight (w_ref: (3*S_in, S_out)).  The 3 vertical taps are 3
    MXU matmuls against sublane-shifted *views* of a single padded copy of the
    rows: one store through the vst slot instead of three replicated copies.
    The H-border zeros come from the pad rows; per-image boundaries inside the
    flattened batch block are masked on the VPU."""
    M, S = xm.shape
    zrow = jnp.zeros((1, S), pad_ref.dtype)
    pad_ref[0:1, :] = zrow                    # top halo (row -1 of image 0)
    pad_ref[1:M + 1, :] = xm                  # single copy of the block
    pad_ref[M + 1:M + 2, :] = zrow            # bottom halo (row H of last image)

    xu = pad_ref[0:M, :]                      # row h-1  (dy = 0 slab)
    xd = pad_ref[2:M + 2, :]                  # row h+1  (dy = 2 slab)
    if NB > 1:
        # Zero the rows whose shifted source crossed an image boundary.
        h = jax.lax.broadcasted_iota(jnp.int32, (M, 1), 0) % H
        xu = jnp.where(h == 0, jnp.zeros_like(xu), xu)
        xd = jnp.where(h == H - 1, jnp.zeros_like(xd), xd)

    acc = jnp.dot(xm, w_ref[S:2 * S, :], preferred_element_type=jnp.float32)
    acc = acc + jnp.dot(xu, w_ref[0:S, :], preferred_element_type=jnp.float32)
    acc = acc + jnp.dot(xd, w_ref[2 * S:3 * S, :], preferred_element_type=jnp.float32)
    return acc                                # (M, S_out) f32


def conv1_stats_kernel(x_ref, w1_ref, y1_ref, csum_ref, csq_ref, pad_ref):
    # x_ref   : (NB, H, W*Cin)     bf16  input slab (channels-last, W in lanes)
    # w1_ref  : (3*W*Cin, W*Cout)  bf16  block-Toeplitz conv1 weight (grid-invariant)
    # y1_ref  : (NB, H, W*Cout)    bf16  conv1 output (pre-BN), bf16 to halve HBM traffic
    # csum_ref: (1, 1, W*Cout)     f32   per-(w, cout) column sums   (BN stats partial)
    # csq_ref : (1, 1, W*Cout)     f32   per-(w, cout) column sum-sq (BN stats partial)
    # pad_ref : (NB*H + 8, W*Cin)  bf16  scratch: single H-padded copy of the rows
    NB, H, S_in = x_ref.shape
    S_out = y1_ref.shape[2]
    M = NB * H
    xm = x_ref[...].reshape(M, S_in)
    acc = _conv3x3_rows(xm, w1_ref, pad_ref, NB, H)        # (M, W*Cout) f32
    y1_ref[...] = acc.reshape(NB, H, S_out).astype(y1_ref.dtype)
    # BN batch-statistic partials fused into the conv1 epilogue (from the f32
    # accumulator, before the bf16 downcast).
    csum_ref[0] = jnp.sum(acc, axis=0, keepdims=True)
    csq_ref[0] = jnp.sum(acc * acc, axis=0, keepdims=True)


def bn_relu_conv2_kernel(y1_ref, scale_ref, shift_ref, w2_ref, b2_ref,
                         out_ref, pad_ref):
    # y1_ref   : (NB, H, W*Cout)     bf16  conv1 output (pre-BN)
    # scale_ref: (1, W*Cout)         f32   gamma * rsqrt(var+eps), tiled over W
    # shift_ref: (1, W*Cout)         f32   beta - mean*scale,      tiled over W
    # w2_ref   : (3*W*Cout, W*Cout)  bf16  block-Toeplitz conv2 weight (grid-invariant)
    # b2_ref   : (1, W*Cout)         f32   conv2 bias, tiled over W
    # out_ref  : (NB, H, W*Cout)     f32
    # pad_ref  : (NB*H + 8, W*Cout)  bf16  scratch
    NB, H, S = y1_ref.shape
    M = NB * H
    y1 = y1_ref[...].reshape(M, S).astype(jnp.float32)
    # BN affine (batch stats pre-folded into scale/shift) + ReLU in f32 on the
    # VPU (v5e has no bf16 VALU path; keeps BN precision).
    y1 = jnp.maximum(y1 * scale_ref[...] + shift_ref[...], 0.0)
    acc = _conv3x3_rows(y1.astype(jnp.bfloat16), w2_ref, pad_ref, NB, H)
    out = jnp.maximum(acc + b2_ref[...], 0.0)
    out_ref[...] = out.reshape(NB, H, S).astype(out_ref.dtype)


@functools.partial(jax.jit, static_argnames=("single_buffer_weights",))
def conv_block_forward(x_nchw, params, single_buffer_weights=True):
    """PyTorch-equivalent ConvBlock.forward (training-mode BatchNorm). NCHW in/out."""
    N, Cin, H, W = x_nchw.shape
    Cout = params["w1"].shape[0]
    eps = 1e-5

    NB = _pick_batch_block(N, H)
    G = N // NB

    # --- glue: NCHW -> (N, H, W*C) lane-dense channels-last, bf16 MXU operands.
    # (If the consumer accepted NHWC/bf16 these wrapper transposes could be dropped.)
    x = jnp.transpose(x_nchw, (0, 2, 3, 1)).reshape(N, H, W * Cin).astype(jnp.bfloat16)
    w1big = _toeplitz_conv_weight(params["w1"], W).astype(jnp.bfloat16)
    w2big = _toeplitz_conv_weight(params["w2"], W).astype(jnp.bfloat16)

    cparams = _compiler_params()

    def _weight_spec(shape):
        # Grid-invariant weight: single buffer (largest resident arrays at real
        # sizes).  Fallback keeps the default double-buffering if Buffered(1)
        # is rejected by this JAX version.
        if single_buffer_weights:
            return pl.BlockSpec(shape, lambda g: (0, 0), pipeline_mode=pl.Buffered(1))
        return pl.BlockSpec(shape, lambda g: (0, 0))

    # --- pass 1: conv1 + fused sum / sumsq partials (for BN batch stats) --------
    y1, csum, csq = pl.pallas_call(
        conv1_stats_kernel,
        grid=(G,),
        in_specs=[
            pl.BlockSpec((NB, H, W * Cin), lambda g: (g, 0, 0)),
            _weight_spec((3 * W * Cin, W * Cout)),
        ],
        out_specs=[
            pl.BlockSpec((NB, H, W * Cout), lambda g: (g, 0, 0)),
            pl.BlockSpec((1, 1, W * Cout), lambda g: (g, 0, 0)),
            pl.BlockSpec((1, 1, W * Cout), lambda g: (g, 0, 0)),
        ],
        out_shape=[
            jax.ShapeDtypeStruct((N, H, W * Cout), jnp.bfloat16),
            jax.ShapeDtypeStruct((G, 1, W * Cout), jnp.float32),
            jax.ShapeDtypeStruct((G, 1, W * Cout), jnp.float32),
        ],
        scratch_shapes=[pltpu.VMEM((NB * H + 8, W * Cin), jnp.bfloat16)],
        compiler_params=cparams,
    )(x, w1big)

    # --- O(C) glue: finish BN batch stats, fold affine into scale/shift ---------
    cnt = N * H * W
    mean = jnp.sum(csum, axis=(0, 1)).reshape(W, Cout).sum(axis=0) / cnt
    ex2 = jnp.sum(csq, axis=(0, 1)).reshape(W, Cout).sum(axis=0) / cnt
    var = ex2 - mean * mean                  # biased variance (training-mode BN)
    scale_c = params["gamma"] * jax.lax.rsqrt(var + eps)
    shift_c = params["beta"] - mean * scale_c
    scale = jnp.tile(scale_c, W).reshape(1, W * Cout).astype(jnp.float32)
    shift = jnp.tile(shift_c, W).reshape(1, W * Cout).astype(jnp.float32)
    b2 = jnp.tile(params["b2"], W).reshape(1, W * Cout).astype(jnp.float32)
    # TODO(synk): running_mean/running_var buffer updates (training side effect)
    # are not materialized; the returned tensor does not depend on them.

    # --- pass 2: BN affine + ReLU + conv2 + bias + ReLU --------------------------
    out = pl.pallas_call(
        bn_relu_conv2_kernel,
        grid=(G,),
        in_specs=[
            pl.BlockSpec((NB, H, W * Cout), lambda g: (g, 0, 0)),
            pl.BlockSpec((1, W * Cout), lambda g: (0, 0)),
            pl.BlockSpec((1, W * Cout), lambda g: (0, 0)),
            _weight_spec((3 * W * Cout, W * Cout)),
            pl.BlockSpec((1, W * Cout), lambda g: (0, 0)),
        ],
        out_specs=pl.BlockSpec((NB, H, W * Cout), lambda g: (g, 0, 0)),
        out_shape=jax.ShapeDtypeStruct((N, H, W * Cout), jnp.float32),
        scratch_shapes=[pltpu.VMEM((NB * H + 8, W * Cout), jnp.bfloat16)],
        compiler_params=cparams,
    )(y1, scale, shift, w2big, b2)

    # lane-dense (N, H, W*Cout) slab -> NCHW for the PyTorch-convention caller.
    return jnp.transpose(out.reshape(N, H, W, Cout), (0, 3, 1, 2))


def ref_forward(x_nchw, params):
    """Pure-JAX f32 reference (mirrors the PyTorch forward, training-mode BN)."""
    dn = ("NCHW", "OIHW", "NCHW")
    y = jax.lax.conv_general_dilated(x_nchw, params["w1"], (1, 1), "SAME",
                                     dimension_numbers=dn)
    mean = jnp.mean(y, axis=(0, 2, 3), keepdims=True)
    var = jnp.mean((y - mean) ** 2, axis=(0, 2, 3), keepdims=True)
    y = (y - mean) * jax.lax.rsqrt(var + 1e-5)
    y = y * params["gamma"].reshape(1, -1, 1, 1) + params["beta"].reshape(1, -1, 1, 1)
    y = jnp.maximum(y, 0.0)
    y = jax.lax.conv_general_dilated(y, params["w2"], (1, 1), "SAME",
                                     dimension_numbers=dn)
    y = y + params["b2"].reshape(1, -1, 1, 1)
    return jnp.maximum(y, 0.0)


if __name__ == "__main__":
    N, Cin, Cout, H, W = 2, 4, 8, 16, 16
    key = jax.random.PRNGKey(0)
    kx, k1, k2, kg, kb, kc = jax.random.split(key, 6)

    x = jax.random.normal(kx, (N, Cin, H, W), jnp.float32)
    params = {
        "w1": 0.2 * jax.random.normal(k1, (Cout, Cin, 3, 3), jnp.float32),
        "w2": 0.2 * jax.random.normal(k2, (Cout, Cout, 3, 3), jnp.float32),
        "gamma": 1.0 + 0.1 * jax.random.normal(kg, (Cout,), jnp.float32),
        "beta": 0.1 * jax.random.normal(kb, (Cout,), jnp.float32),
        "b2": 0.1 * jax.random.normal(kc, (Cout,), jnp.float32),
    }

    try:
        out = jax.block_until_ready(conv_block_forward(x, params))
    except Exception:
        # Fallback if this JAX build rejects pl.Buffered(1) single-buffering of
        # the grid-invariant weights; everything else is identical.
        out = jax.block_until_ready(
            conv_block_forward(x, params, single_buffer_weights=False))
    ref = jax.block_until_ready(ref_forward(x, params))

    assert out.shape == (N, Cout, H, W), out.shape
    max_err = float(jnp.max(jnp.abs(out - ref)))
    ref_mag = float(jnp.max(jnp.abs(ref)))
    # bf16 MXU operands + bf16 y1 intermediate (f32 accumulation / BN math) ->
    # tolerance relative to output scale.
    assert max_err <= 2e-2 * ref_mag + 1e-3, (
        f"kernel/reference mismatch: max_err={max_err}, ref_mag={ref_mag}")
    print("KERNEL_OK")
</pallas_src>

<mosaic_0001>
module attributes {stable_mosaic.version = 11 : i64} {
  func.func @conv1_stats_kernel(%arg0: i32, %arg1: memref<2x16x64xbf16, #tpu.memory_space<vmem>>, %arg2: memref<192x128xbf16, #tpu.memory_space<vmem>>, %arg3: memref<2x16x128xbf16, #tpu.memory_space<vmem>>, %arg4: memref<1x1x128xf32, #tpu.memory_space<vmem>>, %arg5: memref<1x1x128xf32, #tpu.memory_space<vmem>>, %arg6: memref<40x64xbf16, #tpu.memory_space<vmem>>) attributes {dimension_semantics = [#tpu.dimension_semantics<parallel>], iteration_bounds = array<i64: 1>, scalar_prefetch = 0 : i64, scratch_operands = 1 : i64, tpu.core_type = #tpu.core_type<tc>, window_params = [{transform_indices = @transform_0, window_bounds = array<i64: 2, 16, 64>}, {pipeline_mode = #tpu.pipeline_mode<synchronous>, transform_indices = @transform_1, window_bounds = array<i64: 192, 128>}, {transform_indices = @transform_2, window_bounds = array<i64: 2, 16, 128>}, {transform_indices = @transform_3, window_bounds = array<i64: 1, 1, 128>}, {transform_indices = @transform_4, window_bounds = array<i64: 1, 1, 128>}]} {
    %c0 = arith.constant 0 : index
    %c0_0 = arith.constant 0 : index
    %c0_1 = arith.constant 0 : index
    %0 = vector.load %arg1[%c0, %c0_0, %c0_1] : memref<2x16x64xbf16, #tpu.memory_space<vmem>>, vector<2x16x64xbf16>
    %1 = vector.shape_cast %0 : vector<2x16x64xbf16> to vector<32x64xbf16>
    %cst = arith.constant 0.000000e+00 : bf16
    %2 = vector.broadcast %cst : bf16 to vector<1x64xbf16>
    %c0_2 = arith.constant 0 : index
    %c0_3 = arith.constant 0 : index
    %3 = vector.load %arg6[%c0_2, %c0_3] : memref<40x64xbf16, #tpu.memory_space<vmem>>, vector<1x64xbf16>
    tpu.vector_store %arg6[%c0_2, %c0_3], %2 {strides = array<i32>} : memref<40x64xbf16, #tpu.memory_space<vmem>>, vector<1x64xbf16>,
    %c1 = arith.constant 1 : index
    %c0_4 = arith.constant 0 : index
    %4 = vector.load %arg6[%c1, %c0_4] : memref<40x64xbf16, #tpu.memory_space<vmem>>, vector<32x64xbf16>
    tpu.vector_store %arg6[%c1, %c0_4], %1 {strides = array<i32>} : memref<40x64xbf16, #tpu.memory_space<vmem>>, vector<32x64xbf16>,
    %c33 = arith.constant 33 : index
    %c0_5 = arith.constant 0 : index
    %5 = vector.load %arg6[%c33, %c0_5] : memref<40x64xbf16, #tpu.memory_space<vmem>>, vector<1x64xbf16>
    tpu.vector_store %arg6[%c33, %c0_5], %2 {strides = array<i32>} : memref<40x64xbf16, #tpu.memory_space<vmem>>, vector<1x64xbf16>,
    %c0_6 = arith.constant 0 : index
    %c0_7 = arith.constant 0 : index
    %6 = vector.load %arg6[%c0_6, %c0_7] : memref<40x64xbf16, #tpu.memory_space<vmem>>, vector<32x64xbf16>
    %c2 = arith.constant 2 : index
    %c0_8 = arith.constant 0 : index
    %7 = vector.load %arg6[%c2, %c0_8] : memref<40x64xbf16, #tpu.memory_space<vmem>>, vector<32x64xbf16>
    %8 = tpu.iota {dimensions = array<i32: 0>} : vector<32x1xi32>
    %c16_i32 = arith.constant 16 : i32
    %c0_i32 = arith.constant 0 : i32
    %9 = arith.cmpi eq, %c16_i32, %c0_i32 : i32
    %c1_i32 = arith.constant 1 : i32
    %10 = arith.select %9, %c1_i32, %c16_i32 : i32
    %11 = vector.broadcast %10 : i32 to vector<32x1xi32>
    %12 = arith.remsi %8, %11 : vector<32x1xi32>
    %c0_i32_9 = arith.constant 0 : i32
    %13 = vector.broadcast %c0_i32_9 : i32 to vector<32x1xi32>
    %14 = arith.cmpi ne, %12, %13 : vector<32x1xi32>
    %c0_i32_10 = arith.constant 0 : i32
    %15 = vector.broadcast %c0_i32_10 : i32 to vector<32x1xi32>
    %16 = arith.cmpi slt, %12, %15 : vector<32x1xi32>
    %c0_i32_11 = arith.constant 0 : i32
    %17 = arith.cmpi slt, %10, %c0_i32_11 : i32
    %18 = vector.broadcast %17 : i1 to vector<32x1xi1>
    %19 = vector.broadcast %18 : vector<32x1xi1> to vector<32x1xi1>
    %20 = arith.xori %16, %19 : vector<32x1xi1>
    %21 = arith.andi %20, %14 : vector<32x1xi1>
    %22 = vector.broadcast %10 : i32 to vector<32x1xi32>
    %23 = arith.addi %12, %22 : vector<32x1xi32>
    %24 = arith.select %21, %23, %12 : vector<32x1xi1>, vector<32x1xi32>
    %c0_i32_12 = arith.constant 0 : i32
    %25 = vector.broadcast %c0_i32_12 : i32 to vector<32x1xi32>
    %26 = arith.cmpi eq, %24, %25 : vector<32x1xi32>
    %cst_13 = arith.constant 0.000000e+00 : bf16
    %27 = vector.broadcast %cst_13 : bf16 to vector<32x64xbf16>
    %28 = vector.shape_cast %26 : vector<32x1xi1> to vector<32x1xi1>
    %29 = vector.broadcast %28 : vector<32x1xi1> to vector<32x64xi1>
    %30 = arith.select %29, %27, %6 : vector<32x64xi1>, vector<32x64xbf16>
    %c15_i32 = arith.constant 15 : i32
    %31 = vector.broadcast %c15_i32 : i32 to vector<32x1xi32>
    %32 = arith.cmpi eq, %24, %31 : vector<32x1xi32>
    %cst_14 = arith.constant 0.000000e+00 : bf16
    %33 = vector.broadcast %cst_14 : bf16 to vector<32x64xbf16>
    %34 = vector.shape_cast %32 : vector<32x1xi1> to vector<32x1xi1>
    %35 = vector.broadcast %34 : vector<32x1xi1> to vector<32x64xi1>
    %36 = arith.select %35, %33, %7 : vector<32x64xi1>, vector<32x64xbf16>
    %c64 = arith.constant 64 : index
    %c0_15 = arith.constant 0 : index
    %37 = vector.load %arg2[%c64, %c0_15] : memref<192x128xbf16, #tpu.memory_space<vmem>>, vector<64x128xbf16>
    %cst_16 = arith.constant dense<0.000000e+00> : vector<32x128xf32>
    %38 = tpu.matmul %1, %37, %cst_16 {dimension_numbers = #tpu.dot_dimension_numbers<[1], [0], [0], [1], [0, 0, 1, 1], [], []>} : vector<32x64xbf16>, vector<64x128xbf16>, vector<32x128xf32> -> vector<32x128xf32>
    %c0_17 = arith.constant 0 : index
    %c0_18 = arith.constant 0 : index
    %39 = vector.load %arg2[%c0_17, %c0_18] : memref<192x128xbf16, #tpu.memory_space<vmem>>, vector<64x128xbf16>
    %cst_19 = arith.constant dense<0.000000e+00> : vector<32x128xf32>
    %40 = tpu.matmul %30, %39, %cst_19 {dimension_numbers = #tpu.dot_dimension_numbers<[1], [0], [0], [1], [0, 0, 1, 1], [], []>} : vector<32x64xbf16>, vector<64x128xbf16>, vector<32x128xf32> -> vector<32x128xf32>
    %41 = arith.addf %38, %40 : vector<32x128xf32>
    %c128 = arith.constant 128 : index
    %c0_20 = arith.constant 0 : index
    %42 = vector.load %arg2[%c128, %c0_20] : memref<192x128xbf16, #tpu.memory_space<vmem>>, vector<64x128xbf16>
    %cst_21 = arith.constant dense<0.000000e+00> : vector<32x128xf32>
    %43 = tpu.matmul %36, %42, %cst_21 {dimension_numbers = #tpu.dot_dimension_numbers<[1], [0], [0], [1], [0, 0, 1, 1], [], []>} : vector<32x64xbf16>, vector<64x128xbf16>, vector<32x128xf32> -> vector<32x128xf32>
    %44 = arith.addf %41, %43 : vector<32x128xf32>
    %45 = vector.shape_cast %44 : vector<32x128xf32> to vector<2x16x128xf32>
    %46 = arith.truncf %45 : vector<2x16x128xf32> to vector<2x16x128xbf16>
    %c0_22 = arith.constant 0 : index
    %c0_23 = arith.constant 0 : index
    %c0_24 = arith.constant 0 : index
    %47 = vector.load %arg3[%c0_22, %c0_23, %c0_24] : memref<2x16x128xbf16, #tpu.memory_space<vmem>>, vector<2x16x128xbf16>
    tpu.vector_store %arg3[%c0_22, %c0_23, %c0_24], %46 {strides = array<i32>} : memref<2x16x128xbf16, #tpu.memory_space<vmem>>, vector<2x16x128xbf16>,
    %cst_25 = arith.constant dense<0.000000e+00> : vector<128xf32>
    %48 = vector.multi_reduction <add>, %44, %cst_25 [0] : vector<32x128xf32> to vector<128xf32>
    %49 = vector.shape_cast %48 : vector<128xf32> to vector<1x128xf32>
    %c0_26 = arith.constant 0 : index
    %c0_27 = arith.constant 0 : index
    %c0_28 = arith.constant 0 : index
    %50 = vector.load %arg4[%c0_26, %c0_27, %c0_28] : memref<1x1x128xf32, #tpu.memory_space<vmem>>, vector<1x1x128xf32>
    %51 = vector.shape_cast %50 : vector<1x1x128xf32> to vector<1x128xf32>
    %52 = vector.shape_cast %49 : vector<1x128xf32> to vector<1x1x128xf32>
    tpu.vector_store %arg4[%c0_26, %c0_27, %c0_28], %52 {strides = array<i32>} : memref<1x1x128xf32, #tpu.memory_space<vmem>>, vector<1x1x128xf32>,
    %53 = arith.mulf %44, %44 : vector<32x128xf32>
    %cst_29 = arith.constant dense<0.000000e+00> : vector<128xf32>
    %54 = vector.multi_reduction <add>, %53, %cst_29 [0] : vector<32x128xf32> to vector<128xf32>
    %55 = vector.shape_cast %54 : vector<128xf32> to vector<1x128xf32>
    %c0_30 = arith.constant 0 : index
    %c0_31 = arith.constant 0 : index
    %c0_32 = arith.constant 0 : index
    %56 = vector.load %arg5[%c0_30, %c0_31, %c0_32] : memref<1x1x128xf32, #tpu.memory_space<vmem>>, vector<1x1x128xf32>
    %57 = vector.shape_cast %56 : vector<1x1x128xf32> to vector<1x128xf32>
    %58 = vector.shape_cast %55 : vector<1x128xf32> to vector<1x1x128xf32>
    tpu.vector_store %arg5[%c0_30, %c0_31, %c0_32], %58 {strides = array<i32>} : memref<1x1x128xf32, #tpu.memory_space<vmem>>, vector<1x1x128xf32>,
    return
  }
  func.func @transform_0(%arg0: i32) -> (i32, i32, i32) {
    %c0_i32 = arith.constant 0 : i32
    %c0_i32_0 = arith.constant 0 : i32
    %c0_i32_1 = arith.constant 0 : i32
    return %arg0, %c0_i32, %c0_i32_0 : i32, i32, i32
  }
  func.func @transform_1(%arg0: i32) -> (i32, i32) {
    %c0_i32 = arith.constant 0 : i32
    %c0_i32_0 = arith.constant 0 : i32
    %c0_i32_1 = arith.constant 0 : i32
    return %c0_i32, %c0_i32_0 : i32, i32
  }
  func.func @transform_2(%arg0: i32) -> (i32, i32, i32) {
    %c0_i32 = arith.constant 0 : i32
    %c0_i32_0 = arith.constant 0 : i32
    %c0_i32_1 = arith.constant 0 : i32
    return %arg0, %c0_i32, %c0_i32_0 : i32, i32, i32
  }
  func.func @transform_3(%arg0: i32) -> (i32, i32, i32) {
    %c0_i32 = arith.constant 0 : i32
    %c0_i32_0 = arith.constant 0 : i32
    %c0_i32_1 = arith.constant 0 : i32
    return %arg0, %c0_i32, %c0_i32_0 : i32, i32, i32
  }
  func.func @transform_4(%arg0: i32) -> (i32, i32, i32) {
    %c0_i32 = arith.constant 0 : i32
    %c0_i32_0 = arith.constant 0 : i32
    %c0_i32_1 = arith.constant 0 : i32
    return %arg0, %c0_i32, %c0_i32_0 : i32, i32, i32
  }
}

module attributes {stable_mosaic.version = 11 : i64} {
  func.func @bn_relu_conv2_kernel(%arg0: i32, %arg1: memref<2x16x128xbf16, #tpu.memory_space<vmem>>, %arg2: memref<1x128xf32, #tpu.memory_space<vmem>>, %arg3: memref<1x128xf32, #tpu.memory_space<vmem>>, %arg4: memref<384x128xbf16, #tpu.memory_space<vmem>>, %arg5: memref<1x128xf32, #tpu.memory_space<vmem>>, %arg6: memref<2x16x128xf32, #tpu.memory_space<vmem>>, %arg7: memref<40x128xbf16, #tpu.memory_space<vmem>>) attributes {dimension_semantics = [#tpu.dimension_semantics<parallel>], iteration_bounds = array<i64: 1>, scalar_prefetch = 0 : i64, scratch_operands = 1 : i64, tpu.core_type = #tpu.core_type<tc>, window_params = [{transform_indices = @transform_0, window_bounds = array<i64: 2, 16, 128>}, {pipeline_mode = #tpu.pipeline_mode<synchronous>, transform_indices = @transform_1, window_bounds = array<i64: 1, 128>}, {pipeline_mode = #tpu.pipeline_mode<synchronous>, transform_indices = @transform_2, window_bounds = array<i64: 1, 128>}, {pipeline_mode = #tpu.pipeline_mode<synchronous>, transform_indices = @transform_3, window_bounds = array<i64: 384, 128>}, {pipeline_mode = #tpu.pipeline_mode<synchronous>, transform_indices = @transform_4, window_bounds = array<i64: 1, 128>}, {transform_indices = @transform_5, window_bounds = array<i64: 2, 16, 128>}]} {
    %c0 = arith.constant 0 : index
    %c0_0 = arith.constant 0 : index
    %c0_1 = arith.constant 0 : index
    %0 = vector.load %arg1[%c0, %c0_0, %c0_1] : memref<2x16x128xbf16, #tpu.memory_space<vmem>>, vector<2x16x128xbf16>
    %1 = vector.shape_cast %0 : vector<2x16x128xbf16> to vector<32x128xbf16>
    %2 = arith.extf %1 : vector<32x128xbf16> to vector<32x128xf32>
    %c0_2 = arith.constant 0 : index
    %c0_3 = arith.constant 0 : index
    %3 = vector.load %arg2[%c0_2, %c0_3] : memref<1x128xf32, #tpu.memory_space<vmem>>, vector<1x128xf32>
    %4 = vector.broadcast %3 : vector<1x128xf32> to vector<32x128xf32>
    %5 = arith.mulf %2, %4 : vector<32x128xf32>
    %c0_4 = arith.constant 0 : index
    %c0_5 = arith.constant 0 : index
    %6 = vector.load %arg3[%c0_4, %c0_5] : memref<1x128xf32, #tpu.memory_space<vmem>>, vector<1x128xf32>
    %7 = vector.broadcast %6 : vector<1x128xf32> to vector<32x128xf32>
    %8 = arith.addf %5, %7 : vector<32x128xf32>
    %cst = arith.constant 0.000000e+00 : f32
    %9 = vector.broadcast %cst : f32 to vector<32x128xf32>
    %10 = arith.maximumf %8, %9 : vector<32x128xf32>
    %11 = arith.truncf %10 : vector<32x128xf32> to vector<32x128xbf16>
    %cst_6 = arith.constant 0.000000e+00 : bf16
    %12 = vector.broadcast %cst_6 : bf16 to vector<1x128xbf16>
    %c0_7 = arith.constant 0 : index
    %c0_8 = arith.constant 0 : index
    %13 = vector.load %arg7[%c0_7, %c0_8] : memref<40x128xbf16, #tpu.memory_space<vmem>>, vector<1x128xbf16>
    tpu.vector_store %arg7[%c0_7, %c0_8], %12 {strides = array<i32>} : memref<40x128xbf16, #tpu.memory_space<vmem>>, vector<1x128xbf16>,
    %c1 = arith.constant 1 : index
    %c0_9 = arith.constant 0 : index
    %14 = vector.load %arg7[%c1, %c0_9] : memref<40x128xbf16, #tpu.memory_space<vmem>>, vector<32x128xbf16>
    tpu.vector_store %arg7[%c1, %c0_9], %11 {strides = array<i32>} : memref<40x128xbf16, #tpu.memory_space<vmem>>, vector<32x128xbf16>,
    %c33 = arith.constant 33 : index
    %c0_10 = arith.constant 0 : index
    %15 = vector.load %arg7[%c33, %c0_10] : memref<40x128xbf16, #tpu.memory_space<vmem>>, vector<1x128xbf16>
    tpu.vector_store %arg7[%c33, %c0_10], %12 {strides = array<i32>} : memref<40x128xbf16, #tpu.memory_space<vmem>>, vector<1x128xbf16>,
    %c0_11 = arith.constant 0 : index
    %c0_12 = arith.constant 0 : index
    %16 = vector.load %arg7[%c0_11, %c0_12] : memref<40x128xbf16, #tpu.memory_space<vmem>>, vector<32x128xbf16>
    %c2 = arith.constant 2 : index
    %c0_13 = arith.constant 0 : index
    %17 = vector.load %arg7[%c2, %c0_13] : memref<40x128xbf16, #tpu.memory_space<vmem>>, vector<32x128xbf16>
    %18 = tpu.iota {dimensions = array<i32: 0>} : vector<32x1xi32>
    %c16_i32 = arith.constant 16 : i32
    %c0_i32 = arith.constant 0 : i32
    %19 = arith.cmpi eq, %c16_i32, %c0_i32 : i32
    %c1_i32 = arith.constant 1 : i32
    %20 = arith.select %19, %c1_i32, %c16_i32 : i32
    %21 = vector.broadcast %20 : i32 to vector<32x1xi32>
    %22 = arith.remsi %18, %21 : vector<32x1xi32>
    %c0_i32_14 = arith.constant 0 : i32
    %23 = vector.broadcast %c0_i32_14 : i32 to vector<32x1xi32>
    %24 = arith.cmpi ne, %22, %23 : vector<32x1xi32>
    %c0_i32_15 = arith.constant 0 : i32
    %25 = vector.broadcast %c0_i32_15 : i32 to vector<32x1xi32>
    %26 = arith.cmpi slt, %22, %25 : vector<32x1xi32>
    %c0_i32_16 = arith.constant 0 : i32
    %27 = arith.cmpi slt, %20, %c0_i32_16 : i32
    %28 = vector.broadcast %27 : i1 to vector<32x1xi1>
    %29 = vector.broadcast %28 : vector<32x1xi1> to vector<32x1xi1>
    %30 = arith.xori %26, %29 : vector<32x1xi1>
    %31 = arith.andi %30, %24 : vector<32x1xi1>
    %32 = vector.broadcast %20 : i32 to vector<32x1xi32>
    %33 = arith.addi %22, %32 : vector<32x1xi32>
    %34 = arith.select %31, %33, %22 : vector<32x1xi1>, vector<32x1xi32>
    %c0_i32_17 = arith.constant 0 : i32
    %35 = vector.broadcast %c0_i32_17 : i32 to vector<32x1xi32>
    %36 = arith.cmpi eq, %34, %35 : vector<32x1xi32>
    %cst_18 = arith.constant 0.000000e+00 : bf16
    %37 = vector.broadcast %cst_18 : bf16 to vector<32x128xbf16>
    %38 = vector.shape_cast %36 : vector<32x1xi1> to vector<32x1xi1>
    %39 = vector.broadcast %38 : vector<32x1xi1> to vector<32x128xi1>
    %40 = arith.select %39, %37, %16 : vector<32x128xi1>, vector<32x128xbf16>
    %c15_i32 = arith.constant 15 : i32
    %41 = vector.broadcast %c15_i32 : i32 to vector<32x1xi32>
    %42 = arith.cmpi eq, %34, %41 : vector<32x1xi32>
    %cst_19 = arith.constant 0.000000e+00 : bf16
    %43 = vector.broadcast %cst_19 : bf16 to vector<32x128xbf16>
    %44 = vector.shape_cast %42 : vector<32x1xi1> to vector<32x1xi1>
    %45 = vector.broadcast %44 : vector<32x1xi1> to vector<32x128xi1>
    %46 = arith.select %45, %43, %17 : vector<32x128xi1>, vector<32x128xbf16>
    %c128 = arith.constant 128 : index
    %c0_20 = arith.constant 0 : index
    %47 = vector.load %arg4[%c128, %c0_20] : memref<384x128xbf16, #tpu.memory_space<vmem>>, vector<128x128xbf16>
    %cst_21 = arith.constant dense<0.000000e+00> : vector<32x128xf32>
    %48 = tpu.matmul %11, %47, %cst_21 {dimension_numbers = #tpu.dot_dimension_numbers<[1], [0], [0], [1], [0, 0, 1, 1], [], []>} : vector<32x128xbf16>, vector<128x128xbf16>, vector<32x128xf32> -> vector<32x128xf32>
    %c0_22 = arith.constant 0 : index
    %c0_23 = arith.constant 0 : index
    %49 = vector.load %arg4[%c0_22, %c0_23] : memref<384x128xbf16, #tpu.memory_space<vmem>>, vector<128x128xbf16>
    %cst_24 = arith.constant dense<0.000000e+00> : vector<32x128xf32>
    %50 = tpu.matmul %40, %49, %cst_24 {dimension_numbers = #tpu.dot_dimension_numbers<[1], [0], [0], [1], [0, 0, 1, 1], [], []>} : vector<32x128xbf16>, vector<128x128xbf16>, vector<32x128xf32> -> vector<32x128xf32>
    %51 = arith.addf %48, %50 : vector<32x128xf32>
    %c256 = arith.constant 256 : index
    %c0_25 = arith.constant 0 : index
    %52 = vector.load %arg4[%c256, %c0_25] : memref<384x128xbf16, #tpu.memory_space<vmem>>, vector<128x128xbf16>
    %cst_26 = arith.constant dense<0.000000e+00> : vector<32x128xf32>
    %53 = tpu.matmul %46, %52, %cst_26 {dimension_numbers = #tpu.dot_dimension_numbers<[1], [0], [0], [1], [0, 0, 1, 1], [], []>} : vector<32x128xbf16>, vector<128x128xbf16>, vector<32x128xf32> -> vector<32x128xf32>
    %54 = arith.addf %51, %53 : vector<32x128xf32>
    %c0_27 = arith.constant 0 : index
    %c0_28 = arith.constant 0 : index
    %55 = vector.load %arg5[%c0_27, %c0_28] : memref<1x128xf32, #tpu.memory_space<vmem>>, vector<1x128xf32>
    %56 = vector.broadcast %55 : vector<1x128xf32> to vector<32x128xf32>
    %57 = arith.addf %54, %56 : vector<32x128xf32>
    %cst_29 = arith.constant 0.000000e+00 : f32
    %58 = vector.broadcast %cst_29 : f32 to vector<32x128xf32>
    %59 = arith.maximumf %57, %58 : vector<32x128xf32>
    %60 = vector.shape_cast %59 : vector<32x128xf32> to vector<2x16x128xf32>
    %c0_30 = arith.constant 0 : index
    %c0_31 = arith.constant 0 : index
    %c0_32 = arith.constant 0 : index
    %61 = vector.load %arg6[%c0_30, %c0_31, %c0_32] : memref<2x16x128xf32, #tpu.memory_space<vmem>>, vector<2x16x128xf32>
    tpu.vector_store %arg6[%c0_30, %c0_31, %c0_32], %60 {strides = array<i32>} : memref<2x16x128xf32, #tpu.memory_space<vmem>>, vector<2x16x128xf32>,
    return
  }
  func.func @transform_0(%arg0: i32) -> (i32, i32, i32) {
    %c0_i32 = arith.constant 0 : i32
    %c0_i32_0 = arith.constant 0 : i32
    %c0_i32_1 = arith.constant 0 : i32
    return %arg0, %c0_i32, %c0_i32_0 : i32, i32, i32
  }
  func.func @transform_1(%arg0: i32) -> (i32, i32) {
    %c0_i32 = arith.constant 0 : i32
    %c0_i32_0 = arith.constant 0 : i32
    %c0_i32_1 = arith.constant 0 : i32
    return %c0_i32, %c0_i32_0 : i32, i32
  }
  func.func @transform_2(%arg0: i32) -> (i32, i32) {
    %c0_i32 = arith.constant 0 : i32
    %c0_i32_0 = arith.constant 0 : i32
    %c0_i32_1 = arith.constant 0 : i32
    return %c0_i32, %c0_i32_0 : i32, i32
  }
  func.func @transform_3(%arg0: i32) -> (i32, i32) {
    %c0_i32 = arith.constant 0 : i32
    %c0_i32_0 = arith.constant 0 : i32
    %c0_i32_1 = arith.constant 0 : i32
    return %c0_i32, %c0_i32_0 : i32, i32
  }
  func.func @transform_4(%arg0: i32) -> (i32, i32) {
    %c0_i32 = arith.constant 0 : i32
    %c0_i32_0 = arith.constant 0 : i32
    %c0_i32_1 = arith.constant 0 : i32
    return %c0_i32, %c0_i32_0 : i32, i32
  }
  func.func @transform_5(%arg0: i32) -> (i32, i32, i32) {
    %c0_i32 = arith.constant 0 : i32
    %c0_i32_0 = arith.constant 0 : i32
    %c0_i32_1 = arith.constant 0 : i32
    return %arg0, %c0_i32, %c0_i32_0 : i32, i32, i32
  }
}

module attributes {stable_mosaic.version = 11 : i64} {
  func.func @conv1_stats_kernel(%arg0: i32, %arg1: memref<2x16x64xbf16, #tpu.memory_space<vmem>>, %arg2: memref<192x128xbf16, #tpu.memory_space<vmem>>, %arg3: memref<2x16x128xbf16, #tpu.memory_space<vmem>>, %arg4: memref<1x1x128xf32, #tpu.memory_space<vmem>>, %arg5: memref<1x1x128xf32, #tpu.memory_space<vmem>>, %arg6: memref<40x64xbf16, #tpu.memory_space<vmem>>) attributes {dimension_semantics = [#tpu.dimension_semantics<parallel>], iteration_bounds = array<i64: 1>, scalar_prefetch = 0 : i64, scratch_operands = 1 : i64, tpu.core_type = #tpu.core_type<tc>, window_params = [{transform_indices = @transform_0, window_bounds = array<i64: 2, 16, 64>}, {pipeline_mode = #tpu.pipeline_mode<synchronous>, transform_indices = @transform_1, window_bounds = array<i64: 192, 128>}, {transform_indices = @transform_2, window_bounds = array<i64: 2, 16, 128>}, {transform_indices = @transform_3, window_bounds = array<i64: 1, 1, 128>}, {transform_indices = @transform_4, window_bounds = array<i64: 1, 1, 128>}]} {
    %c0 = arith.constant 0 : index
    %c0_0 = arith.constant 0 : index
    %c0_1 = arith.constant 0 : index
    %0 = vector.load %arg1[%c0, %c0_0, %c0_1] : memref<2x16x64xbf16, #tpu.memory_space<vmem>>, vector<2x16x64xbf16>
    %1 = vector.shape_cast %0 : vector<2x16x64xbf16> to vector<32x64xbf16>
    %cst = arith.constant 0.000000e+00 : bf16
    %2 = vector.broadcast %cst : bf16 to vector<1x64xbf16>
    %c0_2 = arith.constant 0 : index
    %c0_3 = arith.constant 0 : index
    %3 = vector.load %arg6[%c0_2, %c0_3] : memref<40x64xbf16, #tpu.memory_space<vmem>>, vector<1x64xbf16>
    tpu.vector_store %arg6[%c0_2, %c0_3], %2 {strides = array<i32>} : memref<40x64xbf16, #tpu.memory_space<vmem>>, vector<1x64xbf16>,
    %c1 = arith.constant 1 : index
    %c0_4 = arith.constant 0 : index
    %4 = vector.load %arg6[%c1, %c0_4] : memref<40x64xbf16, #tpu.memory_space<vmem>>, vector<32x64xbf16>
    tpu.vector_store %arg6[%c1, %c0_4], %1 {strides = array<i32>} : memref<40x64xbf16, #tpu.memory_space<vmem>>, vector<32x64xbf16>,
    %c33 = arith.constant 33 : index
    %c0_5 = arith.constant 0 : index
    %5 = vector.load %arg6[%c33, %c0_5] : memref<40x64xbf16, #tpu.memory_space<vmem>>, vector<1x64xbf16>
    tpu.vector_store %arg6[%c33, %c0_5], %2 {strides = array<i32>} : memref<40x64xbf16, #tpu.memory_space<vmem>>, vector<1x64xbf16>,
    %c0_6 = arith.constant 0 : index
    %c0_7 = arith.constant 0 : index
    %6 = vector.load %arg6[%c0_6, %c0_7] : memref<40x64xbf16, #tpu.memory_space<vmem>>, vector<32x64xbf16>
    %c2 = arith.constant 2 : index
    %c0_8 = arith.constant 0 : index
    %7 = vector.load %arg6[%c2, %c0_8] : memref<40x64xbf16, #tpu.memory_space<vmem>>, vector<32x64xbf16>
    %8 = tpu.iota {dimensions = array<i32: 0>} : vector<32x1xi32>
    %c16_i32 = arith.constant 16 : i32
    %c0_i32 = arith.constant 0 : i32
    %9 = arith.cmpi eq, %c16_i32, %c0_i32 : i32
    %c1_i32 = arith.constant 1 : i32
    %10 = arith.select %9, %c1_i32, %c16_i32 : i32
    %11 = vector.broadcast %10 : i32 to vector<32x1xi32>
    %12 = arith.remsi %8, %11 : vector<32x1xi32>
    %c0_i32_9 = arith.constant 0 : i32
    %13 = vector.broadcast %c0_i32_9 : i32 to vector<32x1xi32>
    %14 = arith.cmpi ne, %12, %13 : vector<32x1xi32>
    %c0_i32_10 = arith.constant 0 : i32
    %15 = vector.broadcast %c0_i32_10 : i32 to vector<32x1xi32>
    %16 = arith.cmpi slt, %12, %15 : vector<32x1xi32>
    %c0_i32_11 = arith.constant 0 : i32
    %17 = arith.cmpi slt, %10, %c0_i32_11 : i32
    %18 = vector.broadcast %17 : i1 to vector<32x1xi1>
    %19 = vector.broadcast %18 : vector<32x1xi1> to vector<32x1xi1>
    %20 = arith.xori %16, %19 : vector<32x1xi1>
    %21 = arith.andi %20, %14 : vector<32x1xi1>
    %22 = vector.broadcast %10 : i32 to vector<32x1xi32>
    %23 = arith.addi %12, %22 : vector<32x1xi32>
    %24 = arith.select %21, %23, %12 : vector<32x1xi1>, vector<32x1xi32>
    %c0_i32_12 = arith.constant 0 : i32
    %25 = vector.broadcast %c0_i32_12 : i32 to vector<32x1xi32>
    %26 = arith.cmpi eq, %24, %25 : vector<32x1xi32>
    %cst_13 = arith.constant 0.000000e+00 : bf16
    %27 = vector.broadcast %cst_13 : bf16 to vector<32x64xbf16>
    %28 = vector.shape_cast %26 : vector<32x1xi1> to vector<32x1xi1>
    %29 = vector.broadcast %28 : vector<32x1xi1> to vector<32x64xi1>
    %30 = arith.select %29, %27, %6 : vector<32x64xi1>, vector<32x64xbf16>
    %c15_i32 = arith.constant 15 : i32
    %31 = vector.broadcast %c15_i32 : i32 to vector<32x1xi32>
    %32 = arith.cmpi eq, %24, %31 : vector<32x1xi32>
    %cst_14 = arith.constant 0.000000e+00 : bf16
    %33 = vector.broadcast %cst_14 : bf16 to vector<32x64xbf16>
    %34 = vector.shape_cast %32 : vector<32x1xi1> to vector<32x1xi1>
    %35 = vector.broadcast %34 : vector<32x1xi1> to vector<32x64xi1>
    %36 = arith.select %35, %33, %7 : vector<32x64xi1>, vector<32x64xbf16>
    %c64 = arith.constant 64 : index
    %c0_15 = arith.constant 0 : index
    %37 = vector.load %arg2[%c64, %c0_15] : memref<192x128xbf16, #tpu.memory_space<vmem>>, vector<64x128xbf16>
    %cst_16 = arith.constant dense<0.000000e+00> : vector<32x128xf32>
    %38 = tpu.matmul %1, %37, %cst_16 {dimension_numbers = #tpu.dot_dimension_numbers<[1], [0], [0], [1], [0, 0, 1, 1], [], []>} : vector<32x64xbf16>, vector<64x128xbf16>, vector<32x128xf32> -> vector<32x128xf32>
    %c0_17 = arith.constant 0 : index
    %c0_18 = arith.constant 0 : index
    %39 = vector.load %arg2[%c0_17, %c0_18] : memref<192x128xbf16, #tpu.memory_space<vmem>>, vector<64x128xbf16>
    %cst_19 = arith.constant dense<0.000000e+00> : vector<32x128xf32>
    %40 = tpu.matmul %30, %39, %cst_19 {dimension_numbers = #tpu.dot_dimension_numbers<[1], [0], [0], [1], [0, 0, 1, 1], [], []>} : vector<32x64xbf16>, vector<64x128xbf16>, vector<32x128xf32> -> vector<32x128xf32>
    %41 = arith.addf %38, %40 : vector<32x128xf32>
    %c128 = arith.constant 128 : index
    %c0_20 = arith.constant 0 : index
    %42 = vector.load %arg2[%c128, %c0_20] : memref<192x128xbf16, #tpu.memory_space<vmem>>, vector<64x128xbf16>
    %cst_21 = arith.constant dense<0.000000e+00> : vector<32x128xf32>
    %43 = tpu.matmul %36, %42, %cst_21 {dimension_numbers = #tpu.dot_dimension_numbers<[1], [0], [0], [1], [0, 0, 1, 1], [], []>} : vector<32x64xbf16>, vector<64x128xbf16>, vector<32x128xf32> -> vector<32x128xf32>
    %44 = arith.addf %41, %43 : vector<32x128xf32>
    %45 = vector.shape_cast %44 : vector<32x128xf32> to vector<2x16x128xf32>
    %46 = arith.truncf %45 : vector<2x16x128xf32> to vector<2x16x128xbf16>
    %c0_22 = arith.constant 0 : index
    %c0_23 = arith.constant 0 : index
    %c0_24 = arith.constant 0 : index
    %47 = vector.load %arg3[%c0_22, %c0_23, %c0_24] : memref<2x16x128xbf16, #tpu.memory_space<vmem>>, vector<2x16x128xbf16>
    tpu.vector_store %arg3[%c0_22, %c0_23, %c0_24], %46 {strides = array<i32>} : memref<2x16x128xbf16, #tpu.memory_space<vmem>>, vector<2x16x128xbf16>,
    %cst_25 = arith.constant dense<0.000000e+00> : vector<128xf32>
    %48 = vector.multi_reduction <add>, %44, %cst_25 [0] : vector<32x128xf32> to vector<128xf32>
    %49 = vector.shape_cast %48 : vector<128xf32> to vector<1x128xf32>
    %c0_26 = arith.constant 0 : index
    %c0_27 = arith.constant 0 : index
    %c0_28 = arith.constant 0 : index
    %50 = vector.load %arg4[%c0_26, %c0_27, %c0_28] : memref<1x1x128xf32, #tpu.memory_space<vmem>>, vector<1x1x128xf32>
    %51 = vector.shape_cast %50 : vector<1x1x128xf32> to vector<1x128xf32>
    %52 = vector.shape_cast %49 : vector<1x128xf32> to vector<1x1x128xf32>
    tpu.vector_store %arg4[%c0_26, %c0_27, %c0_28], %52 {strides = array<i32>} : memref<1x1x128xf32, #tpu.memory_space<vmem>>, vector<1x1x128xf32>,
    %53 = arith.mulf %44, %44 : vector<32x128xf32>
    %cst_29 = arith.constant dense<0.000000e+00> : vector<128xf32>
    %54 = vector.multi_reduction <add>, %53, %cst_29 [0] : vector<32x128xf32> to vector<128xf32>
    %55 = vector.shape_cast %54 : vector<128xf32> to vector<1x128xf32>
    %c0_30 = arith.constant 0 : index
    %c0_31 = arith.constant 0 : index
    %c0_32 = arith.constant 0 : index
    %56 = vector.load %arg5[%c0_30, %c0_31, %c0_32] : memref<1x1x128xf32, #tpu.memory_space<vmem>>, vector<1x1x128xf32>
    %57 = vector.shape_cast %56 : vector<1x1x128xf32> to vector<1x128xf32>
    %58 = vector.shape_cast %55 : vector<1x128xf32> to vector<1x1x128xf32>
    tpu.vector_store %arg5[%c0_30, %c0_31, %c0_32], %58 {strides = array<i32>} : memref<1x1x128xf32, #tpu.memory_space<vmem>>, vector<1x1x128xf32>,
    return
  }
  func.func @transform_0(%arg0: i32) -> (i32, i32, i32) {
    %c0_i32 = arith.constant 0 : i32
    %c0_i32_0 = arith.constant 0 : i32
    %c0_i32_1 = arith.constant 0 : i32
    return %arg0, %c0_i32, %c0_i32_0 : i32, i32, i32
  }
  func.func @transform_1(%arg0: i32) -> (i32, i32) {
    %c0_i32 = arith.constant 0 : i32
    %c0_i32_0 = arith.constant 0 : i32
    %c0_i32_1 = arith.constant 0 : i32
    return %c0_i32, %c0_i32_0 : i32, i32
  }
  func.func @transform_2(%arg0: i32) -> (i32, i32, i32) {
    %c0_i32 = arith.constant 0 : i32
    %c0_i32_0 = arith.constant 0 : i32
    %c0_i32_1 = arith.constant 0 : i32
    return %arg0, %c0_i32, %c0_i32_0 : i32, i32, i32
  }
  func.func @transform_3(%arg0: i32) -> (i32, i32, i32) {
    %c0_i32 = arith.constant 0 : i32
    %c0_i32_0 = arith.constant 0 : i32
    %c0_i32_1 = arith.constant 0 : i32
    return %arg0, %c0_i32, %c0_i32_0 : i32, i32, i32
  }
  func.func @transform_4(%arg0: i32) -> (i32, i32, i32) {
    %c0_i32 = arith.constant 0 : i32
    %c0_i32_0 = arith.constant 0 : i32
    %c0_i32_1 = arith.constant 0 : i32
    return %arg0, %c0_i32, %c0_i32_0 : i32, i32, i32
  }
}

module attributes {stable_mosaic.version = 11 : i64} {
  func.func @bn_relu_conv2_kernel(%arg0: i32, %arg1: memref<2x16x128xbf16, #tpu.memory_space<vmem>>, %arg2: memref<1x128xf32, #tpu.memory_space<vmem>>, %arg3: memref<1x128xf32, #tpu.memory_space<vmem>>, %arg4: memref<384x128xbf16, #tpu.memory_space<vmem>>, %arg5: memref<1x128xf32, #tpu.memory_space<vmem>>, %arg6: memref<2x16x128xf32, #tpu.memory_space<vmem>>, %arg7: memref<40x128xbf16, #tpu.memory_space<vmem>>) attributes {dimension_semantics = [#tpu.dimension_semantics<parallel>], iteration_bounds = array<i64: 1>, scalar_prefetch = 0 : i64, scratch_operands = 1 : i64, tpu.core_type = #tpu.core_type<tc>, window_params = [{transform_indices = @transform_0, window_bounds = array<i64: 2, 16, 128>}, {pipeline_mode = #tpu.pipeline_mode<synchronous>, transform_indices = @transform_1, window_bounds = array<i64: 1, 128>}, {pipeline_mode = #tpu.pipeline_mode<synchronous>, transform_indices = @transform_2, window_bounds = array<i64: 1, 128>}, {pipeline_mode = #tpu.pipeline_mode<synchronous>, transform_indices = @transform_3, window_bounds = array<i64: 384, 128>}, {pipeline_mode = #tpu.pipeline_mode<synchronous>, transform_indices = @transform_4, window_bounds = array<i64: 1, 128>}, {transform_indices = @transform_5, window_bounds = array<i64: 2, 16, 128>}]} {
    %c0 = arith.constant 0 : index
    %c0_0 = arith.constant 0 : index
    %c0_1 = arith.constant 0 : index
    %0 = vector.load %arg1[%c0, %c0_0, %c0_1] : memref<2x16x128xbf16, #tpu.memory_space<vmem>>, vector<2x16x128xbf16>
    %1 = vector.shape_cast %0 : vector<2x16x128xbf16> to vector<32x128xbf16>
    %2 = arith.extf %1 : vector<32x128xbf16> to vector<32x128xf32>
    %c0_2 = arith.constant 0 : index
    %c0_3 = arith.constant 0 : index
    %3 = vector.load %arg2[%c0_2, %c0_3] : memref<1x128xf32, #tpu.memory_space<vmem>>, vector<1x128xf32>
    %4 = vector.broadcast %3 : vector<1x128xf32> to vector<32x128xf32>
    %5 = arith.mulf %2, %4 : vector<32x128xf32>
    %c0_4 = arith.constant 0 : index
    %c0_5 = arith.constant 0 : index
    %6 = vector.load %arg3[%c0_4, %c0_5] : memref<1x128xf32, #tpu.memory_space<vmem>>, vector<1x128xf32>
    %7 = vector.broadcast %6 : vector<1x128xf32> to vector<32x128xf32>
    %8 = arith.addf %5, %7 : vector<32x128xf32>
    %cst = arith.constant 0.000000e+00 : f32
    %9 = vector.broadcast %cst : f32 to vector<32x128xf32>
    %10 = arith.maximumf %8, %9 : vector<32x128xf32>
    %11 = arith.truncf %10 : vector<32x128xf32> to vector<32x128xbf16>
    %cst_6 = arith.constant 0.000000e+00 : bf16
    %12 = vector.broadcast %cst_6 : bf16 to vector<1x128xbf16>
    %c0_7 = arith.constant 0 : index
    %c0_8 = arith.constant 0 : index
    %13 = vector.load %arg7[%c0_7, %c0_8] : memref<40x128xbf16, #tpu.memory_space<vmem>>, vector<1x128xbf16>
    tpu.vector_store %arg7[%c0_7, %c0_8], %12 {strides = array<i32>} : memref<40x128xbf16, #tpu.memory_space<vmem>>, vector<1x128xbf16>,
    %c1 = arith.constant 1 : index
    %c0_9 = arith.constant 0 : index
    %14 = vector.load %arg7[%c1, %c0_9] : memref<40x128xbf16, #tpu.memory_space<vmem>>, vector<32x128xbf16>
    tpu.vector_store %arg7[%c1, %c0_9], %11 {strides = array<i32>} : memref<40x128xbf16, #tpu.memory_space<vmem>>, vector<32x128xbf16>,
    %c33 = arith.constant 33 : index
    %c0_10 = arith.constant 0 : index
    %15 = vector.load %arg7[%c33, %c0_10] : memref<40x128xbf16, #tpu.memory_space<vmem>>, vector<1x128xbf16>
    tpu.vector_store %arg7[%c33, %c0_10], %12 {strides = array<i32>} : memref<40x128xbf16, #tpu.memory_space<vmem>>, vector<1x128xbf16>,
    %c0_11 = arith.constant 0 : index
    %c0_12 = arith.constant 0 : index
    %16 = vector.load %arg7[%c0_11, %c0_12] : memref<40x128xbf16, #tpu.memory_space<vmem>>, vector<32x128xbf16>
    %c2 = arith.constant 2 : index
    %c0_13 = arith.constant 0 : index
    %17 = vector.load %arg7[%c2, %c0_13] : memref<40x128xbf16, #tpu.memory_space<vmem>>, vector<32x128xbf16>
    %18 = tpu.iota {dimensions = array<i32: 0>} : vector<32x1xi32>
    %c16_i32 = arith.constant 16 : i32
    %c0_i32 = arith.constant 0 : i32
    %19 = arith.cmpi eq, %c16_i32, %c0_i32 : i32
    %c1_i32 = arith.constant 1 : i32
    %20 = arith.select %19, %c1_i32, %c16_i32 : i32
    %21 = vector.broadcast %20 : i32 to vector<32x1xi32>
    %22 = arith.remsi %18, %21 : vector<32x1xi32>
    %c0_i32_14 = arith.constant 0 : i32
    %23 = vector.broadcast %c0_i32_14 : i32 to vector<32x1xi32>
    %24 = arith.cmpi ne, %22, %23 : vector<32x1xi32>
    %c0_i32_15 = arith.constant 0 : i32
    %25 = vector.broadcast %c0_i32_15 : i32 to vector<32x1xi32>
    %26 = arith.cmpi slt, %22, %25 : vector<32x1xi32>
    %c0_i32_16 = arith.constant 0 : i32
    %27 = arith.cmpi slt, %20, %c0_i32_16 : i32
    %28 = vector.broadcast %27 : i1 to vector<32x1xi1>
    %29 = vector.broadcast %28 : vector<32x1xi1> to vector<32x1xi1>
    %30 = arith.xori %26, %29 : vector<32x1xi1>
    %31 = arith.andi %30, %24 : vector<32x1xi1>
    %32 = vector.broadcast %20 : i32 to vector<32x1xi32>
    %33 = arith.addi %22, %32 : vector<32x1xi32>
    %34 = arith.select %31, %33, %22 : vector<32x1xi1>, vector<32x1xi32>
    %c0_i32_17 = arith.constant 0 : i32
    %35 = vector.broadcast %c0_i32_17 : i32 to vector<32x1xi32>
    %36 = arith.cmpi eq, %34, %35 : vector<32x1xi32>
    %cst_18 = arith.constant 0.000000e+00 : bf16
    %37 = vector.broadcast %cst_18 : bf16 to vector<32x128xbf16>
    %38 = vector.shape_cast %36 : vector<32x1xi1> to vector<32x1xi1>
    %39 = vector.broadcast %38 : vector<32x1xi1> to vector<32x128xi1>
    %40 = arith.select %39, %37, %16 : vector<32x128xi1>, vector<32x128xbf16>
    %c15_i32 = arith.constant 15 : i32
    %41 = vector.broadcast %c15_i32 : i32 to vector<32x1xi32>
    %42 = arith.cmpi eq, %34, %41 : vector<32x1xi32>
    %cst_19 = arith.constant 0.000000e+00 : bf16
    %43 = vector.broadcast %cst_19 : bf16 to vector<32x128xbf16>
    %44 = vector.shape_cast %42 : vector<32x1xi1> to vector<32x1xi1>
    %45 = vector.broadcast %44 : vector<32x1xi1> to vector<32x128xi1>
    %46 = arith.select %45, %43, %17 : vector<32x128xi1>, vector<32x128xbf16>
    %c128 = arith.constant 128 : index
    %c0_20 = arith.constant 0 : index
    %47 = vector.load %arg4[%c128, %c0_20] : memref<384x128xbf16, #tpu.memory_space<vmem>>, vector<128x128xbf16>
    %cst_21 = arith.constant dense<0.000000e+00> : vector<32x128xf32>
    %48 = tpu.matmul %11, %47, %cst_21 {dimension_numbers = #tpu.dot_dimension_numbers<[1], [0], [0], [1], [0, 0, 1, 1], [], []>} : vector<32x128xbf16>, vector<128x128xbf16>, vector<32x128xf32> -> vector<32x128xf32>
    %c0_22 = arith.constant 0 : index
    %c0_23 = arith.constant 0 : index
    %49 = vector.load %arg4[%c0_22, %c0_23] : memref<384x128xbf16, #tpu.memory_space<vmem>>, vector<128x128xbf16>
    %cst_24 = arith.constant dense<0.000000e+00> : vector<32x128xf32>
    %50 = tpu.matmul %40, %49, %cst_24 {dimension_numbers = #tpu.dot_dimension_numbers<[1], [0], [0], [1], [0, 0, 1, 1], [], []>} : vector<32x128xbf16>, vector<128x128xbf16>, vector<32x128xf32> -> vector<32x128xf32>
    %51 = arith.addf %48, %50 : vector<32x128xf32>
    %c256 = arith.constant 256 : index
    %c0_25 = arith.constant 0 : index
    %52 = vector.load %arg4[%c256, %c0_25] : memref<384x128xbf16, #tpu.memory_space<vmem>>, vector<128x128xbf16>
    %cst_26 = arith.constant dense<0.000000e+00> : vector<32x128xf32>
    %53 = tpu.matmul %46, %52, %cst_26 {dimension_numbers = #tpu.dot_dimension_numbers<[1], [0], [0], [1], [0, 0, 1, 1], [], []>} : vector<32x128xbf16>, vector<128x128xbf16>, vector<32x128xf32> -> vector<32x128xf32>
    %54 = arith.addf %51, %53 : vector<32x128xf32>
    %c0_27 = arith.constant 0 : index
    %c0_28 = arith.constant 0 : index
    %55 = vector.load %arg5[%c0_27, %c0_28] : memref<1x128xf32, #tpu.memory_space<vmem>>, vector<1x128xf32>
    %56 = vector.broadcast %55 : vector<1x128xf32> to vector<32x128xf32>
    %57 = arith.addf %54, %56 : vector<32x128xf32>
    %cst_29 = arith.constant 0.000000e+00 : f32
    %58 = vector.broadcast %cst_29 : f32 to vector<32x128xf32>
    %59 = arith.maximumf %57, %58 : vector<32x128xf32>
    %60 = vector.shape_cast %59 : vector<32x128xf32> to vector<2x16x128xf32>
    %c0_30 = arith.constant 0 : index
    %c0_31 = arith.constant 0 : index
    %c0_32 = arith.constant 0 : index
    %61 = vector.load %arg6[%c0_30, %c0_31, %c0_32] : memref<2x16x128xf32, #tpu.memory_space<vmem>>, vector<2x16x128xf32>
    tpu.vector_store %arg6[%c0_30, %c0_31, %c0_32], %60 {strides = array<i32>} : memref<2x16x128xf32, #tpu.memory_space<vmem>>, vector<2x16x128xf32>,
    return
  }
  func.func @transform_0(%arg0: i32) -> (i32, i32, i32) {
    %c0_i32 = arith.constant 0 : i32
    %c0_i32_0 = arith.constant 0 : i32
    %c0_i32_1 = arith.constant 0 : i32
    return %arg0, %c0_i32, %c0_i32_0 : i32, i32, i32
  }
  func.func @transform_1(%arg0: i32) -> (i32, i32) {
    %c0_i32 = arith.constant 0 : i32
    %c0_i32_0 = arith.constant 0 : i32
    %c0_i32_1 = arith.constant 0 : i32
    return %c0_i32, %c0_i32_0 : i32, i32
  }
  func.func @transform_2(%arg0: i32) -> (i32, i32) {
    %c0_i32 = arith.constant 0 : i32
    %c0_i32_0 = arith.constant 0 : i32
    %c0_i32_1 = arith.constant 0 : i32
    return %c0_i32, %c0_i32_0 : i32, i32
  }
  func.func @transform_3(%arg0: i32) -> (i32, i32) {
    %c0_i32 = arith.constant 0 : i32
    %c0_i32_0 = arith.constant 0 : i32
    %c0_i32_1 = arith.constant 0 : i32
    return %c0_i32, %c0_i32_0 : i32, i32
  }
  func.func @transform_4(%arg0: i32) -> (i32, i32) {
    %c0_i32 = arith.constant 0 : i32
    %c0_i32_0 = arith.constant 0 : i32
    %c0_i32_1 = arith.constant 0 : i32
    return %c0_i32, %c0_i32_0 : i32, i32
  }
  func.func @transform_5(%arg0: i32) -> (i32, i32, i32) {
    %c0_i32 = arith.constant 0 : i32
    %c0_i32_0 = arith.constant 0 : i32
    %c0_i32_1 = arith.constant 0 : i32
    return %arg0, %c0_i32, %c0_i32_0 : i32, i32, i32
  }
}

</mosaic_0001>

<bundles_post_ra>
// kernel: conv_block_forward.2
= control target key start
LH: loop header
LB: loop body
LE: loop exit
PB: predicated region body
PF: predicated region fallthrough
CT: control target
= control target key end

     0   :  { %10 = vsyncpa [#allocation4], 0  ;;  %s1121_s0 = inlined_call_operand.hbm [shape: bf16[2,16,64], index: 0, kind: input, shape index: {}]   ;;  %s1122_s1 = inlined_call_operand.hbm [shape: bf16[192,128], index: 1, kind: input, shape index: {}]   ;;  %s1123_s2 = inlined_call_operand.hbm [shape: bf16[2,16,128], index: 2, kind: output, shape index: {0}]   ;;  %s1124_s3 = inlined_call_operand.hbm [shape: f32[1,1,128], index: 3, kind: output, shape index: {1}]   ;;  %s1125_s4 = inlined_call_operand.hbm [shape: f32[1,1,128], index: 4, kind: output, shape index: {2}]  }
   0x1   :  { %11 = vsyncpa [#allocation7], 0 }
   0x2   :  { %12 = vsyncpa [#allocation5], 0 }
   0x3   :  { %13 = vsyncpa [#allocation10], 0  ;;  %s878_s15 = smov [#allocation3]   ;;  %s760_s19 = scalar_lea.hbm %s1121_s0, 256 }
   0x4   :  { %s19_s16 = sshll.u32 %s878_s15, 4  ;;  %p761_p0 = scmp.ne.s32.totalorder %s1121_s0, %s760_s19  ;;  %s20_s16 = int_to_ptr.vmem [resolvable:$true] %s19_s16 }
   0x5   :  { %p764_p1 = scmp.lt.u32.totalorder %s760_s19, %s1121_s0 }
   0x7   :  { %p766_p2 = pnand %p764_p1, %p761_p0 }
   0x9   :  { %769 = shalt.err (!%p766_p2)
}
   0xa   :  { %s770_s24 = scalar_lea.vmem %s20_s16, 256  ;;  %p775_p4 = scmp.lt.s32.totalorder %s20_s16, %s20_s16 }
   0xb   :  { %p771_p3 = scmp.ne.s32.totalorder %s20_s16, %s770_s24  ;;  %p776_p5 = scmp.lt.s32.totalorder %s770_s24, %s770_s24 }
   0xd   :  { %p777_p6 = por %p776_p5, %p775_p4 }
   0xf   :  { %p778_p7 = pnand %p777_p6, %p771_p3 }
  0x11   :  { %781 = shalt.err (!%p778_p7)
}
  0x12   :  { %s879_s25 = smov 64   ;;  %s880_s26 = smov 4  }
  0x13   :  { %25 = dma.hbm_to_vmem [thread:$0]  %s1121_s0, 256, %s20_s16, [#allocation4], %s879_s25, %s879_s25, %s880_s26  }
  0x14   :  { %s881_s29 = smov [#allocation6]   ;;  %s782_s7 = scalar_lea.hbm %s1122_s1, 1536 }
  0x15   :  { %s31_s30 = sshll.u32 %s881_s29, 4  ;;  %p783_p8 = scmp.ne.s32.totalorder %s1122_s1, %s782_s7  ;;  %s32_s30 = int_to_ptr.vmem [resolvable:$true] %s31_s30 }
  0x16   :  { %p786_p9 = scmp.lt.u32.totalorder %s782_s7, %s1122_s1 }
  0x18   :  { %p788_p10 = pnand %p786_p9, %p783_p8 }
  0x1a   :  { %791 = shalt.err (!%p788_p10)
}
  0x1b   :  { %s792_s12 = scalar_lea.vmem %s32_s30, 1536  ;;  %p797_p12 = scmp.lt.s32.totalorder %s32_s30, %s32_s30 }
  0x1c   :  { %p793_p11 = scmp.ne.s32.totalorder %s32_s30, %s792_s12  ;;  %p798_p13 = scmp.lt.s32.totalorder %s792_s12, %s792_s12 }
  0x1e   :  { %p799_p0 = por %p798_p13, %p797_p12 }
  0x20   :  { %p800_p1 = pnand %p799_p0, %p793_p11 }
  0x22   :  { %803 = shalt.err (!%p800_p1)
}
  0x23   :  { %37 = dma.hbm_to_vmem [thread:$0]  %s1122_s1, 1536, %s32_s30, [#allocation7], %s879_s25, %s879_s25, %s880_s26  }
  0x24   :  { %870 = dma.done.wait [#allocation4], 256  }
  0x25   :  { %871 = vsyncadd [#allocation4], 4294967040 }
  0x26   :  { %872 = dma.done.wait [#allocation7], 1536  }
  0x27   :  { %873 = vsyncadd [#allocation7], 4294965760  ;;  %v122_v0 = vlaneseq  ;;  %vm882_vm0 = vmmov 0   ;;  %vm51_vm2 = vcmask 516096   ;;  %vm52_vm3 = vsmask.f32 256 }
  0x28   :  { %vm945_vm1 = vmpackc.low %vm882_vm0, %vm882_vm0  ;;  %vm57_vm4 = vsmask.f32 4368  ;;  %v748_v5 = vld [vmem:[#allocation6 + $0x20] sm:$0xff]   ;;  %vm99_vm5 = vcmask 519168   ;;  %vm100_vm6 = vsmask.f32 7938 }
  0x29   :  { %v942_v1 = vshrl.u32 %v122_v0, 7  ;;  %vm289_vm7 = vcmask 523264   ;;  %v749_v6 = vld [vmem:[#allocation6 + $0x28] sm:$0xff]   ;;  %v883_v7 = vmov 0   ;;  %707 = vmatprep.subr.bf16.mxu0 %v748_v5  ;;  %vm955_vm8 = vmand %vm51_vm2, %vm52_vm3  ;;  %v750_v12 = vld [vmem:[#allocation6 + $0x30] sm:$0xff]   ;;  %vm215_vm9 = vcmask 1040384  }
  0x2a   :  { %v211_v8 = vsel %vm945_vm1, 65537, %v883_v7  ;;  %708 = vmatpush3.bf16.msra.mxu0 %v748_v5  ;;  %v752_v14 = vld [vmem:[#allocation6] sm:$0xff]   ;;  %vm216_vm10 = vcmask 1044484   ;;  %v47_v16 = vld [vmem:[#allocation3] sm:$0xf]  ;;  %v751_v26 = vld [vmem:[#allocation6 + $0x38] sm:$0xff]  }
  0x2b   :  { %v124_v2 = vadd.s32 8, %v942_v1  ;;  %v126_v4 = vadd.s32 24, %v942_v1  ;;  %v131_v10 = vand.u32 15, %v942_v1  ;;  %709 = vmatprep.subr.bf16.mxu0 %v749_v6  ;;  %v960_v15 = vrot.slane %v211_v8, 7  ;;  %v48_v17 = vld [vmem:[#allocation3 + $0x4] sm:$0xf]  ;;  %695 = vmatprep.subr.bf16.mxu1 %v752_v14  ;;  %vm970_vm12 = vmor %vm52_vm3, %vm57_vm4 }
  0x2c   :  { %v54_v18 = vld [vmem:[#allocation2] sm:$0x1]  ;;  %v60_v20 = vshrl.u32 %v47_v16, 16  ;;  %v63_v21 = vshll.u32 %v47_v16, 16  ;;  %v68_v22 = vshrl.u32 %v48_v17, 16  ;;  %696 = vmatpush3.bf16.msra.mxu1 %v752_v14  ;;  %v71_v23 = vshll.u32 %v48_v17, 16  ;;  %vm988_vm15 = vmand %vm99_vm5, %vm100_vm6 }
  0x2d   :  { %v138_v11 = vand.u32 15, %v124_v2  ;;  %v152_v13 = vand.u32 15, %v126_v4  ;;  %v55_v19 = vsel %vm955_vm8, 0, %v54_v18  ;;  %v641_v24 = vcombine.low %v47_v16, %v48_v17  ;;  %v754_v29 = vld [vmem:[#allocation6 + $0x8] sm:$0xff]   ;;  %v49_v31 = vld [vmem:[#allocation3 + $0x8] sm:$0xf]  ;;  %vm1008_vm3 = vmor %vm215_vm9, %vm216_vm10 }
  0x2e   :  { %710 = vmatpush3.bf16.msra.mxu0 %v749_v6  ;;  %56 = vst [vmem:[#allocation2] sm:$0x1] %v55_v19  ;;  %v62_v27 = vrot.slane %v60_v20, 7  ;;  %v70_v28 = vrot.slane %v68_v22, 7  ;;  %v50_v32 = vld [vmem:[#allocation3 + $0xc] sm:$0xf]  ;;  %697 = vmatprep.subr.bf16.mxu1 %v754_v29 }
  0x2f   :  { %vm964_vm11 = vcmp.eq.s32.totalorder %v138_v11, 15  ;;  %711 = vmatprep.subr.bf16.mxu0 %v750_v12  ;;  %715 = vmatprep.mubr.msk.bf16.mxu0 %vm289_vm7, %v641_v24  ;;  %vm975_vm13 = vcmp.eq.s32.totalorder %v152_v13, 15  ;;  %v980_v34 = vadd.s32 16, %v942_v1  ;;  %v753_v38 = vld [vmem:[#allocation6 + $0x40] sm:$0xff]   ;;  %v219_v39 = vrot.slane %v960_v15, 4  ;;  %v756_v47 = vld [vmem:[#allocation6 + $0x10] sm:$0xff]  }
  0x30   :  { %v65_v35 = vor.u32 %v63_v21, %v62_v27  ;;  %v66_v36 = vrot.slane %v62_v27, 4  ;;  %v73_v37 = vor.u32 %v71_v23, %v70_v28  ;;  %vm208_vm14 = vmpackc.low %vm964_vm11, %vm964_vm11  ;;  %v77_v41 = vshrl.u32 %v49_v31, 16  ;;  %698 = vmatpush3.bf16.msra.mxu1 %v754_v29  ;;  %v109_v50 = vld [vmem:[#allocation2 + $0x10] sm:$0x1]  ;;  %v758_v51 = vld [vmem:[#allocation6 + $0x18] sm:$0xff]   ;;  %s884_s1 = smov [#allocation8]  }
  0x31   :  { %v80_v42 = vshll.u32 %v49_v31, 16  ;;  %v86_v43 = vshrl.u32 %v50_v32, 16  ;;  %v89_v44 = vshll.u32 %v50_v32, 16  ;;  %v75_v46 = vrot.slane %v70_v28, 4  ;;  %vm210_vm0 = vmpackc.low %vm975_vm13, %vm975_vm13  ;;  %699 = vmatprep.subr.bf16.mxu1 %v756_v47  ;;  %v755_v61 = vld [vmem:[#allocation6 + $0x48] sm:$0xff]   ;;  %v759_v22 = vld [vmem:[#allocation6 + $0x58] sm:$0xff]  }
  0x32   :  { %712 = vmatpush3.bf16.msra.mxu0 %v750_v12  ;;  %v74_v45 = vsel %vm970_vm12, %v66_v36, %v73_v37  ;;  %v79_v48 = vrot.slane %v77_v41, 7  ;;  %v212_v52 = vsel %vm208_vm14, 65537, %v883_v7  ;;  %v642_v54 = vcombine.low %v49_v31, %v50_v32  ;;  %v757_v12 = vld [vmem:[#allocation6 + $0x50] sm:$0xff]   ;;  %vm1060_vm14 = vmand %vm51_vm2, %vm100_vm6  ;;  %s593_s14 = sshll.u32 %s884_s1, 4  ;;  %s594_s14 = int_to_ptr.vmem [resolvable:$true] %s593_s14 }
  0x33   :  { %713 = vmatprep.subr.bf16.mxu0 %v751_v26  ;;  %106 = vst.msk [vmem:[#allocation2 + $0x4] sm:$0xf] %vm99_vm5, %v74_v45  ;;  %v88_v49 = vrot.slane %v86_v43, 7  ;;  %v214_v62 = vsel %vm210_vm0, 65537, %v883_v7  ;;  %v220_v63 = vrot.slane %v212_v52, 7  ;;  %v145_v0 = vand.u32 15, %v980_v34  ;;  %p809_p3 = scmp.lt.s32.totalorder %s594_s14, %s594_s14 }
  0x34   :  { %v82_v56 = vor.u32 %v80_v42, %v79_v48  ;;  %v84_v57 = vrot.slane %v79_v48, 4  ;;  %700 = vmatpush3.bf16.msra.mxu1 %v756_v47  ;;  %v226_v5 = vrot.slane %v214_v62, 7  ;;  %vm1030_vm4 = vcmp.eq.s32.totalorder %v131_v10, 0  ;;  %s804_s15 = scalar_lea.vmem %s594_s14, 256 }
  0x35   :  { %v102_v53 = vld [vmem:[#allocation2] sm:$0xf]  ;;  %v91_v58 = vor.u32 %v89_v44, %v88_v49  ;;  %v93_v60 = vrot.slane %v88_v49, 4  ;;  %701 = vmatprep.subr.bf16.mxu1 %v758_v51  ;;  %v221_v8 = vsel %vm1008_vm3, %v219_v39, %v220_v63  ;;  %v222_v11 = vrot.slane %v220_v63, 4  ;;  %p805_p2 = scmp.ne.s32.totalorder %s594_s14, %s804_s15  ;;  %p810_p4 = scmp.lt.s32.totalorder %s804_s15, %s804_s15 }
  0x36   :  { %714 = vmatpush3.bf16.msra.mxu0 %v751_v26  ;;  %v103_v55 = vsel %vm988_vm15, %v65_v35, %v102_v53  ;;  %v83_v2 = vsel %vm970_vm12, %v75_v46, %v82_v56  ;;  %vm230_vm9 = vcmp.ne.s16.totalorder %v221_v8, 0  ;;  %v227_v1 = vsel %vm1008_vm3, %v219_v39, %v226_v5 }
  0x37   :  { %104 = vst [vmem:[#allocation2] sm:$0xf] %v103_v55  ;;  %719 = vmatprep.subr.bf16.mxu0 %v753_v38  ;;  %v92_v4 = vsel %vm970_vm12, %v84_v57, %v91_v58  ;;  %107 = vst.msk [vmem:[#allocation2 + $0x8] sm:$0xf] %vm99_vm5, %v83_v2  ;;  %v110_v6 = vsel %vm955_vm8, %v93_v60, %v109_v50  ;;  %v224_v13 = vsel %vm1008_vm3, %v222_v11, %v960_v15  ;;  %vm455_vm2 = vcmask 1046528   ;;  %p811_p5 = por %p810_p4, %p809_p3 }
  0x38   :  { %108 = vst.msk [vmem:[#allocation2 + $0xc] sm:$0xf] %vm99_vm5, %v92_v4  ;;  %111 = vst [vmem:[#allocation2 + $0x10] sm:$0x1] %v110_v6  ;;  %702 = vmatpush3.bf16.msra.mxu1 %v758_v51  ;;  %vm1041_vm5 = vcmp.eq.s32.totalorder %v145_v0, 0  ;;  %vm229_vm10 = vcmp.ne.s16.totalorder %v960_v15, 0 }
  0x39   :  { %716 = vmatmul.mubr.msk.bf16.vlgmr.msra.gmra.mrb[0].mxu0 %vm289_vm7, %v642_v54  ;;  %vm187_vm8 = vmpackc.low %vm1030_vm4, %vm1030_vm4  ;;  %vm232_vm11 = vcmp.ne.s16.totalorder %v227_v1, 0  ;;  %vm1054_vm13 = vcmp.ne.s16.totalorder %v224_v13, 0  ;;  %v228_v36 = vrot.slane %v226_v5, 4  ;;  %p812_p6 = pnand %p811_p5, %p805_p2 }
  0x3a   :  { %720 = vmatpush3.bf16.msra.mxu0 %v753_v38  ;;  %v117_v9 = vld [vmem:[#allocation2 + $0x4] sm:$0xf]  ;;  %vm189_vm12 = vmpackc.low %vm1041_vm5, %vm1041_vm5 }
  0x3b   :  { %721 = vmatprep.subr.bf16.mxu0 %v755_v61  ;;  %v192_v14 = vsel %vm945_vm1, 0, %v117_v9  ;;  %v235_v16 = vsel %vm230_vm9, 0, %v117_v9 }
  0x3e   :  { %722 = vmatpush3.bf16.msra.mxu0 %v755_v61  ;;  %v116_v17 = vld [vmem:[#allocation2] sm:$0xf]  ;;  %v118_v26 = vld [vmem:[#allocation2 + $0x8] sm:$0xf] }
  0x3f   :  { %v120_v18 = vld [vmem:[#allocation2] sm:$0xe]  ;;  %723 = vmatprep.subr.bf16.mxu0 %v757_v12  ;;  %v191_v20 = vsel %vm187_vm8, 0, %v116_v17  ;;  %v119_v23 = vld [vmem:[#allocation2 + $0xc] sm:$0xf]  ;;  %v193_v30 = vsel %vm189_vm12, 0, %v118_v26 }
  0x40   :  { %v234_v21 = vsel %vm229_vm10, 0, %v120_v18  ;;  %v633_v24 = vcombine.low %v191_v20, %v192_v14  ;;  %v113_v27 = vld [vmem:[#allocation2 + $0x10] sm:$0x1]  ;;  %v194_v28 = vsel %vm945_vm1, 0, %v119_v23  ;;  %v237_v29 = vsel %vm232_vm11, 0, %v119_v23 }
  0x41   :  { %v649_v25 = vcombine.low %v234_v21, %v235_v16  ;;  %v236_v31 = vsel %vm1054_vm13, 0, %v118_v26  ;;  %v114_v32 = vsel %vm1060_vm14, 0, %v113_v27  ;;  %v634_v34 = vcombine.low %v193_v30, %v194_v28 }
  0x42   :  { %724 = vmatpush3.bf16.msra.mxu0 %v757_v12  ;;  %703 = vmatprep.mubr.msk.bf16.mxu1 %vm289_vm7, %v633_v24  ;;  %v650_v35 = vcombine.low %v236_v31, %v237_v29  ;;  %115 = vst [vmem:[#allocation2 + $0x10] sm:$0x1] %v114_v32  ;;  %vm233_vm1 = vcmp.ne.s16.totalorder %v228_v36, 0 }
  0x43   :  { %v456_v33 = vrot.slane %v649_v25, 1  ;;  %725 = vmatprep.subr.bf16.mxu0 %v759_v22  ;;  %704 = vmatmul.mubr.msk.bf16.vlgmr.msra.gmra.mrb[0].mxu1 %vm289_vm7, %v634_v34 }
  0x44   :  { %v457_v3 = vrot.slane %v650_v35, 1 }
  0x46   :  { %726 = vmatpush3.bf16.msra.mxu0 %v759_v22  ;;  %v458_v37 = vsel %vm455_vm2, %v456_v33, %v457_v3 }
  0x47   :  { %727 = vmatprep.mubr.msk.bf16.mxu0 %vm289_vm7, %v458_v37 }
  0x49   :  { %v121_v38 = vld [vmem:[#allocation2 + $0x10] sm:$0x1] }
  0x4a   :  { %v238_v39 = vsel %vm233_vm1, 0, %v121_v38 }
  0x4b   :  { %v651_v40 = vcombine.low %v238_v39, %v238_v39 }
  0x4d   :  { %v459_v41 = vrot.slane %v651_v40, 1 }
  0x4f   :  { %v460_v42 = vsel %vm455_vm2, %v457_v3, %v459_v41 }
  0x50   :  { %728 = vmatmul.mubr.msk.bf16.vlgmr.msra.gmra.mrb[0].mxu0 %vm289_vm7, %v460_v42 }
 0x116   :  { %v705_v43 = vpop.f32.mrb[0].mxu1 }
 0x117   :  { %v330_v44 = vpop.f32.mrb[1].mxu1 }
 0x118   :  { %v706_v45 = vpop.f32.mrb[2].mxu1 }
 0x119   :  { %v333_v46 = vpop.f32.mrb[3].mxu1 }
 0x123   :  { %v729_v47 = vpop.f32.mrb[0].mxu0 }
 0x124   :  { %v731_v48 = vadd.f32 %v729_v47, %v705_v43  ;;  %v525_v49 = vpop.f32.mrb[1].mxu0 }
 0x125   :  { %v732_v50 = vadd.f32 %v525_v49, %v330_v44  ;;  %v730_v51 = vpop.f32.mrb[2].mxu0 }
 0x126   :  { %v733_v52 = vadd.f32 %v730_v51, %v706_v45  ;;  %v528_v53 = vpop.f32.mrb[3].mxu0  ;;  %v576_v60 = vmul.f32 %v731_v48, %v731_v48 }
 0x127   :  { %v734_v54 = vadd.f32 %v528_v53, %v333_v46  ;;  %v574_v56 = vmul.f32 %v732_v50, %v732_v50 }
 0x128   :  { %v674_v55 = vpack.c.bf16 %v733_v52, %v731_v48 }
 0x129   :  { %v669_v57 = vpack.c.bf16 %v734_v54, %v732_v50  ;;  %v564_v58 = vadd.f32 %v734_v54, %v732_v50  ;;  %v575_v59 = vmul.f32 %v734_v54, %v734_v54 }
 0x12a   :  { %676 = vst [vmem:[#allocation8 + $0x8] sm:$0xff] %v674_v55  }
 0x12b   :  { %v565_v61 = vadd.f32 %v731_v48, %v564_v58  ;;  %v578_v62 = vadd.f32 %v575_v59, %v574_v56  ;;  %670 = vst [vmem:[#allocation8] sm:$0xff] %v669_v57  }
 0x12c   :  { %815 = shalt.err (!%p812_p6)
}
 0x12d   :  { %s816_s18 = scalar_lea.hbm %s1123_s2, 256 }
 0x12e   :  { %p817_p7 = scmp.ne.s32.totalorder %s1123_s2, %s816_s18  ;;  %p820_p8 = scmp.lt.u32.totalorder %s816_s18, %s1123_s2 }
 0x130   :  { %p822_p9 = pnand %p820_p8, %p817_p7 }
 0x132   :  { %825 = shalt.err (!%p822_p9)
}
 0x133   :  { %599 = dma.vmem_to_hbm [thread:$0]  %s594_s14, 256, %s1123_s2, [#allocation5], %s879_s25, %s879_s25, %s880_s26   ;;  %v577_v63 = vmul.f32 %v733_v52, %v733_v52  ;;  %v566_v0 = vadd.f32 %v733_v52, %v565_v61  ;;  %v579_v2 = vadd.f32 %v578_v62, %v576_v60 }
 0x134   :  { %s885_s27 = smov [#allocation9]   ;;  %s886_s29 = smov [#allocation11]  }
 0x135   :  { %v580_v4 = vadd.f32 %v579_v2, %v577_v63  ;;  %v567_v5 = vrot.slane %v566_v0, 4  ;;  %s606_s28 = sshll.u32 %s885_s27, 4  ;;  %s616_s30 = sshll.u32 %s886_s29, 4  ;;  %s607_s28 = int_to_ptr.vmem [resolvable:$true] %s606_s28  ;;  %s1089_s30 = int_to_ptr.vmem [resolvable:$true] %s616_s30 }
 0x136   :  { %s826_s2 = scalar_lea.vmem %s607_s28, 16  ;;  %s830_s25 = scalar_lea.vmem %s607_s28, 32 }
 0x137   :  { %v568_v6 = vadd.f32 %v567_v5, %v566_v0  ;;  %v581_v7 = vrot.slane %v580_v4, 4  ;;  %p827_p10 = scmp.ne.s32.totalorder %s607_s28, %s826_s2  ;;  %p831_p11 = scmp.lt.s32.totalorder %s607_s28, %s607_s28 }
 0x138   :  { %p832_p12 = scmp.lt.s32.totalorder %s830_s25, %s826_s2 }
 0x139   :  { %v569_v8 = vrot.slane %v568_v6, 2  ;;  %v582_v11 = vadd.f32 %v581_v7, %v580_v4 }
 0x13a   :  { %p833_p13 = por %p832_p12, %p831_p11 }
 0x13b   :  { %v570_v12 = vadd.f32 %v569_v8, %v568_v6  ;;  %v583_v9 = vrot.slane %v582_v11, 2 }
 0x13c   :  { %p834_p0 = pnand %p833_p13, %p827_p10 }
 0x13d   :  { %v571_v13 = vrot.slane %v570_v12, 1  ;;  %v584_v1 = vadd.f32 %v583_v9, %v582_v11 }
 0x13f   :  { %v572_v10 = vadd.f32 %v571_v13, %v570_v12  ;;  %v585_v14 = vrot.slane %v584_v1, 1 }
 0x141   :  { %573 = vst [vmem:[#allocation9] sm:$0x1] %v572_v10  ;;  %v586_v16 = vadd.f32 %v585_v14, %v584_v1 }
 0x142   :  { %837 = shalt.err (!%p834_p0)
}
 0x143   :  { %s838_s6 = scalar_lea.hbm %s1124_s3, 16 }
 0x144   :  { %p839_p1 = scmp.ne.s32.totalorder %s1124_s3, %s838_s6  ;;  %p842_p2 = scmp.lt.u32.totalorder %s838_s6, %s1124_s3 }
 0x146   :  { %p844_p3 = pnand %p842_p2, %p839_p1 }
 0x148   :  { %847 = shalt.err (!%p844_p3)
}
 0x149   :  { %609 = dma.vmem_to_hbm [thread:$0]  %s607_s28, 16, %s1124_s3, [#allocation10]   ;;  %587 = vst [vmem:[#allocation11] sm:$0x1] %v586_v16 }
 0x14a   :  { %s848_s0 = scalar_lea.vmem %s1089_s30, 16  ;;  %s852_s13 = scalar_lea.vmem %s1089_s30, 32 }
 0x14b   :  { %p849_p4 = scmp.ne.s32.totalorder %s1089_s30, %s848_s0  ;;  %p853_p5 = scmp.lt.s32.totalorder %s1089_s30, %s1089_s30 }
 0x14c   :  { %p854_p6 = scmp.lt.s32.totalorder %s852_s13, %s848_s0 }
 0x14e   :  { %p855_p7 = por %p854_p6, %p853_p5 }
 0x150   :  { %p856_p8 = pnand %p855_p7, %p849_p4 }
 0x152   :  { %859 = shalt.err (!%p856_p8)
}
 0x153   :  { %s860_s15 = scalar_lea.hbm %s1125_s4, 16 }
 0x154   :  { %p861_p9 = scmp.ne.s32.totalorder %s1125_s4, %s860_s15  ;;  %p864_p10 = scmp.lt.u32.totalorder %s860_s15, %s1125_s4 }
 0x156   :  { %p866_p11 = pnand %p864_p10, %p861_p9 }
 0x158   :  { %869 = shalt.err (!%p866_p11)
}
 0x159   :  { %619 = dma.vmem_to_hbm [thread:$0]  %s1089_s30, 16, %s1125_s4, [#allocation10]  }
 0x15a   :  { %874 = dma.done.wait [#allocation5], 256  }
 0x15b   :  { %875 = vsyncadd [#allocation5], 4294967040 }
 0x15c   :  { %876 = dma.done.wait [#allocation10], 32  }
 0x15d   :  { %877 = vsyncadd [#allocation10], 4294967264 }
 0x15e   :  { %629 = vsyncpa [#allocation4], 1 }
 0x15f   :  { %630 = vsyncpa [#allocation7], 1 }
 0x160   :  { %631 = vsyncpa [#allocation5], 1 }
 0x161   :  { %632 = vsyncpa [#allocation10], 1 }

// kernel: tile.18
= control target key start
LH: loop header
LB: loop body
LE: loop exit
PB: predicated region body
PF: predicated region fallthrough
CT: control target
= control target key end

     0   :  { %s28_s0 = inlined_call_operand.vmem [shape: f32[8], index: 0, kind: input, shape index: {}]   ;;  %s29_s1 = inlined_call_operand.vmem [shape: f32[16,8], index: 1, kind: output, shape index: {}]  }
   0x1   :  { %v4_v0 = vld [vmem:[%s28_s0] ss:$0 sm:$0xff] }
   0x2   :  { %5 = vst [vmem:[%s29_s1] sm:$0xff] %v4_v0  ;;  %8 = vst [vmem:[%s29_s1 + $0x8] sm:$0xff] %v4_v0 }

// kernel: tile.19
= control target key start
LH: loop header
LB: loop body
LE: loop exit
PB: predicated region body
PF: predicated region fallthrough
CT: control target
= control target key end

     0   :  { %s167_s10 = smov 120   ;;  %s168_s11 = smov 104   ;;  %vm4_vm0 = vcmask 64512   ;;  %s253_s0 = inlined_call_operand.vmem [shape: f32[16,8], index: 0, kind: input, shape index: {}]   ;;  %s254_s1 = inlined_call_operand.hbm [shape: f32[1,128], index: 1, kind: output, shape index: {}]  }
   0x1   :  { %v112_v0 = vld [vmem:[%s253_s0 + $0xf] sm:$0x1]   ;;  %v114_v1 = vld [vmem:[%s253_s0 + $0xd] sm:$0x1]   ;;  %v113_v2 = vld [vmem:[%s253_s0 + $0xe] sm:$0x1]  }
   0x2   :  { %8 = vrot.lane.b32.xlu0 %v112_v0, %s167_s10  ;;  %20 = vrot.lane.b32.xlu1 %v114_v1, %s168_s11  ;;  %v115_v3 = vld [vmem:[%s253_s0 + $0xc] sm:$0x1]   ;;  %s169_s16 = smov 112   ;;  %s170_s17 = smov 96   ;;  %v116_v4 = vld [vmem:[%s253_s0 + $0xb] sm:$0x1]  }
   0x3   :  { %v117_v5 = vld [vmem:[%s253_s0 + $0xa] sm:$0x1]   ;;  %v3_v6 = vld [vmem:[%s253_s0] sm:$0x1]  }
   0x6   :  { %14 = vrot.lane.b32.xlu0 %v113_v2, %s169_s16  ;;  %26 = vrot.lane.b32.xlu1 %v115_v3, %s170_s17 }
   0x7   :  { %2 = vsyncpa [#allocation1], 0  ;;  %s171_s24 = smov 88   ;;  %s172_s25 = smov 80   ;;  %5 = vst.msk [vmem:[#allocation2] sm:$0x1] %vm4_vm0, %v3_v6  }
   0x8   :  { %v118_v7 = vld [vmem:[%s253_s0 + $0x9] sm:$0x1]   ;;  %v119_v8 = vld [vmem:[%s253_s0 + $0x8] sm:$0x1]   ;;  %s173_s30 = smov 72   ;;  %s174_s2 = smov 64  }
   0x9   :  { %v120_v9 = vld [vmem:[%s253_s0 + $0x7] sm:$0x1]   ;;  %v121_v10 = vld [vmem:[%s253_s0 + $0x6] sm:$0x1]   ;;  %s175_s7 = smov 56   ;;  %s176_s8 = smov 48  }
   0xa   :  { %32 = vrot.lane.b32.xlu0 %v116_v4, %s171_s24  ;;  %38 = vrot.lane.b32.xlu1 %v117_v5, %s172_s25  ;;  %v122_v11 = vld [vmem:[%s253_s0 + $0x5] sm:$0x1]   ;;  %v123_v12 = vld [vmem:[%s253_s0 + $0x4] sm:$0x1]   ;;  %s177_s13 = smov 40   ;;  %s178_s14 = smov 32  }
   0xb   :  { %v124_v13 = vld [vmem:[%s253_s0 + $0x3] sm:$0x1]   ;;  %v125_v14 = vld [vmem:[%s253_s0 + $0x2] sm:$0x1]   ;;  %s179_s19 = smov 24   ;;  %s180_s20 = smov 16  }
   0xc   :  { %v126_v15 = vld [vmem:[%s253_s0 + $0x1] sm:$0x1]   ;;  %s181_s0 = smov 8   ;;  %vm10_vm1 = vcmask 1048512   ;;  %vm16_vm2 = vcmask 982912   ;;  %vm22_vm3 = vcmask 917312  }
   0xd   :  { %vm28_vm4 = vcmask 851712   ;;  %vm34_vm5 = vcmask 786112   ;;  %vm40_vm6 = vcmask 720512   ;;  %vm46_vm7 = vcmask 654912   ;;  %s182_s23 = smov [#allocation0]  }
   0xe   :  { %44 = vrot.lane.b32.xlu0 %v118_v7, %s173_s30  ;;  %50 = vrot.lane.b32.xlu1 %v119_v8, %s174_s2  ;;  %vm52_vm8 = vcmask 589312   ;;  %vm58_vm9 = vcmask 523712   ;;  %vm64_vm10 = vcmask 458112   ;;  %vm70_vm11 = vcmask 392512   ;;  %s106_s24 = sshll.u32 %s182_s23, 4  ;;  %s107_s24 = int_to_ptr.vmem [resolvable:$true] %s106_s24 }
   0xf   :  { %vm76_vm12 = vcmask 326912   ;;  %vm82_vm13 = vcmask 261312   ;;  %vm88_vm14 = vcmask 195712   ;;  %vm94_vm15 = vcmask 130112   ;;  %s143_s25 = scalar_lea.vmem %s107_s24, 16  ;;  %s147_s26 = scalar_lea.vmem %s107_s24, 32 }
  0x10   :  { %p144_p0 = scmp.ne.s32.totalorder %s107_s24, %s143_s25  ;;  %p148_p1 = scmp.lt.s32.totalorder %s107_s24, %s107_s24 }
  0x11   :  { %p149_p2 = scmp.lt.s32.totalorder %s147_s26, %s143_s25 }
  0x12   :  { %56 = vrot.lane.b32.xlu0 %v120_v9, %s175_s7  ;;  %62 = vrot.lane.b32.xlu1 %v121_v10, %s176_s8 }
  0x13   :  { %p150_p3 = por %p149_p2, %p148_p1 }
  0x15   :  { %p151_p4 = pnand %p150_p3, %p144_p0 }
  0x16   :  { %68 = vrot.lane.b32.xlu0 %v122_v11, %s177_s13  ;;  %74 = vrot.lane.b32.xlu1 %v123_v12, %s178_s14 }
  0x1a   :  { %80 = vrot.lane.b32.xlu0 %v124_v13, %s179_s19  ;;  %86 = vrot.lane.b32.xlu1 %v125_v14, %s180_s20 }
  0x1e   :  { %92 = vrot.lane.b32.xlu0 %v126_v15, %s181_s0 }
  0x74   :  { %v9_v16 = vpop.permute.xlu0 %8   ;;  %v21_v17 = vpop.permute.xlu1 %20  }
  0x75   :  { %11 = vst.msk [vmem:[#allocation2] sm:$0x1] %vm10_vm1, %v9_v16  }
  0x78   :  { %v15_v18 = vpop.permute.xlu0 %14   ;;  %v27_v19 = vpop.permute.xlu1 %26  }
  0x79   :  { %17 = vst.msk [vmem:[#allocation2] sm:$0x1] %vm16_vm2, %v15_v18  }
  0x7a   :  { %23 = vst.msk [vmem:[#allocation2] sm:$0x1] %vm22_vm3, %v21_v17  }
  0x7b   :  { %29 = vst.msk [vmem:[#allocation2] sm:$0x1] %vm28_vm4, %v27_v19  }
  0x7c   :  { %v33_v20 = vpop.permute.xlu0 %32   ;;  %v39_v21 = vpop.permute.xlu1 %38  }
  0x7d   :  { %35 = vst.msk [vmem:[#allocation2] sm:$0x1] %vm34_vm5, %v33_v20  }
  0x7e   :  { %41 = vst.msk [vmem:[#allocation2] sm:$0x1] %vm40_vm6, %v39_v21  }
  0x80   :  { %v45_v22 = vpop.permute.xlu0 %44   ;;  %v51_v23 = vpop.permute.xlu1 %50  }
  0x81   :  { %47 = vst.msk [vmem:[#allocation2] sm:$0x1] %vm46_vm7, %v45_v22  }
  0x82   :  { %53 = vst.msk [vmem:[#allocation2] sm:$0x1] %vm52_vm8, %v51_v23  }
  0x84   :  { %v57_v24 = vpop.permute.xlu0 %56   ;;  %v63_v25 = vpop.permute.xlu1 %62  }
  0x85   :  { %59 = vst.msk [vmem:[#allocation2] sm:$0x1] %vm58_vm9, %v57_v24  }
  0x86   :  { %65 = vst.msk [vmem:[#allocation2] sm:$0x1] %vm64_vm10, %v63_v25  }
  0x88   :  { %v69_v26 = vpop.permute.xlu0 %68   ;;  %v75_v27 = vpop.permute.xlu1 %74  }
  0x89   :  { %71 = vst.msk [vmem:[#allocation2] sm:$0x1] %vm70_vm11, %v69_v26  }
  0x8a   :  { %77 = vst.msk [vmem:[#allocation2] sm:$0x1] %vm76_vm12, %v75_v27  }
  0x8c   :  { %v81_v28 = vpop.permute.xlu0 %80   ;;  %v87_v29 = vpop.permute.xlu1 %86  }
  0x8d   :  { %83 = vst.msk [vmem:[#allocation2] sm:$0x1] %vm82_vm13, %v81_v28  }
  0x8e   :  { %89 = vst.msk [vmem:[#allocation2] sm:$0x1] %vm88_vm14, %v87_v29  }
  0x90   :  { %v93_v30 = vpop.permute.xlu0 %92  }
  0x91   :  { %95 = vst.msk [vmem:[#allocation2] sm:$0x1] %vm94_vm15, %v93_v30  }
  0x98   :  { %v99_v31 = vld [vmem:[#allocation2] sm:$0x1] }
  0x99   :  { %101 = vst [vmem:[#allocation0] sm:$0x1] %v99_v31 }
  0x9a   :  { %154 = shalt.err (!%p151_p4)
}
  0x9b   :  { %s155_s29 = scalar_lea.hbm %s254_s1, 16 }
  0x9c   :  { %p156_p5 = scmp.ne.s32.totalorder %s254_s1, %s155_s29  ;;  %p159_p6 = scmp.lt.u32.totalorder %s155_s29, %s254_s1 }
  0x9e   :  { %p161_p7 = pnand %p159_p6, %p156_p5 }
  0xa0   :  { %164 = shalt.err (!%p161_p7)
}
  0xa1   :  { %109 = dma.vmem_to_hbm [thread:$0]  %s107_s24, 16, %s254_s1, [#allocation1]  }
  0xa2   :  { %165 = dma.done.wait [#allocation1], 16  }
  0xa3   :  { %166 = vsyncadd [#allocation1], 4294967280 }
  0xa4   :  { %111 = vsyncpa [#allocation1], 1 }

// kernel: conv_block_forward.3
= control target key start
LH: loop header
LB: loop body
LE: loop exit
PB: predicated region body
PF: predicated region fallthrough
CT: control target
= control target key end

     0   :  { %10 = vsyncpa [#allocation4], 0  ;;  %s1319_s0 = inlined_call_operand.hbm [shape: bf16[2,16,128], index: 0, kind: input, shape index: {}]   ;;  %s1320_s1 = inlined_call_operand.hbm [shape: f32[1,128], index: 1, kind: input, shape index: {}]   ;;  %s1321_s2 = inlined_call_operand.hbm [shape: f32[1,128], index: 2, kind: input, shape index: {}]   ;;  %s1322_s3 = inlined_call_operand.hbm [shape: bf16[384,128], index: 3, kind: input, shape index: {}]   ;;  %s1323_s4 = inlined_call_operand.hbm [shape: f32[1,128], index: 4, kind: input, shape index: {}]   ;;  %s1324_s5 = inlined_call_operand.hbm [shape: f32[2,16,128], index: 5, kind: output, shape index: {}]  }
   0x1   :  { %11 = vsyncpa [#allocation7], 0 }
   0x2   :  { %12 = vsyncpa [#allocation10], 0 }
   0x3   :  { %13 = vsyncpa [#allocation5], 0  ;;  %s1058_s18 = smov [#allocation6]   ;;  %s918_s22 = scalar_lea.hbm %s1320_s1, 16 }
   0x4   :  { %s32_s19 = sshll.u32 %s1058_s18, 4  ;;  %p919_p0 = scmp.ne.s32.totalorder %s1320_s1, %s918_s22  ;;  %s33_s19 = int_to_ptr.vmem [resolvable:$true] %s32_s19 }
   0x5   :  { %p922_p1 = scmp.lt.u32.totalorder %s918_s22, %s1320_s1 }
   0x7   :  { %p924_p2 = pnand %p922_p1, %p919_p0 }
   0x9   :  { %927 = shalt.err (!%p924_p2)
}
   0xa   :  { %s928_s27 = scalar_lea.vmem %s33_s19, 16  ;;  %s932_s28 = scalar_lea.vmem %s33_s19, 32 }
   0xb   :  { %p929_p3 = scmp.ne.s32.totalorder %s33_s19, %s928_s27  ;;  %p933_p4 = scmp.lt.s32.totalorder %s33_s19, %s33_s19 }
   0xc   :  { %p934_p5 = scmp.lt.s32.totalorder %s932_s28, %s928_s27 }
   0xe   :  { %p935_p6 = por %p934_p5, %p933_p4 }
  0x10   :  { %p936_p7 = pnand %p935_p6, %p929_p3 }
  0x12   :  { %939 = shalt.err (!%p936_p7)
}
  0x13   :  { %35 = dma.hbm_to_vmem [thread:$0]  %s1320_s1, 16, %s33_s19, [#allocation7]  }
  0x14   :  { %s1059_s6 = smov [#allocation9]   ;;  %s1060_s8 = smov [#allocation3]  }
  0x15   :  { %s51_s7 = sshll.u32 %s1059_s6, 4  ;;  %s19_s9 = sshll.u32 %s1060_s8, 4  ;;  %s52_s7 = int_to_ptr.vmem [resolvable:$true] %s51_s7  ;;  %s20_s9 = int_to_ptr.vmem [resolvable:$true] %s19_s9 }
  0x16   :  { %s940_s12 = scalar_lea.hbm %s1322_s3, 3072 }
  0x17   :  { %p941_p8 = scmp.ne.s32.totalorder %s1322_s3, %s940_s12  ;;  %p944_p9 = scmp.lt.u32.totalorder %s940_s12, %s1322_s3 }
  0x19   :  { %p946_p10 = pnand %p944_p9, %p941_p8 }
  0x1b   :  { %949 = shalt.err (!%p946_p10)
}
  0x1c   :  { %s950_s1 = scalar_lea.vmem %s52_s7, 3072  ;;  %p955_p12 = scmp.lt.s32.totalorder %s52_s7, %s52_s7 }
  0x1d   :  { %p951_p11 = scmp.ne.s32.totalorder %s52_s7, %s950_s1  ;;  %p956_p13 = scmp.lt.s32.totalorder %s950_s1, %s950_s1 }
  0x1f   :  { %p957_p0 = por %p956_p13, %p955_p12 }
  0x21   :  { %p958_p1 = pnand %p957_p0, %p951_p11 }
  0x23   :  { %961 = shalt.err (!%p958_p1)
}
  0x24   :  { %s1061_s17 = smov 64   ;;  %s1062_s18 = smov 4  }
  0x25   :  { %57 = dma.hbm_to_vmem [thread:$0]  %s1322_s3, 3072, %s52_s7, [#allocation10], %s1061_s17, %s1061_s17, %s1062_s18  }
  0x26   :  { %s962_s23 = scalar_lea.hbm %s1319_s0, 256 }
  0x27   :  { %p963_p2 = scmp.ne.s32.totalorder %s1319_s0, %s962_s23  ;;  %p966_p3 = scmp.lt.u32.totalorder %s962_s23, %s1319_s0 }
  0x29   :  { %p968_p4 = pnand %p966_p3, %p963_p2 }
  0x2b   :  { %971 = shalt.err (!%p968_p4)
}
  0x2c   :  { %s972_s28 = scalar_lea.vmem %s20_s9, 256  ;;  %p977_p6 = scmp.lt.s32.totalorder %s20_s9, %s20_s9 }
  0x2d   :  { %p973_p5 = scmp.ne.s32.totalorder %s20_s9, %s972_s28  ;;  %p978_p7 = scmp.lt.s32.totalorder %s972_s28, %s972_s28 }
  0x2f   :  { %p979_p8 = por %p978_p7, %p977_p6 }
  0x31   :  { %p980_p9 = pnand %p979_p8, %p973_p5 }
  0x33   :  { %983 = shalt.err (!%p980_p9)
}
  0x34   :  { %25 = dma.hbm_to_vmem [thread:$0]  %s1319_s0, 256, %s20_s9, [#allocation4], %s1061_s17, %s1061_s17, %s1062_s18  }
  0x35   :  { %s1063_s30 = smov [#allocation8]   ;;  %s1064_s7 = smov [#allocation11]  }
  0x36   :  { %s42_s6 = sshll.u32 %s1063_s30, 4  ;;  %s64_s8 = sshll.u32 %s1064_s7, 4  ;;  %s43_s6 = int_to_ptr.vmem [resolvable:$true] %s42_s6  ;;  %s65_s8 = int_to_ptr.vmem [resolvable:$true] %s64_s8 }
  0x37   :  { %s984_s12 = scalar_lea.hbm %s1321_s2, 16 }
  0x38   :  { %p985_p10 = scmp.ne.s32.totalorder %s1321_s2, %s984_s12  ;;  %p988_p11 = scmp.lt.u32.totalorder %s984_s12, %s1321_s2 }
  0x3a   :  { %p990_p12 = pnand %p988_p11, %p985_p10 }
  0x3c   :  { %993 = shalt.err (!%p990_p12)
}
  0x3d   :  { %s994_s0 = scalar_lea.vmem %s43_s6, 16  ;;  %s998_s9 = scalar_lea.vmem %s43_s6, 32 }
  0x3e   :  { %p995_p13 = scmp.ne.s32.totalorder %s43_s6, %s994_s0  ;;  %p999_p0 = scmp.lt.s32.totalorder %s43_s6, %s43_s6 }
  0x3f   :  { %p1000_p1 = scmp.lt.s32.totalorder %s998_s9, %s994_s0 }
  0x41   :  { %p1001_p2 = por %p1000_p1, %p999_p0 }
  0x43   :  { %p1002_p3 = pnand %p1001_p2, %p995_p13 }
  0x45   :  { %1005 = shalt.err (!%p1002_p3)
}
  0x46   :  { %45 = dma.hbm_to_vmem [thread:$0]  %s1321_s2, 16, %s43_s6, [#allocation7]  }
  0x47   :  { %s1006_s20 = scalar_lea.hbm %s1323_s4, 16 }
  0x48   :  { %p1007_p4 = scmp.ne.s32.totalorder %s1323_s4, %s1006_s20  ;;  %p1010_p5 = scmp.lt.u32.totalorder %s1006_s20, %s1323_s4 }
  0x4a   :  { %p1012_p6 = pnand %p1010_p5, %p1007_p4 }
  0x4c   :  { %1015 = shalt.err (!%p1012_p6)
}
  0x4d   :  { %s1016_s25 = scalar_lea.vmem %s65_s8, 16  ;;  %s1020_s26 = scalar_lea.vmem %s65_s8, 32 }
  0x4e   :  { %p1017_p7 = scmp.ne.s32.totalorder %s65_s8, %s1016_s25  ;;  %p1021_p8 = scmp.lt.s32.totalorder %s65_s8, %s65_s8 }
  0x4f   :  { %p1022_p9 = scmp.lt.s32.totalorder %s1020_s26, %s1016_s25 }
  0x51   :  { %p1023_p10 = por %p1022_p9, %p1021_p8 }
  0x53   :  { %p1024_p11 = pnand %p1023_p10, %p1017_p7 }
  0x55   :  { %1027 = shalt.err (!%p1024_p11)
}
  0x56   :  { %67 = dma.hbm_to_vmem [thread:$0]  %s1323_s4, 16, %s65_s8, [#allocation10]  }
  0x57   :  { %1050 = dma.done.wait [#allocation4], 256  }
  0x58   :  { %1051 = vsyncadd [#allocation4], 4294967040 }
  0x59   :  { %1052 = dma.done.wait [#allocation7], 32  }
  0x5a   :  { %1053 = vsyncadd [#allocation7], 4294967264 }
  0x5b   :  { %1054 = dma.done.wait [#allocation10], 3088  }
  0x5c   :  { %1055 = vsyncadd [#allocation10], 4294964208  ;;  %v894_v0 = vld [vmem:[#allocation9 + $0x40] sm:$0xff]   ;;  %v205_v1 = vlaneseq  ;;  %v895_v2 = vld [vmem:[#allocation9 + $0x48] sm:$0xff]   ;;  %vm122_vm0 = vcmask 1040384   ;;  %vm1065_vm3 = vmmov 0  }
  0x5d   :  { %834 = vmatprep.subr.bf16.mxu0 %v894_v0  ;;  %vm123_vm1 = vsmask.f32 256  ;;  %v896_v3 = vld [vmem:[#allocation9 + $0x50] sm:$0xff]   ;;  %vm1168_vm4 = vmpackc.low %vm1065_vm3, %vm1065_vm3  ;;  %v897_v7 = vld [vmem:[#allocation9 + $0x58] sm:$0xff]   ;;  %vm138_vm5 = vsmask.f32 4368 }
  0x5e   :  { %835 = vmatpush3.bf16.msra.mxu0 %v894_v0  ;;  %v1160_v4 = vshrl.u32 %v205_v1, 7  ;;  %vm1164_vm2 = vmand %vm122_vm0, %vm123_vm1  ;;  %v902_v8 = vld [vmem:[#allocation9] sm:$0xff]   ;;  %v776_v10 = vld [vmem:[#allocation3] sm:$0xff]   ;;  %vm180_vm6 = vcmask 1043456   ;;  %vm181_vm7 = vsmask.f32 7938 }
  0x5f   :  { %836 = vmatprep.subr.bf16.mxu0 %v895_v2  ;;  %v735_v11 = vld [vmem:[#allocation6] ss:$0 sm:$0xff]  ;;  %v736_v12 = vld [vmem:[#allocation8] ss:$0 sm:$0xff]  ;;  %814 = vmatprep.subr.bf16.mxu1 %v902_v8  ;;  %v777_v14 = vunpack.c.l.bf16 %v776_v10  ;;  %v778_v15 = vunpack.c.h.bf16 %v776_v10  ;;  %v125_v16 = vld [vmem:[#allocation2] sm:$0x1] }
  0x60   :  { %v207_v9 = vadd.s32 8, %v1160_v4  ;;  %v209_v13 = vadd.s32 24, %v1160_v4  ;;  %815 = vmatpush3.bf16.msra.mxu1 %v902_v8  ;;  %v126_v17 = vsel %vm1164_vm2, 0, %v125_v16  ;;  %v898_v18 = vld [vmem:[#allocation9 + $0x60] sm:$0xff]   ;;  %v904_v21 = vld [vmem:[#allocation9 + $0x8] sm:$0xff]   ;;  %v783_v22 = vld [vmem:[#allocation3 + $0x8] sm:$0xff]  }
  0x61   :  { %v101_v19 = vmul.f32 %v777_v14, %v735_v11  ;;  %v102_v20 = vmul.f32 %v778_v15, %v735_v11  ;;  %127 = vst [vmem:[#allocation2] sm:$0x1] %v126_v17  ;;  %v1066_v23 = vmov 0   ;;  %v781_v25 = vunpack.c.l.bf16 %v783_v22  ;;  %816 = vmatprep.subr.bf16.mxu1 %v904_v21  ;;  %v906_v31 = vld [vmem:[#allocation9 + $0x10] sm:$0xff]   ;;  %v899_v33 = vld [vmem:[#allocation9 + $0x68] sm:$0xff]   ;;  %v908_v41 = vld [vmem:[#allocation9 + $0x18] sm:$0xff]  }
  0x62   :  { %837 = vmatpush3.bf16.msra.mxu0 %v895_v2  ;;  %v294_v24 = vsel %vm1168_vm4, 65537, %v1066_v23  ;;  %v782_v26 = vunpack.c.h.bf16 %v783_v22  ;;  %v214_v27 = vand.u32 15, %v1160_v4  ;;  %v221_v28 = vand.u32 15, %v207_v9  ;;  %v900_v47 = vld [vmem:[#allocation9 + $0x70] sm:$0xff]   ;;  %v910_v50 = vld [vmem:[#allocation9 + $0x20] sm:$0xff]   ;;  %vm1200_vm11 = vmor %vm123_vm1, %vm138_vm5  ;;  %s1067_s4 = smov [#allocation12]  }
  0x63   :  { %838 = vmatprep.subr.bf16.mxu0 %v896_v3  ;;  %v112_v29 = vadd.f32 %v736_v12, %v101_v19  ;;  %v113_v30 = vadd.f32 %v736_v12, %v102_v20  ;;  %v235_v32 = vand.u32 15, %v209_v13  ;;  %v103_v34 = vmul.f32 %v781_v25, %v735_v11  ;;  %v901_v61 = vld [vmem:[#allocation9 + $0x78] sm:$0xff]   ;;  %vm1214_vm13 = vmand %vm180_vm6, %vm181_vm7  ;;  %v903_v25 = vld [vmem:[#allocation9 + $0x80] sm:$0xff]   ;;  %s721_s28 = sshll.u32 %s1067_s4, 4  ;;  %s722_s28 = int_to_ptr.vmem [resolvable:$true] %s721_s28 }
  0x64   :  { %v104_v35 = vmul.f32 %v782_v26, %v735_v11  ;;  %817 = vmatpush3.bf16.msra.mxu1 %v904_v21  ;;  %v1180_v36 = vrot.slane %v294_v24, 7  ;;  %vm298_vm8 = vcmask 1044484   ;;  %v1183_v42 = vadd.s32 16, %v1160_v4  ;;  %v189_v11 = vld [vmem:[#allocation2 + $0x10] sm:$0x1]  ;;  %v914_v26 = vld [vmem:[#allocation9 + $0x30] sm:$0xff]   ;;  %vm1272_vm6 = vmand %vm122_vm0, %vm181_vm7  ;;  %p1033_p13 = scmp.lt.s32.totalorder %s722_s28, %s722_s28 }
  0x65   :  { %v116_v37 = vmax.f32 %v112_v29, 0.0  ;;  %v117_v38 = vmax.f32 %v113_v30, 0.0  ;;  %818 = vmatprep.subr.bf16.mxu1 %v906_v31  ;;  %v114_v39 = vadd.f32 %v736_v12, %v103_v34  ;;  %vm1185_vm9 = vcmp.eq.s32.totalorder %v221_v28, 15  ;;  %vm1231_vm1 = vmor %vm122_vm0, %vm298_vm8  ;;  %v905_v5 = vld [vmem:[#allocation9 + $0x88] sm:$0xff]   ;;  %s1028_s3 = scalar_lea.vmem %s722_s28, 512 }
  0x66   :  { %839 = vmatpush3.bf16.msra.mxu0 %v896_v3  ;;  %v115_v40 = vadd.f32 %v736_v12, %v104_v35  ;;  %vm1193_vm10 = vcmp.eq.s32.totalorder %v235_v32, 15  ;;  %v301_v52 = vrot.slane %v1180_v36, 4  ;;  %vm1208_vm12 = vcmp.eq.s32.totalorder %v214_v27, 0  ;;  %vm291_vm14 = vmpackc.low %vm1185_vm9, %vm1185_vm9  ;;  %v912_v12 = vld [vmem:[#allocation9 + $0x28] sm:$0xff]   ;;  %p1029_p12 = scmp.ne.s32.totalorder %s722_s28, %s1028_s3  ;;  %p1034_p0 = scmp.lt.s32.totalorder %s1028_s3, %s1028_s3 }
  0x67   :  { %840 = vmatprep.subr.bf16.mxu0 %v897_v7  ;;  %v120_v43 = vpack.c.bf16 %v117_v38, %v116_v37  ;;  %v771_v44 = vpack.c.bf16 %v116_v37, %v116_v37  ;;  %v772_v45 = vpack.c.bf16 %v117_v38, %v117_v38  ;;  %v1189_v48 = vmax.f32 %v114_v39, 0.0  ;;  %vm293_vm15 = vmpackc.low %vm1193_vm10, %vm1193_vm10  ;;  %v916_v37 = vld [vmem:[#allocation9 + $0x38] sm:$0xff]  }
  0x68   :  { %v1191_v49 = vmax.f32 %v115_v40, 0.0  ;;  %819 = vmatpush3.bf16.msra.mxu1 %v906_v31  ;;  %v183_v1 = vld [vmem:[#allocation2] sm:$0xf]  ;;  %v228_v16 = vand.u32 15, %v1183_v42  ;;  %v295_v27 = vsel %vm291_vm14, 65537, %v1066_v23  ;;  %v1247_v28 = vsel %vm293_vm15, 65537, %v1066_v23  ;;  %p1035_p1 = por %p1034_p0, %p1033_p13 }
  0x69   :  { %v141_v54 = vshrl.u32 %v771_v44, 16  ;;  %v144_v55 = vshll.u32 %v771_v44, 16  ;;  %v149_v56 = vshrl.u32 %v772_v45, 16  ;;  %v152_v57 = vshll.u32 %v772_v45, 16  ;;  %850 = vmatprep.mubr.bf16.mxu0 %v120_v43  ;;  %820 = vmatprep.subr.bf16.mxu1 %v908_v41 }
  0x6a   :  { %841 = vmatpush3.bf16.msra.mxu0 %v897_v7  ;;  %v773_v58 = vpack.c.bf16 %v1189_v48, %v1189_v48  ;;  %v774_v59 = vpack.c.bf16 %v1191_v49, %v1191_v49  ;;  %v302_v32 = vrot.slane %v295_v27, 7  ;;  %v308_v34 = vrot.slane %v1247_v28, 7  ;;  %p1036_p2 = pnand %p1035_p1, %p1029_p12 }
  0x6b   :  { %842 = vmatprep.subr.bf16.mxu0 %v898_v18  ;;  %v143_v62 = vrot.slane %v141_v54, 7  ;;  %v151_v63 = vrot.slane %v149_v56, 7  ;;  %vm1265_vm3 = vcmp.eq.s32.totalorder %v228_v16, 0  ;;  %vm311_vm5 = vcmp.ne.s16.totalorder %v1180_v36, 0 }
  0x6c   :  { %v158_v2 = vshrl.u32 %v773_v58, 16  ;;  %v161_v3 = vshll.u32 %v773_v58, 16  ;;  %v167_v4 = vshrl.u32 %v774_v59, 16  ;;  %v170_v7 = vshll.u32 %v774_v59, 16  ;;  %821 = vmatpush3.bf16.msra.mxu1 %v908_v41  ;;  %vm272_vm0 = vmpackc.low %vm1265_vm3, %vm1265_vm3 }
  0x6d   :  { %v146_v8 = vor.u32 %v144_v55, %v143_v62  ;;  %v147_v9 = vrot.slane %v143_v62, 4  ;;  %v154_v10 = vor.u32 %v152_v57, %v151_v63  ;;  %822 = vmatprep.subr.bf16.mxu1 %v910_v50  ;;  %v156_v13 = vrot.slane %v151_v63, 4  ;;  %v909_v63 = vld [vmem:[#allocation9 + $0x98] sm:$0xff]  }
  0x6e   :  { %843 = vmatpush3.bf16.msra.mxu0 %v898_v18  ;;  %v160_v14 = vrot.slane %v158_v2, 7  ;;  %v169_v15 = vrot.slane %v167_v4, 7  ;;  %v304_v23 = vrot.slane %v302_v32, 4  ;;  %v303_v35 = vsel %vm1231_vm1, %v301_v52, %v302_v32 }
  0x6f   :  { %844 = vmatprep.subr.bf16.mxu0 %v899_v33  ;;  %v155_v17 = vsel %vm1200_vm11, %v147_v9, %v154_v10  ;;  %v184_v18 = vsel %vm1214_vm13, %v146_v8, %v183_v1  ;;  %v309_v41 = vsel %vm1231_vm1, %v301_v52, %v308_v34  ;;  %vm312_vm8 = vcmp.ne.s16.totalorder %v303_v35, 0  ;;  %v913_v8 = vld [vmem:[#allocation9 + $0xa8] sm:$0xff]   ;;  %v915_v10 = vld [vmem:[#allocation9 + $0xb0] sm:$0xff]  }
  0x70   :  { %185 = vst [vmem:[#allocation2] sm:$0xf] %v184_v18  ;;  %186 = vst [vmem:[#allocation2 + $0x4] sm:$0xf] %v155_v17  ;;  %v163_v19 = vor.u32 %v161_v3, %v160_v14  ;;  %v165_v20 = vrot.slane %v160_v14, 4  ;;  %v172_v21 = vor.u32 %v170_v7, %v169_v15  ;;  %v174_v22 = vrot.slane %v169_v15, 4  ;;  %823 = vmatpush3.bf16.msra.mxu1 %v910_v50 }
  0x71   :  { %824 = vmatprep.subr.bf16.mxu1 %v912_v12  ;;  %v306_v40 = vsel %vm1231_vm1, %v304_v23, %v1180_v36  ;;  %vm314_vm9 = vcmp.ne.s16.totalorder %v309_v41, 0  ;;  %vm588_vm10 = vcmask 1046528   ;;  %v911_v3 = vld [vmem:[#allocation9 + $0xa0] sm:$0xff]   ;;  %v310_v7 = vrot.slane %v308_v34, 4 }
  0x72   :  { %845 = vmatpush3.bf16.msra.mxu0 %v899_v33  ;;  %v164_v29 = vsel %vm1200_vm11, %v156_v13, %v163_v19  ;;  %v173_v30 = vsel %vm1200_vm11, %v165_v20, %v172_v21  ;;  %v190_v31 = vsel %vm1164_vm2, %v174_v22, %v189_v11  ;;  %v121_v33 = vpack.c.bf16 %v1191_v49, %v1189_v48  ;;  %vm270_vm2 = vmpackc.low %vm1208_vm12, %vm1208_vm12  ;;  %v907_v48 = vld [vmem:[#allocation9 + $0x90] sm:$0xff]   ;;  %v917_v13 = vld [vmem:[#allocation9 + $0xb8] sm:$0xff]  }
  0x73   :  { %846 = vmatprep.subr.bf16.mxu0 %v900_v47  ;;  %187 = vst [vmem:[#allocation2 + $0x8] sm:$0xf] %v164_v29  ;;  %188 = vst [vmem:[#allocation2 + $0xc] sm:$0xf] %v173_v30  ;;  %vm1288_vm7 = vcmp.ne.s16.totalorder %v306_v40, 0 }
  0x74   :  { %191 = vst [vmem:[#allocation2 + $0x10] sm:$0x1] %v190_v31  ;;  %825 = vmatpush3.bf16.msra.mxu1 %v912_v12  ;;  %v770_v21 = vld [vmem:[#allocation11] ss:$0 sm:$0xff] }
  0x75   :  { %826 = vmatprep.subr.bf16.mxu1 %v914_v26 }
  0x76   :  { %847 = vmatpush3.bf16.msra.mxu0 %v900_v47 }
  0x77   :  { %848 = vmatprep.subr.bf16.mxu0 %v901_v61  ;;  %v196_v42 = vld [vmem:[#allocation2] sm:$0xf]  ;;  %v197_v43 = vld [vmem:[#allocation2 + $0x4] sm:$0xf] }
  0x78   :  { %v200_v44 = vld [vmem:[#allocation2] sm:$0xe]  ;;  %827 = vmatpush3.bf16.msra.mxu1 %v914_v26  ;;  %v274_v45 = vsel %vm270_vm2, 0, %v196_v42  ;;  %v275_v46 = vsel %vm1168_vm4, 0, %v197_v43  ;;  %v201_v47 = vld [vmem:[#allocation2 + $0x4] sm:$0xf] }
  0x79   :  { %v316_v36 = vsel %vm311_vm5, 0, %v200_v44  ;;  %828 = vmatprep.subr.bf16.mxu1 %v916_v37  ;;  %v741_v49 = vcombine.low %v274_v45, %v275_v46  ;;  %v317_v51 = vsel %vm312_vm8, 0, %v201_v47 }
  0x7a   :  { %849 = vmatpush3.bf16.msra.mxu0 %v901_v61  ;;  %v198_v53 = vld [vmem:[#allocation2 + $0x8] sm:$0xf]  ;;  %v199_v54 = vld [vmem:[#allocation2 + $0xc] sm:$0xf]  ;;  %v759_v55 = vcombine.low %v316_v36, %v317_v51 }
  0x7b   :  { %854 = vmatprep.subr.bf16.mxu0 %v903_v25  ;;  %v193_v52 = vld [vmem:[#allocation2 + $0x10] sm:$0x1]  ;;  %830 = vmatprep.mubr.bf16.mxu1 %v741_v49  ;;  %v276_v57 = vsel %vm272_vm0, 0, %v198_v53  ;;  %v277_v58 = vsel %vm1168_vm4, 0, %v199_v54  ;;  %v202_v59 = vld [vmem:[#allocation2 + $0x8] sm:$0xf] }
  0x7c   :  { %v194_v56 = vsel %vm1272_vm6, 0, %v193_v52  ;;  %829 = vmatpush3.bf16.msra.mxu1 %v916_v37  ;;  %v742_v60 = vcombine.low %v276_v57, %v277_v58  ;;  %v203_v61 = vld [vmem:[#allocation2 + $0xc] sm:$0xf]  ;;  %v318_v62 = vsel %vm1288_vm7, 0, %v202_v59  ;;  %v589_v2 = vrot.slane %v759_v55, 1 }
  0x7d   :  { %851 = vmatmul.mubr.bf16.vlgmr.msra.gmra.mrb[0].mxu0 %v121_v33  ;;  %195 = vst [vmem:[#allocation2 + $0x10] sm:$0x1] %v194_v56  ;;  %v319_v0 = vsel %vm314_vm9, 0, %v203_v61  ;;  %vm315_vm4 = vcmp.ne.s16.totalorder %v310_v7, 0 }
  0x7e   :  { %855 = vmatpush3.bf16.msra.mxu0 %v903_v25  ;;  %v760_v1 = vcombine.low %v318_v62, %v319_v0 }
  0x7f   :  { %856 = vmatprep.subr.bf16.mxu0 %v905_v5  ;;  %831 = vmatmul.mubr.bf16.vlgmr.msra.gmra.mrb[0].mxu1 %v742_v60 }
  0x80   :  { %v590_v6 = vrot.slane %v760_v1, 1 }
  0x82   :  { %857 = vmatpush3.bf16.msra.mxu0 %v905_v5  ;;  %v591_v4 = vsel %vm588_vm10, %v589_v2, %v590_v6 }
  0x83   :  { %858 = vmatprep.subr.bf16.mxu0 %v907_v48  ;;  %870 = vmatprep.mubr.bf16.mxu0 %v591_v4 }
  0x84   :  { %v204_v9 = vld [vmem:[#allocation2 + $0x10] sm:$0x1] }
  0x85   :  { %v320_v11 = vsel %vm315_vm4, 0, %v204_v9 }
  0x86   :  { %859 = vmatpush3.bf16.msra.mxu0 %v907_v48  ;;  %v761_v12 = vcombine.low %v320_v11, %v320_v11 }
  0x87   :  { %860 = vmatprep.subr.bf16.mxu0 %v909_v63 }
  0x88   :  { %v592_v14 = vrot.slane %v761_v12, 1 }
  0x8a   :  { %861 = vmatpush3.bf16.msra.mxu0 %v909_v63  ;;  %v593_v15 = vsel %vm588_vm10, %v590_v6, %v592_v14 }
  0x8b   :  { %862 = vmatprep.subr.bf16.mxu0 %v911_v3 }
  0x8e   :  { %863 = vmatpush3.bf16.msra.mxu0 %v911_v3 }
  0x8f   :  { %864 = vmatprep.subr.bf16.mxu0 %v913_v8 }
  0x92   :  { %865 = vmatpush3.bf16.msra.mxu0 %v913_v8 }
  0x93   :  { %866 = vmatprep.subr.bf16.mxu0 %v915_v10 }
  0x96   :  { %867 = vmatpush3.bf16.msra.mxu0 %v915_v10 }
  0x97   :  { %868 = vmatprep.subr.bf16.mxu0 %v917_v13 }
  0x9a   :  { %869 = vmatpush3.bf16.msra.mxu0 %v917_v13 }
  0x9d   :  { %871 = vmatmul.mubr.bf16.vlgmr.msra.gmra.mrb[0].mxu0 %v593_v15 }
 0x152   :  { %v832_v16 = vpop.f32.mrb[0].mxu1 }
 0x153   :  { %v447_v17 = vpop.f32.mrb[1].mxu1 }
 0x154   :  { %v833_v18 = vpop.f32.mrb[2].mxu1 }
 0x155   :  { %v450_v19 = vpop.f32.mrb[3].mxu1 }
 0x170   :  { %v872_v20 = vpop.f32.mrb[0].mxu0 }
 0x171   :  { %v874_v22 = vadd.f32 %v872_v20, %v832_v16  ;;  %v678_v24 = vpop.f32.mrb[1].mxu0 }
 0x172   :  { %v875_v25 = vadd.f32 %v678_v24, %v447_v17  ;;  %v873_v26 = vpop.f32.mrb[2].mxu0 }
 0x173   :  { %v706_v27 = vadd.f32 %v874_v22, %v770_v21  ;;  %v876_v28 = vadd.f32 %v873_v26, %v833_v18  ;;  %v681_v29 = vpop.f32.mrb[3].mxu0 }
 0x174   :  { %v704_v30 = vadd.f32 %v875_v25, %v770_v21  ;;  %v877_v31 = vadd.f32 %v681_v29, %v450_v19 }
 0x175   :  { %v710_v32 = vmax.f32 %v706_v27, 0.0  ;;  %v707_v33 = vadd.f32 %v876_v28, %v770_v21 }
 0x176   :  { %v708_v34 = vmax.f32 %v704_v30, 0.0  ;;  %v705_v23 = vadd.f32 %v877_v31, %v770_v21 }
 0x177   :  { %714 = vst [vmem:[#allocation12 + $0x10] sm:$0xff] %v710_v32  ;;  %v711_v35 = vmax.f32 %v707_v33, 0.0 }
 0x178   :  { %712 = vst [vmem:[#allocation12] sm:$0xff] %v708_v34  ;;  %v709_v5 = vmax.f32 %v705_v23, 0.0 }
 0x179   :  { %715 = vst [vmem:[#allocation12 + $0x18] sm:$0xff] %v711_v35 }
 0x17a   :  { %713 = vst [vmem:[#allocation12 + $0x8] sm:$0xff] %v709_v5 }
 0x17b   :  { %1039 = shalt.err (!%p1036_p2)
}
 0x17c   :  { %s1040_s6 = scalar_lea.hbm %s1324_s5, 512 }
 0x17d   :  { %p1041_p3 = scmp.ne.s32.totalorder %s1324_s5, %s1040_s6  ;;  %p1044_p4 = scmp.lt.u32.totalorder %s1040_s6, %s1324_s5 }
 0x17f   :  { %p1046_p5 = pnand %p1044_p4, %p1041_p3 }
 0x181   :  { %1049 = shalt.err (!%p1046_p5)
}
 0x182   :  { %s1068_s12 = smov 128   ;;  %s1069_s13 = smov 8  }
 0x183   :  { %727 = dma.vmem_to_hbm [thread:$0]  %s722_s28, 512, %s1324_s5, [#allocation5], %s1068_s12, %s1068_s12, %s1069_s13  }
 0x184   :  { %1056 = dma.done.wait [#allocation5], 512  }
 0x185   :  { %1057 = vsyncadd [#allocation5], 4294966784 }
 0x186   :  { %731 = vsyncpa [#allocation4], 1 }
 0x187   :  { %732 = vsyncpa [#allocation7], 1 }
 0x188   :  { %733 = vsyncpa [#allocation10], 1 }
 0x189   :  { %734 = vsyncpa [#allocation5], 1 }

// kernel: conv_block_forward.2
= control target key start
LH: loop header
LB: loop body
LE: loop exit
PB: predicated region body
PF: predicated region fallthrough
CT: control target
= control target key end

     0   :  { %10 = vsyncpa [#allocation4], 0  ;;  %s1121_s0 = inlined_call_operand.hbm [shape: bf16[2,16,64], index: 0, kind: input, shape index: {}]   ;;  %s1122_s1 = inlined_call_operand.hbm [shape: bf16[192,128], index: 1, kind: input, shape index: {}]   ;;  %s1123_s2 = inlined_call_operand.hbm [shape: bf16[2,16,128], index: 2, kind: output, shape index: {0}]   ;;  %s1124_s3 = inlined_call_operand.hbm [shape: f32[1,1,128], index: 3, kind: output, shape index: {1}]   ;;  %s1125_s4 = inlined_call_operand.hbm [shape: f32[1,1,128], index: 4, kind: output, shape index: {2}]  }
   0x1   :  { %11 = vsyncpa [#allocation7], 0 }
   0x2   :  { %12 = vsyncpa [#allocation5], 0 }
   0x3   :  { %13 = vsyncpa [#allocation10], 0  ;;  %s878_s15 = smov [#allocation3]   ;;  %s760_s19 = scalar_lea.hbm %s1121_s0, 256 }
   0x4   :  { %s19_s16 = sshll.u32 %s878_s15, 4  ;;  %p761_p0 = scmp.ne.s32.totalorder %s1121_s0, %s760_s19  ;;  %s20_s16 = int_to_ptr.vmem [resolvable:$true] %s19_s16 }
   0x5   :  { %p764_p1 = scmp.lt.u32.totalorder %s760_s19, %s1121_s0 }
   0x7   :  { %p766_p2 = pnand %p764_p1, %p761_p0 }
   0x9   :  { %769 = shalt.err (!%p766_p2)
}
   0xa   :  { %s770_s24 = scalar_lea.vmem %s20_s16, 256  ;;  %p775_p4 = scmp.lt.s32.totalorder %s20_s16, %s20_s16 }
   0xb   :  { %p771_p3 = scmp.ne.s32.totalorder %s20_s16, %s770_s24  ;;  %p776_p5 = scmp.lt.s32.totalorder %s770_s24, %s770_s24 }
   0xd   :  { %p777_p6 = por %p776_p5, %p775_p4 }
   0xf   :  { %p778_p7 = pnand %p777_p6, %p771_p3 }
  0x11   :  { %781 = shalt.err (!%p778_p7)
}
  0x12   :  { %s879_s25 = smov 64   ;;  %s880_s26 = smov 4  }
  0x13   :  { %25 = dma.hbm_to_vmem [thread:$0]  %s1121_s0, 256, %s20_s16, [#allocation4], %s879_s25, %s879_s25, %s880_s26  }
  0x14   :  { %s881_s29 = smov [#allocation6]   ;;  %s782_s7 = scalar_lea.hbm %s1122_s1, 1536 }
  0x15   :  { %s31_s30 = sshll.u32 %s881_s29, 4  ;;  %p783_p8 = scmp.ne.s32.totalorder %s1122_s1, %s782_s7  ;;  %s32_s30 = int_to_ptr.vmem [resolvable:$true] %s31_s30 }
  0x16   :  { %p786_p9 = scmp.lt.u32.totalorder %s782_s7, %s1122_s1 }
  0x18   :  { %p788_p10 = pnand %p786_p9, %p783_p8 }
  0x1a   :  { %791 = shalt.err (!%p788_p10)
}
  0x1b   :  { %s792_s12 = scalar_lea.vmem %s32_s30, 1536  ;;  %p797_p12 = scmp.lt.s32.totalorder %s32_s30, %s32_s30 }
  0x1c   :  { %p793_p11 = scmp.ne.s32.totalorder %s32_s30, %s792_s12  ;;  %p798_p13 = scmp.lt.s32.totalorder %s792_s12, %s792_s12 }
  0x1e   :  { %p799_p0 = por %p798_p13, %p797_p12 }
  0x20   :  { %p800_p1 = pnand %p799_p0, %p793_p11 }
  0x22   :  { %803 = shalt.err (!%p800_p1)
}
  0x23   :  { %37 = dma.hbm_to_vmem [thread:$0]  %s1122_s1, 1536, %s32_s30, [#allocation7], %s879_s25, %s879_s25, %s880_s26  }
  0x24   :  { %870 = dma.done.wait [#allocation4], 256  }
  0x25   :  { %871 = vsyncadd [#allocation4], 4294967040 }
  0x26   :  { %872 = dma.done.wait [#allocation7], 1536  }
  0x27   :  { %873 = vsyncadd [#allocation7], 4294965760  ;;  %v122_v0 = vlaneseq  ;;  %vm882_vm0 = vmmov 0   ;;  %vm51_vm2 = vcmask 516096   ;;  %vm52_vm3 = vsmask.f32 256 }
  0x28   :  { %vm945_vm1 = vmpackc.low %vm882_vm0, %vm882_vm0  ;;  %vm57_vm4 = vsmask.f32 4368  ;;  %v748_v5 = vld [vmem:[#allocation6 + $0x20] sm:$0xff]   ;;  %vm99_vm5 = vcmask 519168   ;;  %vm100_vm6 = vsmask.f32 7938 }
  0x29   :  { %v942_v1 = vshrl.u32 %v122_v0, 7  ;;  %vm289_vm7 = vcmask 523264   ;;  %v749_v6 = vld [vmem:[#allocation6 + $0x28] sm:$0xff]   ;;  %v883_v7 = vmov 0   ;;  %707 = vmatprep.subr.bf16.mxu0 %v748_v5  ;;  %vm955_vm8 = vmand %vm51_vm2, %vm52_vm3  ;;  %v750_v12 = vld [vmem:[#allocation6 + $0x30] sm:$0xff]   ;;  %vm215_vm9 = vcmask 1040384  }
  0x2a   :  { %v211_v8 = vsel %vm945_vm1, 65537, %v883_v7  ;;  %708 = vmatpush3.bf16.msra.mxu0 %v748_v5  ;;  %v752_v14 = vld [vmem:[#allocation6] sm:$0xff]   ;;  %vm216_vm10 = vcmask 1044484   ;;  %v47_v16 = vld [vmem:[#allocation3] sm:$0xf]  ;;  %v751_v26 = vld [vmem:[#allocation6 + $0x38] sm:$0xff]  }
  0x2b   :  { %v124_v2 = vadd.s32 8, %v942_v1  ;;  %v126_v4 = vadd.s32 24, %v942_v1  ;;  %v131_v10 = vand.u32 15, %v942_v1  ;;  %709 = vmatprep.subr.bf16.mxu0 %v749_v6  ;;  %v960_v15 = vrot.slane %v211_v8, 7  ;;  %v48_v17 = vld [vmem:[#allocation3 + $0x4] sm:$0xf]  ;;  %695 = vmatprep.subr.bf16.mxu1 %v752_v14  ;;  %vm970_vm12 = vmor %vm52_vm3, %vm57_vm4 }
  0x2c   :  { %v54_v18 = vld [vmem:[#allocation2] sm:$0x1]  ;;  %v60_v20 = vshrl.u32 %v47_v16, 16  ;;  %v63_v21 = vshll.u32 %v47_v16, 16  ;;  %v68_v22 = vshrl.u32 %v48_v17, 16  ;;  %696 = vmatpush3.bf16.msra.mxu1 %v752_v14  ;;  %v71_v23 = vshll.u32 %v48_v17, 16  ;;  %vm988_vm15 = vmand %vm99_vm5, %vm100_vm6 }
  0x2d   :  { %v138_v11 = vand.u32 15, %v124_v2  ;;  %v152_v13 = vand.u32 15, %v126_v4  ;;  %v55_v19 = vsel %vm955_vm8, 0, %v54_v18  ;;  %v641_v24 = vcombine.low %v47_v16, %v48_v17  ;;  %v754_v29 = vld [vmem:[#allocation6 + $0x8] sm:$0xff]   ;;  %v49_v31 = vld [vmem:[#allocation3 + $0x8] sm:$0xf]  ;;  %vm1008_vm3 = vmor %vm215_vm9, %vm216_vm10 }
  0x2e   :  { %710 = vmatpush3.bf16.msra.mxu0 %v749_v6  ;;  %56 = vst [vmem:[#allocation2] sm:$0x1] %v55_v19  ;;  %v62_v27 = vrot.slane %v60_v20, 7  ;;  %v70_v28 = vrot.slane %v68_v22, 7  ;;  %v50_v32 = vld [vmem:[#allocation3 + $0xc] sm:$0xf]  ;;  %697 = vmatprep.subr.bf16.mxu1 %v754_v29 }
  0x2f   :  { %vm964_vm11 = vcmp.eq.s32.totalorder %v138_v11, 15  ;;  %711 = vmatprep.subr.bf16.mxu0 %v750_v12  ;;  %715 = vmatprep.mubr.msk.bf16.mxu0 %vm289_vm7, %v641_v24  ;;  %vm975_vm13 = vcmp.eq.s32.totalorder %v152_v13, 15  ;;  %v980_v34 = vadd.s32 16, %v942_v1  ;;  %v753_v38 = vld [vmem:[#allocation6 + $0x40] sm:$0xff]   ;;  %v219_v39 = vrot.slane %v960_v15, 4  ;;  %v756_v47 = vld [vmem:[#allocation6 + $0x10] sm:$0xff]  }
  0x30   :  { %v65_v35 = vor.u32 %v63_v21, %v62_v27  ;;  %v66_v36 = vrot.slane %v62_v27, 4  ;;  %v73_v37 = vor.u32 %v71_v23, %v70_v28  ;;  %vm208_vm14 = vmpackc.low %vm964_vm11, %vm964_vm11  ;;  %v77_v41 = vshrl.u32 %v49_v31, 16  ;;  %698 = vmatpush3.bf16.msra.mxu1 %v754_v29  ;;  %v109_v50 = vld [vmem:[#allocation2 + $0x10] sm:$0x1]  ;;  %v758_v51 = vld [vmem:[#allocation6 + $0x18] sm:$0xff]   ;;  %s884_s1 = smov [#allocation8]  }
  0x31   :  { %v80_v42 = vshll.u32 %v49_v31, 16  ;;  %v86_v43 = vshrl.u32 %v50_v32, 16  ;;  %v89_v44 = vshll.u32 %v50_v32, 16  ;;  %v75_v46 = vrot.slane %v70_v28, 4  ;;  %vm210_vm0 = vmpackc.low %vm975_vm13, %vm975_vm13  ;;  %699 = vmatprep.subr.bf16.mxu1 %v756_v47  ;;  %v755_v61 = vld [vmem:[#allocation6 + $0x48] sm:$0xff]   ;;  %v759_v22 = vld [vmem:[#allocation6 + $0x58] sm:$0xff]  }
  0x32   :  { %712 = vmatpush3.bf16.msra.mxu0 %v750_v12  ;;  %v74_v45 = vsel %vm970_vm12, %v66_v36, %v73_v37  ;;  %v79_v48 = vrot.slane %v77_v41, 7  ;;  %v212_v52 = vsel %vm208_vm14, 65537, %v883_v7  ;;  %v642_v54 = vcombine.low %v49_v31, %v50_v32  ;;  %v757_v12 = vld [vmem:[#allocation6 + $0x50] sm:$0xff]   ;;  %vm1060_vm14 = vmand %vm51_vm2, %vm100_vm6  ;;  %s593_s14 = sshll.u32 %s884_s1, 4  ;;  %s594_s14 = int_to_ptr.vmem [resolvable:$true] %s593_s14 }
  0x33   :  { %713 = vmatprep.subr.bf16.mxu0 %v751_v26  ;;  %106 = vst.msk [vmem:[#allocation2 + $0x4] sm:$0xf] %vm99_vm5, %v74_v45  ;;  %v88_v49 = vrot.slane %v86_v43, 7  ;;  %v214_v62 = vsel %vm210_vm0, 65537, %v883_v7  ;;  %v220_v63 = vrot.slane %v212_v52, 7  ;;  %v145_v0 = vand.u32 15, %v980_v34  ;;  %p809_p3 = scmp.lt.s32.totalorder %s594_s14, %s594_s14 }
  0x34   :  { %v82_v56 = vor.u32 %v80_v42, %v79_v48  ;;  %v84_v57 = vrot.slane %v79_v48, 4  ;;  %700 = vmatpush3.bf16.msra.mxu1 %v756_v47  ;;  %v226_v5 = vrot.slane %v214_v62, 7  ;;  %vm1030_vm4 = vcmp.eq.s32.totalorder %v131_v10, 0  ;;  %s804_s15 = scalar_lea.vmem %s594_s14, 256 }
  0x35   :  { %v102_v53 = vld [vmem:[#allocation2] sm:$0xf]  ;;  %v91_v58 = vor.u32 %v89_v44, %v88_v49  ;;  %v93_v60 = vrot.slane %v88_v49, 4  ;;  %701 = vmatprep.subr.bf16.mxu1 %v758_v51  ;;  %v221_v8 = vsel %vm1008_vm3, %v219_v39, %v220_v63  ;;  %v222_v11 = vrot.slane %v220_v63, 4  ;;  %p805_p2 = scmp.ne.s32.totalorder %s594_s14, %s804_s15  ;;  %p810_p4 = scmp.lt.s32.totalorder %s804_s15, %s804_s15 }
  0x36   :  { %714 = vmatpush3.bf16.msra.mxu0 %v751_v26  ;;  %v103_v55 = vsel %vm988_vm15, %v65_v35, %v102_v53  ;;  %v83_v2 = vsel %vm970_vm12, %v75_v46, %v82_v56  ;;  %vm230_vm9 = vcmp.ne.s16.totalorder %v221_v8, 0  ;;  %v227_v1 = vsel %vm1008_vm3, %v219_v39, %v226_v5 }
  0x37   :  { %104 = vst [vmem:[#allocation2] sm:$0xf] %v103_v55  ;;  %719 = vmatprep.subr.bf16.mxu0 %v753_v38  ;;  %v92_v4 = vsel %vm970_vm12, %v84_v57, %v91_v58  ;;  %107 = vst.msk [vmem:[#allocation2 + $0x8] sm:$0xf] %vm99_vm5, %v83_v2  ;;  %v110_v6 = vsel %vm955_vm8, %v93_v60, %v109_v50  ;;  %v224_v13 = vsel %vm1008_vm3, %v222_v11, %v960_v15  ;;  %vm455_vm2 = vcmask 1046528   ;;  %p811_p5 = por %p810_p4, %p809_p3 }
  0x38   :  { %108 = vst.msk [vmem:[#allocation2 + $0xc] sm:$0xf] %vm99_vm5, %v92_v4  ;;  %111 = vst [vmem:[#allocation2 + $0x10] sm:$0x1] %v110_v6  ;;  %702 = vmatpush3.bf16.msra.mxu1 %v758_v51  ;;  %vm1041_vm5 = vcmp.eq.s32.totalorder %v145_v0, 0  ;;  %vm229_vm10 = vcmp.ne.s16.totalorder %v960_v15, 0 }
  0x39   :  { %716 = vmatmul.mubr.msk.bf16.vlgmr.msra.gmra.mrb[0].mxu0 %vm289_vm7, %v642_v54  ;;  %vm187_vm8 = vmpackc.low %vm1030_vm4, %vm1030_vm4  ;;  %vm232_vm11 = vcmp.ne.s16.totalorder %v227_v1, 0  ;;  %vm1054_vm13 = vcmp.ne.s16.totalorder %v224_v13, 0  ;;  %v228_v36 = vrot.slane %v226_v5, 4  ;;  %p812_p6 = pnand %p811_p5, %p805_p2 }
  0x3a   :  { %720 = vmatpush3.bf16.msra.mxu0 %v753_v38  ;;  %v117_v9 = vld [vmem:[#allocation2 + $0x4] sm:$0xf]  ;;  %vm189_vm12 = vmpackc.low %vm1041_vm5, %vm1041_vm5 }
  0x3b   :  { %721 = vmatprep.subr.bf16.mxu0 %v755_v61  ;;  %v192_v14 = vsel %vm945_vm1, 0, %v117_v9  ;;  %v235_v16 = vsel %vm230_vm9, 0, %v117_v9 }
  0x3e   :  { %722 = vmatpush3.bf16.msra.mxu0 %v755_v61  ;;  %v116_v17 = vld [vmem:[#allocation2] sm:$0xf]  ;;  %v118_v26 = vld [vmem:[#allocation2 + $0x8] sm:$0xf] }
  0x3f   :  { %v120_v18 = vld [vmem:[#allocation2] sm:$0xe]  ;;  %723 = vmatprep.subr.bf16.mxu0 %v757_v12  ;;  %v191_v20 = vsel %vm187_vm8, 0, %v116_v17  ;;  %v119_v23 = vld [vmem:[#allocation2 + $0xc] sm:$0xf]  ;;  %v193_v30 = vsel %vm189_vm12, 0, %v118_v26 }
  0x40   :  { %v234_v21 = vsel %vm229_vm10, 0, %v120_v18  ;;  %v633_v24 = vcombine.low %v191_v20, %v192_v14  ;;  %v113_v27 = vld [vmem:[#allocation2 + $0x10] sm:$0x1]  ;;  %v194_v28 = vsel %vm945_vm1, 0, %v119_v23  ;;  %v237_v29 = vsel %vm232_vm11, 0, %v119_v23 }
  0x41   :  { %v649_v25 = vcombine.low %v234_v21, %v235_v16  ;;  %v236_v31 = vsel %vm1054_vm13, 0, %v118_v26  ;;  %v114_v32 = vsel %vm1060_vm14, 0, %v113_v27  ;;  %v634_v34 = vcombine.low %v193_v30, %v194_v28 }
  0x42   :  { %724 = vmatpush3.bf16.msra.mxu0 %v757_v12  ;;  %703 = vmatprep.mubr.msk.bf16.mxu1 %vm289_vm7, %v633_v24  ;;  %v650_v35 = vcombine.low %v236_v31, %v237_v29  ;;  %115 = vst [vmem:[#allocation2 + $0x10] sm:$0x1] %v114_v32  ;;  %vm233_vm1 = vcmp.ne.s16.totalorder %v228_v36, 0 }
  0x43   :  { %v456_v33 = vrot.slane %v649_v25, 1  ;;  %725 = vmatprep.subr.bf16.mxu0 %v759_v22  ;;  %704 = vmatmul.mubr.msk.bf16.vlgmr.msra.gmra.mrb[0].mxu1 %vm289_vm7, %v634_v34 }
  0x44   :  { %v457_v3 = vrot.slane %v650_v35, 1 }
  0x46   :  { %726 = vmatpush3.bf16.msra.mxu0 %v759_v22  ;;  %v458_v37 = vsel %vm455_vm2, %v456_v33, %v457_v3 }
  0x47   :  { %727 = vmatprep.mubr.msk.bf16.mxu0 %vm289_vm7, %v458_v37 }
  0x49   :  { %v121_v38 = vld [vmem:[#allocation2 + $0x10] sm:$0x1] }
  0x4a   :  { %v238_v39 = vsel %vm233_vm1, 0, %v121_v38 }
  0x4b   :  { %v651_v40 = vcombine.low %v238_v39, %v238_v39 }
  0x4d   :  { %v459_v41 = vrot.slane %v651_v40, 1 }
  0x4f   :  { %v460_v42 = vsel %vm455_vm2, %v457_v3, %v459_v41 }
  0x50   :  { %728 = vmatmul.mubr.msk.bf16.vlgmr.msra.gmra.mrb[0].mxu0 %vm289_vm7, %v460_v42 }
 0x116   :  { %v705_v43 = vpop.f32.mrb[0].mxu1 }
 0x117   :  { %v330_v44 = vpop.f32.mrb[1].mxu1 }
 0x118   :  { %v706_v45 = vpop.f32.mrb[2].mxu1 }
 0x119   :  { %v333_v46 = vpop.f32.mrb[3].mxu1 }
 0x123   :  { %v729_v47 = vpop.f32.mrb[0].mxu0 }
 0x124   :  { %v731_v48 = vadd.f32 %v729_v47, %v705_v43  ;;  %v525_v49 = vpop.f32.mrb[1].mxu0 }
 0x125   :  { %v732_v50 = vadd.f32 %v525_v49, %v330_v44  ;;  %v730_v51 = vpop.f32.mrb[2].mxu0 }
 0x126   :  { %v733_v52 = vadd.f32 %v730_v51, %v706_v45  ;;  %v528_v53 = vpop.f32.mrb[3].mxu0  ;;  %v576_v60 = vmul.f32 %v731_v48, %v731_v48 }
 0x127   :  { %v734_v54 = vadd.f32 %v528_v53, %v333_v46  ;;  %v574_v56 = vmul.f32 %v732_v50, %v732_v50 }
 0x128   :  { %v674_v55 = vpack.c.bf16 %v733_v52, %v731_v48 }
 0x129   :  { %v669_v57 = vpack.c.bf16 %v734_v54, %v732_v50  ;;  %v564_v58 = vadd.f32 %v734_v54, %v732_v50  ;;  %v575_v59 = vmul.f32 %v734_v54, %v734_v54 }
 0x12a   :  { %676 = vst [vmem:[#allocation8 + $0x8] sm:$0xff] %v674_v55  }
 0x12b   :  { %v565_v61 = vadd.f32 %v731_v48, %v564_v58  ;;  %v578_v62 = vadd.f32 %v575_v59, %v574_v56  ;;  %670 = vst [vmem:[#allocation8] sm:$0xff] %v669_v57  }
 0x12c   :  { %815 = shalt.err (!%p812_p6)
}
 0x12d   :  { %s816_s18 = scalar_lea.hbm %s1123_s2, 256 }
 0x12e   :  { %p817_p7 = scmp.ne.s32.totalorder %s1123_s2, %s816_s18  ;;  %p820_p8 = scmp.lt.u32.totalorder %s816_s18, %s1123_s2 }
 0x130   :  { %p822_p9 = pnand %p820_p8, %p817_p7 }
 0x132   :  { %825 = shalt.err (!%p822_p9)
}
 0x133   :  { %599 = dma.vmem_to_hbm [thread:$0]  %s594_s14, 256, %s1123_s2, [#allocation5], %s879_s25, %s879_s25, %s880_s26   ;;  %v577_v63 = vmul.f32 %v733_v52, %v733_v52  ;;  %v566_v0 = vadd.f32 %v733_v52, %v565_v61  ;;  %v579_v2 = vadd.f32 %v578_v62, %v576_v60 }
 0x134   :  { %s885_s27 = smov [#allocation9]   ;;  %s886_s29 = smov [#allocation11]  }
 0x135   :  { %v580_v4 = vadd.f32 %v579_v2, %v577_v63  ;;  %v567_v5 = vrot.slane %v566_v0, 4  ;;  %s606_s28 = sshll.u32 %s885_s27, 4  ;;  %s616_s30 = sshll.u32 %s886_s29, 4  ;;  %s607_s28 = int_to_ptr.vmem [resolvable:$true] %s606_s28  ;;  %s1089_s30 = int_to_ptr.vmem [resolvable:$true] %s616_s30 }
 0x136   :  { %s826_s2 = scalar_lea.vmem %s607_s28, 16  ;;  %s830_s25 = scalar_lea.vmem %s607_s28, 32 }
 0x137   :  { %v568_v6 = vadd.f32 %v567_v5, %v566_v0  ;;  %v581_v7 = vrot.slane %v580_v4, 4  ;;  %p827_p10 = scmp.ne.s32.totalorder %s607_s28, %s826_s2  ;;  %p831_p11 = scmp.lt.s32.totalorder %s607_s28, %s607_s28 }
 0x138   :  { %p832_p12 = scmp.lt.s32.totalorder %s830_s25, %s826_s2 }
 0x139   :  { %v569_v8 = vrot.slane %v568_v6, 2  ;;  %v582_v11 = vadd.f32 %v581_v7, %v580_v4 }
 0x13a   :  { %p833_p13 = por %p832_p12, %p831_p11 }
 0x13b   :  { %v570_v12 = vadd.f32 %v569_v8, %v568_v6  ;;  %v583_v9 = vrot.slane %v582_v11, 2 }
 0x13c   :  { %p834_p0 = pnand %p833_p13, %p827_p10 }
 0x13d   :  { %v571_v13 = vrot.slane %v570_v12, 1  ;;  %v584_v1 = vadd.f32 %v583_v9, %v582_v11 }
 0x13f   :  { %v572_v10 = vadd.f32 %v571_v13, %v570_v12  ;;  %v585_v14 = vrot.slane %v584_v1, 1 }
 0x141   :  { %573 = vst [vmem:[#allocation9] sm:$0x1] %v572_v10  ;;  %v586_v16 = vadd.f32 %v585_v14, %v584_v1 }
 0x142   :  { %837 = shalt.err (!%p834_p0)
}
 0x143   :  { %s838_s6 = scalar_lea.hbm %s1124_s3, 16 }
 0x144   :  { %p839_p1 = scmp.ne.s32.totalorder %s1124_s3, %s838_s6  ;;  %p842_p2 = scmp.lt.u32.totalorder %s838_s6, %s1124_s3 }
 0x146   :  { %p844_p3 = pnand %p842_p2, %p839_p1 }
 0x148   :  { %847 = shalt.err (!%p844_p3)
}
 0x149   :  { %609 = dma.vmem_to_hbm [thread:$0]  %s607_s28, 16, %s1124_s3, [#allocation10]   ;;  %587 = vst [vmem:[#allocation11] sm:$0x1] %v586_v16 }
 0x14a   :  { %s848_s0 = scalar_lea.vmem %s1089_s30, 16  ;;  %s852_s13 = scalar_lea.vmem %s1089_s30, 32 }
 0x14b   :  { %p849_p4 = scmp.ne.s32.totalorder %s1089_s30, %s848_s0  ;;  %p853_p5 = scmp.lt.s32.totalorder %s1089_s30, %s1089_s30 }
 0x14c   :  { %p854_p6 = scmp.lt.s32.totalorder %s852_s13, %s848_s0 }
 0x14e   :  { %p855_p7 = por %p854_p6, %p853_p5 }
 0x150   :  { %p856_p8 = pnand %p855_p7, %p849_p4 }
 0x152   :  { %859 = shalt.err (!%p856_p8)
}
 0x153   :  { %s860_s15 = scalar_lea.hbm %s1125_s4, 16 }
 0x154   :  { %p861_p9 = scmp.ne.s32.totalorder %s1125_s4, %s860_s15  ;;  %p864_p10 = scmp.lt.u32.totalorder %s860_s15, %s1125_s4 }
 0x156   :  { %p866_p11 = pnand %p864_p10, %p861_p9 }
 0x158   :  { %869 = shalt.err (!%p866_p11)
}
 0x159   :  { %619 = dma.vmem_to_hbm [thread:$0]  %s1089_s30, 16, %s1125_s4, [#allocation10]  }
 0x15a   :  { %874 = dma.done.wait [#allocation5], 256  }
 0x15b   :  { %875 = vsyncadd [#allocation5], 4294967040 }
 0x15c   :  { %876 = dma.done.wait [#allocation10], 32  }
 0x15d   :  { %877 = vsyncadd [#allocation10], 4294967264 }
 0x15e   :  { %629 = vsyncpa [#allocation4], 1 }
 0x15f   :  { %630 = vsyncpa [#allocation7], 1 }
 0x160   :  { %631 = vsyncpa [#allocation5], 1 }
 0x161   :  { %632 = vsyncpa [#allocation10], 1 }

// kernel: tile.18
= control target key start
LH: loop header
LB: loop body
LE: loop exit
PB: predicated region body
PF: predicated region fallthrough
CT: control target
= control target key end

     0   :  { %s28_s0 = inlined_call_operand.vmem [shape: f32[8], index: 0, kind: input, shape index: {}]   ;;  %s29_s1 = inlined_call_operand.vmem [shape: f32[16,8], index: 1, kind: output, shape index: {}]  }
   0x1   :  { %v4_v0 = vld [vmem:[%s28_s0] ss:$0 sm:$0xff] }
   0x2   :  { %5 = vst [vmem:[%s29_s1] sm:$0xff] %v4_v0  ;;  %8 = vst [vmem:[%s29_s1 + $0x8] sm:$0xff] %v4_v0 }

// kernel: tile.19
= control target key start
LH: loop header
LB: loop body
LE: loop exit
PB: predicated region body
PF: predicated region fallthrough
CT: control target
= control target key end

     0   :  { %s167_s10 = smov 120   ;;  %s168_s11 = smov 104   ;;  %vm4_vm0 = vcmask 64512   ;;  %s253_s0 = inlined_call_operand.vmem [shape: f32[16,8], index: 0, kind: input, shape index: {}]   ;;  %s254_s1 = inlined_call_operand.hbm [shape: f32[1,128], index: 1, kind: output, shape index: {}]  }
   0x1   :  { %v112_v0 = vld [vmem:[%s253_s0 + $0xf] sm:$0x1]   ;;  %v114_v1 = vld [vmem:[%s253_s0 + $0xd] sm:$0x1]   ;;  %v113_v2 = vld [vmem:[%s253_s0 + $0xe] sm:$0x1]  }
   0x2   :  { %8 = vrot.lane.b32.xlu0 %v112_v0, %s167_s10  ;;  %20 = vrot.lane.b32.xlu1 %v114_v1, %s168_s11  ;;  %v115_v3 = vld [vmem:[%s253_s0 + $0xc] sm:$0x1]   ;;  %s169_s16 = smov 112   ;;  %s170_s17 = smov 96   ;;  %v116_v4 = vld [vmem:[%s253_s0 + $0xb] sm:$0x1]  }
   0x3   :  { %v117_v5 = vld [vmem:[%s253_s0 + $0xa] sm:$0x1]   ;;  %v3_v6 = vld [vmem:[%s253_s0] sm:$0x1]  }
   0x6   :  { %14 = vrot.lane.b32.xlu0 %v113_v2, %s169_s16  ;;  %26 = vrot.lane.b32.xlu1 %v115_v3, %s170_s17 }
   0x7   :  { %2 = vsyncpa [#allocation1], 0  ;;  %s171_s24 = smov 88   ;;  %s172_s25 = smov 80   ;;  %5 = vst.msk [vmem:[#allocation2] sm:$0x1] %vm4_vm0, %v3_v6  }
   0x8   :  { %v118_v7 = vld [vmem:[%s253_s0 + $0x9] sm:$0x1]   ;;  %v119_v8 = vld [vmem:[%s253_s0 + $0x8] sm:$0x1]   ;;  %s173_s30 = smov 72   ;;  %s174_s2 = smov 64  }
   0x9   :  { %v120_v9 = vld [vmem:[%s253_s0 + $0x7] sm:$0x1]   ;;  %v121_v10 = vld [vmem:[%s253_s0 + $0x6] sm:$0x1]   ;;  %s175_s7 = smov 56   ;;  %s176_s8 = smov 48  }
   0xa   :  { %32 = vrot.lane.b32.xlu0 %v116_v4, %s171_s24  ;;  %38 = vrot.lane.b32.xlu1 %v117_v5, %s172_s25  ;;  %v122_v11 = vld [vmem:[%s253_s0 + $0x5] sm:$0x1]   ;;  %v123_v12 = vld [vmem:[%s253_s0 + $0x4] sm:$0x1]   ;;  %s177_s13 = smov 40   ;;  %s178_s14 = smov 32  }
   0xb   :  { %v124_v13 = vld [vmem:[%s253_s0 + $0x3] sm:$0x1]   ;;  %v125_v14 = vld [vmem:[%s253_s0 + $0x2] sm:$0x1]   ;;  %s179_s19 = smov 24   ;;  %s180_s20 = smov 16  }
   0xc   :  { %v126_v15 = vld [vmem:[%s253_s0 + $0x1] sm:$0x1]   ;;  %s181_s0 = smov 8   ;;  %vm10_vm1 = vcmask 1048512   ;;  %vm16_vm2 = vcmask 982912   ;;  %vm22_vm3 = vcmask 917312  }
   0xd   :  { %vm28_vm4 = vcmask 851712   ;;  %vm34_vm5 = vcmask 786112   ;;  %vm40_vm6 = vcmask 720512   ;;  %vm46_vm7 = vcmask 654912   ;;  %s182_s23 = smov [#allocation0]  }
   0xe   :  { %44 = vrot.lane.b32.xlu0 %v118_v7, %s173_s30  ;;  %50 = vrot.lane.b32.xlu1 %v119_v8, %s174_s2  ;;  %vm52_vm8 = vcmask 589312   ;;  %vm58_vm9 = vcmask 523712   ;;  %vm64_vm10 = vcmask 458112   ;;  %vm70_vm11 = vcmask 392512   ;;  %s106_s24 = sshll.u32 %s182_s23, 4  ;;  %s107_s24 = int_to_ptr.vmem [resolvable:$true] %s106_s24 }
   0xf   :  { %vm76_vm12 = vcmask 326912   ;;  %vm82_vm13 = vcmask 261312   ;;  %vm88_vm14 = vcmask 195712   ;;  %vm94_vm15 = vcmask 130112   ;;  %s143_s25 = scalar_lea.vmem %s107_s24, 16  ;;  %s147_s26 = scalar_lea.vmem %s107_s24, 32 }
  0x10   :  { %p144_p0 = scmp.ne.s32.totalorder %s107_s24, %s143_s25  ;;  %p148_p1 = scmp.lt.s32.totalorder %s107_s24, %s107_s24 }
  0x11   :  { %p149_p2 = scmp.lt.s32.totalorder %s147_s26, %s143_s25 }
  0x12   :  { %56 = vrot.lane.b32.xlu0 %v120_v9, %s175_s7  ;;  %62 = vrot.lane.b32.xlu1 %v121_v10, %s176_s8 }
  0x13   :  { %p150_p3 = por %p149_p2, %p148_p1 }
  0x15   :  { %p151_p4 = pnand %p150_p3, %p144_p0 }
  0x16   :  { %68 = vrot.lane.b32.xlu0 %v122_v11, %s177_s13  ;;  %74 = vrot.lane.b32.xlu1 %v123_v12, %s178_s14 }
  0x1a   :  { %80 = vrot.lane.b32.xlu0 %v124_v13, %s179_s19  ;;  %86 = vrot.lane.b32.xlu1 %v125_v14, %s180_s20 }
  0x1e   :  { %92 = vrot.lane.b32.xlu0 %v126_v15, %s181_s0 }
  0x74   :  { %v9_v16 = vpop.permute.xlu0 %8   ;;  %v21_v17 = vpop.permute.xlu1 %20  }
  0x75   :  { %11 = vst.msk [vmem:[#allocation2] sm:$0x1] %vm10_vm1, %v9_v16  }
  0x78   :  { %v15_v18 = vpop.permute.xlu0 %14   ;;  %v27_v19 = vpop.permute.xlu1 %26  }
  0x79   :  { %17 = vst.msk [vmem:[#allocation2] sm:$0x1] %vm16_vm2, %v15_v18  }
  0x7a   :  { %23 = vst.msk [vmem:[#allocation2] sm:$0x1] %vm22_vm3, %v21_v17  }
  0x7b   :  { %29 = vst.msk [vmem:[#allocation2] sm:$0x1] %vm28_vm4, %v27_v19  }
  0x7c   :  { %v33_v20 = vpop.permute.xlu0 %32   ;;  %v39_v21 = vpop.permute.xlu1 %38  }
  0x7d   :  { %35 = vst.msk [vmem:[#allocation2] sm:$0x1] %vm34_vm5, %v33_v20  }
  0x7e   :  { %41 = vst.msk [vmem:[#allocation2] sm:$0x1] %vm40_vm6, %v39_v21  }
  0x80   :  { %v45_v22 = vpop.permute.xlu0 %44   ;;  %v51_v23 = vpop.permute.xlu1 %50  }
  0x81   :  { %47 = vst.msk [vmem:[#allocation2] sm:$0x1] %vm46_vm7, %v45_v22  }
  0x82   :  { %53 = vst.msk [vmem:[#allocation2] sm:$0x1] %vm52_vm8, %v51_v23  }
  0x84   :  { %v57_v24 = vpop.permute.xlu0 %56   ;;  %v63_v25 = vpop.permute.xlu1 %62  }
  0x85   :  { %59 = vst.msk [vmem:[#allocation2] sm:$0x1] %vm58_vm9, %v57_v24  }
  0x86   :  { %65 = vst.msk [vmem:[#allocation2] sm:$0x1] %vm64_vm10, %v63_v25  }
  0x88   :  { %v69_v26 = vpop.permute.xlu0 %68   ;;  %v75_v27 = vpop.permute.xlu1 %74  }
  0x89   :  { %71 = vst.msk [vmem:[#allocation2] sm:$0x1] %vm70_vm11, %v69_v26  }
  0x8a   :  { %77 = vst.msk [vmem:[#allocation2] sm:$0x1] %vm76_vm12, %v75_v27  }
  0x8c   :  { %v81_v28 = vpop.permute.xlu0 %80   ;;  %v87_v29 = vpop.permute.xlu1 %86  }
  0x8d   :  { %83 = vst.msk [vmem:[#allocation2] sm:$0x1] %vm82_vm13, %v81_v28  }
  0x8e   :  { %89 = vst.msk [vmem:[#allocation2] sm:$0x1] %vm88_vm14, %v87_v29  }
  0x90   :  { %v93_v30 = vpop.permute.xlu0 %92  }
  0x91   :  { %95 = vst.msk [vmem:[#allocation2] sm:$0x1] %vm94_vm15, %v93_v30  }
  0x98   :  { %v99_v31 = vld [vmem:[#allocation2] sm:$0x1] }
  0x99   :  { %101 = vst [vmem:[#allocation0] sm:$0x1] %v99_v31 }
  0x9a   :  { %154 = shalt.err (!%p151_p4)
}
  0x9b   :  { %s155_s29 = scalar_lea.hbm %s254_s1, 16 }
  0x9c   :  { %p156_p5 = scmp.ne.s32.totalorder %s254_s1, %s155_s29  ;;  %p159_p6 = scmp.lt.u32.totalorder %s155_s29, %s254_s1 }
  0x9e   :  { %p161_p7 = pnand %p159_p6, %p156_p5 }
  0xa0   :  { %164 = shalt.err (!%p161_p7)
}
  0xa1   :  { %109 = dma.vmem_to_hbm [thread:$0]  %s107_s24, 16, %s254_s1, [#allocation1]  }
  0xa2   :  { %165 = dma.done.wait [#allocation1], 16  }
  0xa3   :  { %166 = vsyncadd [#allocation1], 4294967280 }
  0xa4   :  { %111 = vsyncpa [#allocation1], 1 }

// kernel: conv_block_forward.3
= control target key start
LH: loop header
LB: loop body
LE: loop exit
PB: predicated region body
PF: predicated region fallthrough
CT: control target
= control target key end

     0   :  { %10 = vsyncpa [#allocation4], 0  ;;  %s1319_s0 = inlined_call_operand.hbm [shape: bf16[2,16,128], index: 0, kind: input, shape index: {}]   ;;  %s1320_s1 = inlined_call_operand.hbm [shape: f32[1,128], index: 1, kind: input, shape index: {}]   ;;  %s1321_s2 = inlined_call_operand.hbm [shape: f32[1,128], index: 2, kind: input, shape index: {}]   ;;  %s1322_s3 = inlined_call_operand.hbm [shape: bf16[384,128], index: 3, kind: input, shape index: {}]   ;;  %s1323_s4 = inlined_call_operand.hbm [shape: f32[1,128], index: 4, kind: input, shape index: {}]   ;;  %s1324_s5 = inlined_call_operand.hbm [shape: f32[2,16,128], index: 5, kind: output, shape index: {}]  }
   0x1   :  { %11 = vsyncpa [#allocation7], 0 }
   0x2   :  { %12 = vsyncpa [#allocation10], 0 }
   0x3   :  { %13 = vsyncpa [#allocation5], 0  ;;  %s1058_s18 = smov [#allocation6]   ;;  %s918_s22 = scalar_lea.hbm %s1320_s1, 16 }
   0x4   :  { %s32_s19 = sshll.u32 %s1058_s18, 4  ;;  %p919_p0 = scmp.ne.s32.totalorder %s1320_s1, %s918_s22  ;;  %s33_s19 = int_to_ptr.vmem [resolvable:$true] %s32_s19 }
   0x5   :  { %p922_p1 = scmp.lt.u32.totalorder %s918_s22, %s1320_s1 }
   0x7   :  { %p924_p2 = pnand %p922_p1, %p919_p0 }
   0x9   :  { %927 = shalt.err (!%p924_p2)
}
   0xa   :  { %s928_s27 = scalar_lea.vmem %s33_s19, 16  ;;  %s932_s28 = scalar_lea.vmem %s33_s19, 32 }
   0xb   :  { %p929_p3 = scmp.ne.s32.totalorder %s33_s19, %s928_s27  ;;  %p933_p4 = scmp.lt.s32.totalorder %s33_s19, %s33_s19 }
   0xc   :  { %p934_p5 = scmp.lt.s32.totalorder %s932_s28, %s928_s27 }
   0xe   :  { %p935_p6 = por %p934_p5, %p933_p4 }
  0x10   :  { %p936_p7 = pnand %p935_p6, %p929_p3 }
  0x12   :  { %939 = shalt.err (!%p936_p7)
}
  0x13   :  { %35 = dma.hbm_to_vmem [thread:$0]  %s1320_s1, 16, %s33_s19, [#allocation7]  }
  0x14   :  { %s1059_s6 = smov [#allocation9]   ;;  %s1060_s8 = smov [#allocation3]  }
  0x15   :  { %s51_s7 = sshll.u32 %s1059_s6, 4  ;;  %s19_s9 = sshll.u32 %s1060_s8, 4  ;;  %s52_s7 = int_to_ptr.vmem [resolvable:$true] %s51_s7  ;;  %s20_s9 = int_to_ptr.vmem [resolvable:$true] %s19_s9 }
  0x16   :  { %s940_s12 = scalar_lea.hbm %s1322_s3, 3072 }
  0x17   :  { %p941_p8 = scmp.ne.s32.totalorder %s1322_s3, %s940_s12  ;;  %p944_p9 = scmp.lt.u32.totalorder %s940_s12, %s1322_s3 }
  0x19   :  { %p946_p10 = pnand %p944_p9, %p941_p8 }
  0x1b   :  { %949 = shalt.err (!%p946_p10)
}
  0x1c   :  { %s950_s1 = scalar_lea.vmem %s52_s7, 3072  ;;  %p955_p12 = scmp.lt.s32.totalorder %s52_s7, %s52_s7 }
  0x1d   :  { %p951_p11 = scmp.ne.s32.totalorder %s52_s7, %s950_s1  ;;  %p956_p13 = scmp.lt.s32.totalorder %s950_s1, %s950_s1 }
  0x1f   :  { %p957_p0 = por %p956_p13, %p955_p12 }
  0x21   :  { %p958_p1 = pnand %p957_p0, %p951_p11 }
  0x23   :  { %961 = shalt.err (!%p958_p1)
}
  0x24   :  { %s1061_s17 = smov 64   ;;  %s1062_s18 = smov 4  }
  0x25   :  { %57 = dma.hbm_to_vmem [thread:$0]  %s1322_s3, 3072, %s52_s7, [#allocation10], %s1061_s17, %s1061_s17, %s1062_s18  }
  0x26   :  { %s962_s23 = scalar_lea.hbm %s1319_s0, 256 }
  0x27   :  { %p963_p2 = scmp.ne.s32.totalorder %s1319_s0, %s962_s23  ;;  %p966_p3 = scmp.lt.u32.totalorder %s962_s23, %s1319_s0 }
  0x29   :  { %p968_p4 = pnand %p966_p3, %p963_p2 }
  0x2b   :  { %971 = shalt.err (!%p968_p4)
}
  0x2c   :  { %s972_s28 = scalar_lea.vmem %s20_s9, 256  ;;  %p977_p6 = scmp.lt.s32.totalorder %s20_s9, %s20_s9 }
  0x2d   :  { %p973_p5 = scmp.ne.s32.totalorder %s20_s9, %s972_s28  ;;  %p978_p7 = scmp.lt.s32.totalorder %s972_s28, %s972_s28 }
  0x2f   :  { %p979_p8 = por %p978_p7, %p977_p6 }
  0x31   :  { %p980_p9 = pnand %p979_p8, %p973_p5 }
  0x33   :  { %983 = shalt.err (!%p980_p9)
}
  0x34   :  { %25 = dma.hbm_to_vmem [thread:$0]  %s1319_s0, 256, %s20_s9, [#allocation4], %s1061_s17, %s1061_s17, %s1062_s18  }
  0x35   :  { %s1063_s30 = smov [#allocation8]   ;;  %s1064_s7 = smov [#allocation11]  }
  0x36   :  { %s42_s6 = sshll.u32 %s1063_s30, 4  ;;  %s64_s8 = sshll.u32 %s1064_s7, 4  ;;  %s43_s6 = int_to_ptr.vmem [resolvable:$true] %s42_s6  ;;  %s65_s8 = int_to_ptr.vmem [resolvable:$true] %s64_s8 }
  0x37   :  { %s984_s12 = scalar_lea.hbm %s1321_s2, 16 }
  0x38   :  { %p985_p10 = scmp.ne.s32.totalorder %s1321_s2, %s984_s12  ;;  %p988_p11 = scmp.lt.u32.totalorder %s984_s12, %s1321_s2 }
  0x3a   :  { %p990_p12 = pnand %p988_p11, %p985_p10 }
  0x3c   :  { %993 = shalt.err (!%p990_p12)
}
  0x3d   :  { %s994_s0 = scalar_lea.vmem %s43_s6, 16  ;;  %s998_s9 = scalar_lea.vmem %s43_s6, 32 }
  0x3e   :  { %p995_p13 = scmp.ne.s32.totalorder %s43_s6, %s994_s0  ;;  %p999_p0 = scmp.lt.s32.totalorder %s43_s6, %s43_s6 }
  0x3f   :  { %p1000_p1 = scmp.lt.s32.totalorder %s998_s9, %s994_s0 }
  0x41   :  { %p1001_p2 = por %p1000_p1, %p999_p0 }
  0x43   :  { %p1002_p3 = pnand %p1001_p2, %p995_p13 }
  0x45   :  { %1005 = shalt.err (!%p1002_p3)
}
  0x46   :  { %45 = dma.hbm_to_vmem [thread:$0]  %s1321_s2, 16, %s43_s6, [#allocation7]  }
  0x47   :  { %s1006_s20 = scalar_lea.hbm %s1323_s4, 16 }
  0x48   :  { %p1007_p4 = scmp.ne.s32.totalorder %s1323_s4, %s1006_s20  ;;  %p1010_p5 = scmp.lt.u32.totalorder %s1006_s20, %s1323_s4 }
  0x4a   :  { %p1012_p6 = pnand %p1010_p5, %p1007_p4 }
  0x4c   :  { %1015 = shalt.err (!%p1012_p6)
}
  0x4d   :  { %s1016_s25 = scalar_lea.vmem %s65_s8, 16  ;;  %s1020_s26 = scalar_lea.vmem %s65_s8, 32 }
  0x4e   :  { %p1017_p7 = scmp.ne.s32.totalorder %s65_s8, %s1016_s25  ;;  %p1021_p8 = scmp.lt.s32.totalorder %s65_s8, %s65_s8 }
  0x4f   :  { %p1022_p9 = scmp.lt.s32.totalorder %s1020_s26, %s1016_s25 }
  0x51   :  { %p1023_p10 = por %p1022_p9, %p1021_p8 }
  0x53   :  { %p1024_p11 = pnand %p1023_p10, %p1017_p7 }
  0x55   :  { %1027 = shalt.err (!%p1024_p11)
}
  0x56   :  { %67 = dma.hbm_to_vmem [thread:$0]  %s1323_s4, 16, %s65_s8, [#allocation10]  }
  0x57   :  { %1050 = dma.done.wait [#allocation4], 256  }
  0x58   :  { %1051 = vsyncadd [#allocation4], 4294967040 }
  0x59   :  { %1052 = dma.done.wait [#allocation7], 32  }
  0x5a   :  { %1053 = vsyncadd [#allocation7], 4294967264 }
  0x5b   :  { %1054 = dma.done.wait [#allocation10], 3088  }
  0x5c   :  { %1055 = vsyncadd [#allocation10], 4294964208  ;;  %v894_v0 = vld [vmem:[#allocation9 + $0x40] sm:$0xff]   ;;  %v205_v1 = vlaneseq  ;;  %v895_v2 = vld [vmem:[#allocation9 + $0x48] sm:$0xff]   ;;  %vm122_vm0 = vcmask 1040384   ;;  %vm1065_vm3 = vmmov 0  }
  0x5d   :  { %834 = vmatprep.subr.bf16.mxu0 %v894_v0  ;;  %vm123_vm1 = vsmask.f32 256  ;;  %v896_v3 = vld [vmem:[#allocation9 + $0x50] sm:$0xff]   ;;  %vm1168_vm4 = vmpackc.low %vm1065_vm3, %vm1065_vm3  ;;  %v897_v7 = vld [vmem:[#allocation9 + $0x58] sm:$0xff]   ;;  %vm138_vm5 = vsmask.f32 4368 }
  0x5e   :  { %835 = vmatpush3.bf16.msra.mxu0 %v894_v0  ;;  %v1160_v4 = vshrl.u32 %v205_v1, 7  ;;  %vm1164_vm2 = vmand %vm122_vm0, %vm123_vm1  ;;  %v902_v8 = vld [vmem:[#allocation9] sm:$0xff]   ;;  %v776_v10 = vld [vmem:[#allocation3] sm:$0xff]   ;;  %vm180_vm6 = vcmask 1043456   ;;  %vm181_vm7 = vsmask.f32 7938 }
  0x5f   :  { %836 = vmatprep.subr.bf16.mxu0 %v895_v2  ;;  %v735_v11 = vld [vmem:[#allocation6] ss:$0 sm:$0xff]  ;;  %v736_v12 = vld [vmem:[#allocation8] ss:$0 sm:$0xff]  ;;  %814 = vmatprep.subr.bf16.mxu1 %v902_v8  ;;  %v777_v14 = vunpack.c.l.bf16 %v776_v10  ;;  %v778_v15 = vunpack.c.h.bf16 %v776_v10  ;;  %v125_v16 = vld [vmem:[#allocation2] sm:$0x1] }
  0x60   :  { %v207_v9 = vadd.s32 8, %v1160_v4  ;;  %v209_v13 = vadd.s32 24, %v1160_v4  ;;  %815 = vmatpush3.bf16.msra.mxu1 %v902_v8  ;;  %v126_v17 = vsel %vm1164_vm2, 0, %v125_v16  ;;  %v898_v18 = vld [vmem:[#allocation9 + $0x60] sm:$0xff]   ;;  %v904_v21 = vld [vmem:[#allocation9 + $0x8] sm:$0xff]   ;;  %v783_v22 = vld [vmem:[#allocation3 + $0x8] sm:$0xff]  }
  0x61   :  { %v101_v19 = vmul.f32 %v777_v14, %v735_v11  ;;  %v102_v20 = vmul.f32 %v778_v15, %v735_v11  ;;  %127 = vst [vmem:[#allocation2] sm:$0x1] %v126_v17  ;;  %v1066_v23 = vmov 0   ;;  %v781_v25 = vunpack.c.l.bf16 %v783_v22  ;;  %816 = vmatprep.subr.bf16.mxu1 %v904_v21  ;;  %v906_v31 = vld [vmem:[#allocation9 + $0x10] sm:$0xff]   ;;  %v899_v33 = vld [vmem:[#allocation9 + $0x68] sm:$0xff]   ;;  %v908_v41 = vld [vmem:[#allocation9 + $0x18] sm:$0xff]  }
  0x62   :  { %837 = vmatpush3.bf16.msra.mxu0 %v895_v2  ;;  %v294_v24 = vsel %vm1168_vm4, 65537, %v1066_v23  ;;  %v782_v26 = vunpack.c.h.bf16 %v783_v22  ;;  %v214_v27 = vand.u32 15, %v1160_v4  ;;  %v221_v28 = vand.u32 15, %v207_v9  ;;  %v900_v47 = vld [vmem:[#allocation9 + $0x70] sm:$0xff]   ;;  %v910_v50 = vld [vmem:[#allocation9 + $0x20] sm:$0xff]   ;;  %vm1200_vm11 = vmor %vm123_vm1, %vm138_vm5  ;;  %s1067_s4 = smov [#allocation12]  }
  0x63   :  { %838 = vmatprep.subr.bf16.mxu0 %v896_v3  ;;  %v112_v29 = vadd.f32 %v736_v12, %v101_v19  ;;  %v113_v30 = vadd.f32 %v736_v12, %v102_v20  ;;  %v235_v32 = vand.u32 15, %v209_v13  ;;  %v103_v34 = vmul.f32 %v781_v25, %v735_v11  ;;  %v901_v61 = vld [vmem:[#allocation9 + $0x78] sm:$0xff]   ;;  %vm1214_vm13 = vmand %vm180_vm6, %vm181_vm7  ;;  %v903_v25 = vld [vmem:[#allocation9 + $0x80] sm:$0xff]   ;;  %s721_s28 = sshll.u32 %s1067_s4, 4  ;;  %s722_s28 = int_to_ptr.vmem [resolvable:$true] %s721_s28 }
  0x64   :  { %v104_v35 = vmul.f32 %v782_v26, %v735_v11  ;;  %817 = vmatpush3.bf16.msra.mxu1 %v904_v21  ;;  %v1180_v36 = vrot.slane %v294_v24, 7  ;;  %vm298_vm8 = vcmask 1044484   ;;  %v1183_v42 = vadd.s32 16, %v1160_v4  ;;  %v189_v11 = vld [vmem:[#allocation2 + $0x10] sm:$0x1]  ;;  %v914_v26 = vld [vmem:[#allocation9 + $0x30] sm:$0xff]   ;;  %vm1272_vm6 = vmand %vm122_vm0, %vm181_vm7  ;;  %p1033_p13 = scmp.lt.s32.totalorder %s722_s28, %s722_s28 }
  0x65   :  { %v116_v37 = vmax.f32 %v112_v29, 0.0  ;;  %v117_v38 = vmax.f32 %v113_v30, 0.0  ;;  %818 = vmatprep.subr.bf16.mxu1 %v906_v31  ;;  %v114_v39 = vadd.f32 %v736_v12, %v103_v34  ;;  %vm1185_vm9 = vcmp.eq.s32.totalorder %v221_v28, 15  ;;  %vm1231_vm1 = vmor %vm122_vm0, %vm298_vm8  ;;  %v905_v5 = vld [vmem:[#allocation9 + $0x88] sm:$0xff]   ;;  %s1028_s3 = scalar_lea.vmem %s722_s28, 512 }
  0x66   :  { %839 = vmatpush3.bf16.msra.mxu0 %v896_v3  ;;  %v115_v40 = vadd.f32 %v736_v12, %v104_v35  ;;  %vm1193_vm10 = vcmp.eq.s32.totalorder %v235_v32, 15  ;;  %v301_v52 = vrot.slane %v1180_v36, 4  ;;  %vm1208_vm12 = vcmp.eq.s32.totalorder %v214_v27, 0  ;;  %vm291_vm14 = vmpackc.low %vm1185_vm9, %vm1185_vm9  ;;  %v912_v12 = vld [vmem:[#allocation9 + $0x28] sm:$0xff]   ;;  %p1029_p12 = scmp.ne.s32.totalorder %s722_s28, %s1028_s3  ;;  %p1034_p0 = scmp.lt.s32.totalorder %s1028_s3, %s1028_s3 }
  0x67   :  { %840 = vmatprep.subr.bf16.mxu0 %v897_v7  ;;  %v120_v43 = vpack.c.bf16 %v117_v38, %v116_v37  ;;  %v771_v44 = vpack.c.bf16 %v116_v37, %v116_v37  ;;  %v772_v45 = vpack.c.bf16 %v117_v38, %v117_v38  ;;  %v1189_v48 = vmax.f32 %v114_v39, 0.0  ;;  %vm293_vm15 = vmpackc.low %vm1193_vm10, %vm1193_vm10  ;;  %v916_v37 = vld [vmem:[#allocation9 + $0x38] sm:$0xff]  }
  0x68   :  { %v1191_v49 = vmax.f32 %v115_v40, 0.0  ;;  %819 = vmatpush3.bf16.msra.mxu1 %v906_v31  ;;  %v183_v1 = vld [vmem:[#allocation2] sm:$0xf]  ;;  %v228_v16 = vand.u32 15, %v1183_v42  ;;  %v295_v27 = vsel %vm291_vm14, 65537, %v1066_v23  ;;  %v1247_v28 = vsel %vm293_vm15, 65537, %v1066_v23  ;;  %p1035_p1 = por %p1034_p0, %p1033_p13 }
  0x69   :  { %v141_v54 = vshrl.u32 %v771_v44, 16  ;;  %v144_v55 = vshll.u32 %v771_v44, 16  ;;  %v149_v56 = vshrl.u32 %v772_v45, 16  ;;  %v152_v57 = vshll.u32 %v772_v45, 16  ;;  %850 = vmatprep.mubr.bf16.mxu0 %v120_v43  ;;  %820 = vmatprep.subr.bf16.mxu1 %v908_v41 }
  0x6a   :  { %841 = vmatpush3.bf16.msra.mxu0 %v897_v7  ;;  %v773_v58 = vpack.c.bf16 %v1189_v48, %v1189_v48  ;;  %v774_v59 = vpack.c.bf16 %v1191_v49, %v1191_v49  ;;  %v302_v32 = vrot.slane %v295_v27, 7  ;;  %v308_v34 = vrot.slane %v1247_v28, 7  ;;  %p1036_p2 = pnand %p1035_p1, %p1029_p12 }
  0x6b   :  { %842 = vmatprep.subr.bf16.mxu0 %v898_v18  ;;  %v143_v62 = vrot.slane %v141_v54, 7  ;;  %v151_v63 = vrot.slane %v149_v56, 7  ;;  %vm1265_vm3 = vcmp.eq.s32.totalorder %v228_v16, 0  ;;  %vm311_vm5 = vcmp.ne.s16.totalorder %v1180_v36, 0 }
  0x6c   :  { %v158_v2 = vshrl.u32 %v773_v58, 16  ;;  %v161_v3 = vshll.u32 %v773_v58, 16  ;;  %v167_v4 = vshrl.u32 %v774_v59, 16  ;;  %v170_v7 = vshll.u32 %v774_v59, 16  ;;  %821 = vmatpush3.bf16.msra.mxu1 %v908_v41  ;;  %vm272_vm0 = vmpackc.low %vm1265_vm3, %vm1265_vm3 }
  0x6d   :  { %v146_v8 = vor.u32 %v144_v55, %v143_v62  ;;  %v147_v9 = vrot.slane %v143_v62, 4  ;;  %v154_v10 = vor.u32 %v152_v57, %v151_v63  ;;  %822 = vmatprep.subr.bf16.mxu1 %v910_v50  ;;  %v156_v13 = vrot.slane %v151_v63, 4  ;;  %v909_v63 = vld [vmem:[#allocation9 + $0x98] sm:$0xff]  }
  0x6e   :  { %843 = vmatpush3.bf16.msra.mxu0 %v898_v18  ;;  %v160_v14 = vrot.slane %v158_v2, 7  ;;  %v169_v15 = vrot.slane %v167_v4, 7  ;;  %v304_v23 = vrot.slane %v302_v32, 4  ;;  %v303_v35 = vsel %vm1231_vm1, %v301_v52, %v302_v32 }
  0x6f   :  { %844 = vmatprep.subr.bf16.mxu0 %v899_v33  ;;  %v155_v17 = vsel %vm1200_vm11, %v147_v9, %v154_v10  ;;  %v184_v18 = vsel %vm1214_vm13, %v146_v8, %v183_v1  ;;  %v309_v41 = vsel %vm1231_vm1, %v301_v52, %v308_v34  ;;  %vm312_vm8 = vcmp.ne.s16.totalorder %v303_v35, 0  ;;  %v913_v8 = vld [vmem:[#allocation9 + $0xa8] sm:$0xff]   ;;  %v915_v10 = vld [vmem:[#allocation9 + $0xb0] sm:$0xff]  }
  0x70   :  { %185 = vst [vmem:[#allocation2] sm:$0xf] %v184_v18  ;;  %186 = vst [vmem:[#allocation2 + $0x4] sm:$0xf] %v155_v17  ;;  %v163_v19 = vor.u32 %v161_v3, %v160_v14  ;;  %v165_v20 = vrot.slane %v160_v14, 4  ;;  %v172_v21 = vor.u32 %v170_v7, %v169_v15  ;;  %v174_v22 = vrot.slane %v169_v15, 4  ;;  %823 = vmatpush3.bf16.msra.mxu1 %v910_v50 }
  0x71   :  { %824 = vmatprep.subr.bf16.mxu1 %v912_v12  ;;  %v306_v40 = vsel %vm1231_vm1, %v304_v23, %v1180_v36  ;;  %vm314_vm9 = vcmp.ne.s16.totalorder %v309_v41, 0  ;;  %vm588_vm10 = vcmask 1046528   ;;  %v911_v3 = vld [vmem:[#allocation9 + $0xa0] sm:$0xff]   ;;  %v310_v7 = vrot.slane %v308_v34, 4 }
  0x72   :  { %845 = vmatpush3.bf16.msra.mxu0 %v899_v33  ;;  %v164_v29 = vsel %vm1200_vm11, %v156_v13, %v163_v19  ;;  %v173_v30 = vsel %vm1200_vm11, %v165_v20, %v172_v21  ;;  %v190_v31 = vsel %vm1164_vm2, %v174_v22, %v189_v11  ;;  %v121_v33 = vpack.c.bf16 %v1191_v49, %v1189_v48  ;;  %vm270_vm2 = vmpackc.low %vm1208_vm12, %vm1208_vm12  ;;  %v907_v48 = vld [vmem:[#allocation9 + $0x90] sm:$0xff]   ;;  %v917_v13 = vld [vmem:[#allocation9 + $0xb8] sm:$0xff]  }
  0x73   :  { %846 = vmatprep.subr.bf16.mxu0 %v900_v47  ;;  %187 = vst [vmem:[#allocation2 + $0x8] sm:$0xf] %v164_v29  ;;  %188 = vst [vmem:[#allocation2 + $0xc] sm:$0xf] %v173_v30  ;;  %vm1288_vm7 = vcmp.ne.s16.totalorder %v306_v40, 0 }
  0x74   :  { %191 = vst [vmem:[#allocation2 + $0x10] sm:$0x1] %v190_v31  ;;  %825 = vmatpush3.bf16.msra.mxu1 %v912_v12  ;;  %v770_v21 = vld [vmem:[#allocation11] ss:$0 sm:$0xff] }
  0x75   :  { %826 = vmatprep.subr.bf16.mxu1 %v914_v26 }
  0x76   :  { %847 = vmatpush3.bf16.msra.mxu0 %v900_v47 }
  0x77   :  { %848 = vmatprep.subr.bf16.mxu0 %v901_v61  ;;  %v196_v42 = vld [vmem:[#allocation2] sm:$0xf]  ;;  %v197_v43 = vld [vmem:[#allocation2 + $0x4] sm:$0xf] }
  0x78   :  { %v200_v44 = vld [vmem:[#allocation2] sm:$0xe]  ;;  %827 = vmatpush3.bf16.msra.mxu1 %v914_v26  ;;  %v274_v45 = vsel %vm270_vm2, 0, %v196_v42  ;;  %v275_v46 = vsel %vm1168_vm4, 0, %v197_v43  ;;  %v201_v47 = vld [vmem:[#allocation2 + $0x4] sm:$0xf] }
  0x79   :  { %v316_v36 = vsel %vm311_vm5, 0, %v200_v44  ;;  %828 = vmatprep.subr.bf16.mxu1 %v916_v37  ;;  %v741_v49 = vcombine.low %v274_v45, %v275_v46  ;;  %v317_v51 = vsel %vm312_vm8, 0, %v201_v47 }
  0x7a   :  { %849 = vmatpush3.bf16.msra.mxu0 %v901_v61  ;;  %v198_v53 = vld [vmem:[#allocation2 + $0x8] sm:$0xf]  ;;  %v199_v54 = vld [vmem:[#allocation2 + $0xc] sm:$0xf]  ;;  %v759_v55 = vcombine.low %v316_v36, %v317_v51 }
  0x7b   :  { %854 = vmatprep.subr.bf16.mxu0 %v903_v25  ;;  %v193_v52 = vld [vmem:[#allocation2 + $0x10] sm:$0x1]  ;;  %830 = vmatprep.mubr.bf16.mxu1 %v741_v49  ;;  %v276_v57 = vsel %vm272_vm0, 0, %v198_v53  ;;  %v277_v58 = vsel %vm1168_vm4, 0, %v199_v54  ;;  %v202_v59 = vld [vmem:[#allocation2 + $0x8] sm:$0xf] }
  0x7c   :  { %v194_v56 = vsel %vm1272_vm6, 0, %v193_v52  ;;  %829 = vmatpush3.bf16.msra.mxu1 %v916_v37  ;;  %v742_v60 = vcombine.low %v276_v57, %v277_v58  ;;  %v203_v61 = vld [vmem:[#allocation2 + $0xc] sm:$0xf]  ;;  %v318_v62 = vsel %vm1288_vm7, 0, %v202_v59  ;;  %v589_v2 = vrot.slane %v759_v55, 1 }
  0x7d   :  { %851 = vmatmul.mubr.bf16.vlgmr.msra.gmra.mrb[0].mxu0 %v121_v33  ;;  %195 = vst [vmem:[#allocation2 + $0x10] sm:$0x1] %v194_v56  ;;  %v319_v0 = vsel %vm314_vm9, 0, %v203_v61  ;;  %vm315_vm4 = vcmp.ne.s16.totalorder %v310_v7, 0 }
  0x7e   :  { %855 = vmatpush3.bf16.msra.mxu0 %v903_v25  ;;  %v760_v1 = vcombine.low %v318_v62, %v319_v0 }
  0x7f   :  { %856 = vmatprep.subr.bf16.mxu0 %v905_v5  ;;  %831 = vmatmul.mubr.bf16.vlgmr.msra.gmra.mrb[0].mxu1 %v742_v60 }
  0x80   :  { %v590_v6 = vrot.slane %v760_v1, 1 }
  0x82   :  { %857 = vmatpush3.bf16.msra.mxu0 %v905_v5  ;;  %v591_v4 = vsel %vm588_vm10, %v589_v2, %v590_v6 }
  0x83   :  { %858 = vmatprep.subr.bf16.mxu0 %v907_v48  ;;  %870 = vmatprep.mubr.bf16.mxu0 %v591_v4 }
  0x84   :  { %v204_v9 = vld [vmem:[#allocation2 + $0x10] sm:$0x1] }
  0x85   :  { %v320_v11 = vsel %vm315_vm4, 0, %v204_v9 }
  0x86   :  { %859 = vmatpush3.bf16.msra.mxu0 %v907_v48  ;;  %v761_v12 = vcombine.low %v320_v11, %v320_v11 }
  0x87   :  { %860 = vmatprep.subr.bf16.mxu0 %v909_v63 }
  0x88   :  { %v592_v14 = vrot.slane %v761_v12, 1 }
  0x8a   :  { %861 = vmatpush3.bf16.msra.mxu0 %v909_v63  ;;  %v593_v15 = vsel %vm588_vm10, %v590_v6, %v592_v14 }
  0x8b   :  { %862 = vmatprep.subr.bf16.mxu0 %v911_v3 }
  0x8e   :  { %863 = vmatpush3.bf16.msra.mxu0 %v911_v3 }
  0x8f   :  { %864 = vmatprep.subr.bf16.mxu0 %v913_v8 }
  0x92   :  { %865 = vmatpush3.bf16.msra.mxu0 %v913_v8 }
  0x93   :  { %866 = vmatprep.subr.bf16.mxu0 %v915_v10 }
  0x96   :  { %867 = vmatpush3.bf16.msra.mxu0 %v915_v10 }
  0x97   :  { %868 = vmatprep.subr.bf16.mxu0 %v917_v13 }
  0x9a   :  { %869 = vmatpush3.bf16.msra.mxu0 %v917_v13 }
  0x9d   :  { %871 = vmatmul.mubr.bf16.vlgmr.msra.gmra.mrb[0].mxu0 %v593_v15 }
 0x152   :  { %v832_v16 = vpop.f32.mrb[0].mxu1 }
 0x153   :  { %v447_v17 = vpop.f32.mrb[1].mxu1 }
 0x154   :  { %v833_v18 = vpop.f32.mrb[2].mxu1 }
 0x155   :  { %v450_v19 = vpop.f32.mrb[3].mxu1 }
 0x170   :  { %v872_v20 = vpop.f32.mrb[0].mxu0 }
 0x171   :  { %v874_v22 = vadd.f32 %v872_v20, %v832_v16  ;;  %v678_v24 = vpop.f32.mrb[1].mxu0 }
 0x172   :  { %v875_v25 = vadd.f32 %v678_v24, %v447_v17  ;;  %v873_v26 = vpop.f32.mrb[2].mxu0 }
 0x173   :  { %v706_v27 = vadd.f32 %v874_v22, %v770_v21  ;;  %v876_v28 = vadd.f32 %v873_v26, %v833_v18  ;;  %v681_v29 = vpop.f32.mrb[3].mxu0 }
 0x174   :  { %v704_v30 = vadd.f32 %v875_v25, %v770_v21  ;;  %v877_v31 = vadd.f32 %v681_v29, %v450_v19 }
 0x175   :  { %v710_v32 = vmax.f32 %v706_v27, 0.0  ;;  %v707_v33 = vadd.f32 %v876_v28, %v770_v21 }
 0x176   :  { %v708_v34 = vmax.f32 %v704_v30, 0.0  ;;  %v705_v23 = vadd.f32 %v877_v31, %v770_v21 }
 0x177   :  { %714 = vst [vmem:[#allocation12 + $0x10] sm:$0xff] %v710_v32  ;;  %v711_v35 = vmax.f32 %v707_v33, 0.0 }
 0x178   :  { %712 = vst [vmem:[#allocation12] sm:$0xff] %v708_v34  ;;  %v709_v5 = vmax.f32 %v705_v23, 0.0 }
 0x179   :  { %715 = vst [vmem:[#allocation12 + $0x18] sm:$0xff] %v711_v35 }
 0x17a   :  { %713 = vst [vmem:[#allocation12 + $0x8] sm:$0xff] %v709_v5 }
 0x17b   :  { %1039 = shalt.err (!%p1036_p2)
}
 0x17c   :  { %s1040_s6 = scalar_lea.hbm %s1324_s5, 512 }
 0x17d   :  { %p1041_p3 = scmp.ne.s32.totalorder %s1324_s5, %s1040_s6  ;;  %p1044_p4 = scmp.lt.u32.totalorder %s1040_s6, %s1324_s5 }
 0x17f   :  { %p1046_p5 = pnand %p1044_p4, %p1041_p3 }
 0x181   :  { %1049 = shalt.err (!%p1046_p5)
}
 0x182   :  { %s1068_s12 = smov 128   ;;  %s1069_s13 = smov 8  }
 0x183   :  { %727 = dma.vmem_to_hbm [thread:$0]  %s722_s28, 512, %s1324_s5, [#allocation5], %s1068_s12, %s1068_s12, %s1069_s13  }
 0x184   :  { %1056 = dma.done.wait [#allocation5], 512  }
 0x185   :  { %1057 = vsyncadd [#allocation5], 4294966784 }
 0x186   :  { %731 = vsyncpa [#allocation4], 1 }
 0x187   :  { %732 = vsyncpa [#allocation7], 1 }
 0x188   :  { %733 = vsyncpa [#allocation10], 1 }
 0x189   :  { %734 = vsyncpa [#allocation5], 1 }

</bundles_post_ra>
